<compile_context>
chip_gen: v7x
topology: tpu7x:2x2x1
jax: 0.10.0
libtpu: 0.0.40
codegen_flags: <defaults>
</compile_context>

<pallas_src>
import jax
import jax.numpy as jnp
from jax.experimental import pallas as pl
from jax.experimental.pallas import tpu as pltpu

MID = 128  # LR-ASPP b0 hidden width (fixed by the module)


def _seghead_kernel(x_ref, w1_ref, shift_ref, w2_ref, b2_ref, o_ref):
    # x_ref:     (1, Cin, t_hw)     f32   input pixels, channels-first
    # w1_ref:    (128, Cin)         bf16  BN-scale-folded conv1 weight (transposed)
    # shift_ref: (128, 1)           f32   folded BN shift = beta - mean*scale
    # w2_ref:    (nclass, 128)      bf16  project conv weight (transposed)
    # b2_ref:    (nclass, 1)        f32   project conv bias
    # o_ref:     (1, nclass, t_hw)  f32
    x = x_ref[0].astype(jnp.bfloat16)                     # VPU cast in VMEM (no extra HBM pass)
    h = jnp.dot(w1_ref[...], x, preferred_element_type=jnp.float32)   # (128, t)
    h = jnp.maximum(h + shift_ref[...], 0.0)              # BN shift + ReLU in f32
    out = jnp.dot(w2_ref[...], h.astype(w2_ref.dtype),
                  preferred_element_type=jnp.float32) + b2_ref[...]   # (nclass, t)
    o_ref[0] = out.astype(o_ref.dtype)


def seghead_forward(x_nchw, params, *, t_hw=1024):
    """x_nchw: (N, Cin, H, W) float32. Returns (N, nclass, H, W) float32."""
    N, Cin, H, W = x_nchw.shape
    HW = H * W
    nclass = params["w2"].shape[1]

    # ---- host-side parameter prep (tiny tensors; fold BN scale into w1,
    #      transpose to channels-first orientation, cast matmul weights) ----
    w1t = (params["w1"] * params["bn_scale"]).T.astype(jnp.bfloat16)   # (128, Cin)
    shift = params["bn_shift"].reshape(MID, 1).astype(jnp.float32)     # (128, 1)
    w2t = params["w2"].T.astype(jnp.bfloat16)                          # (nclass, 128)
    b2 = params["b2"].reshape(nclass, 1).astype(jnp.float32)           # (nclass, 1)

    # NCHW -> (N, Cin, HW): free reshape, no transpose, NO dtype change
    # (the kernel reads x in its native dtype and casts per-tile in VMEM).
    x3d = x_nchw.reshape(N, Cin, HW)
    x_itemsize = jnp.dtype(x3d.dtype).itemsize

    # ---- spatial tile selection: multiple of 128 (lane-dense) or full HW ----
    max_t = max(128, (t_hw // 128) * 128)
    if N == 1 and HW > 256:
        # keep >= 2 HW tiles so both v7x TensorCores get work on the
        # ("parallel", "parallel") grid; single-TC chips are unaffected.
        max_t = max(128, min(max_t, ((HW // 2) // 128) * 128))
    t = HW if HW <= max_t else max_t
    n_hw = pl.cdiv(HW, t)

    # ---- per-step VMEM estimate; raise the scoped limit only if needed
    #      (default t=1024 stays under v5e's 16 MiB scoped default) ----
    vmem_est = (2 * Cin * t * x_itemsize        # double-buffered x tile
                + Cin * t * 2                   # in-kernel bf16 copy of the tile
                + MID * t * 4                   # h temp (f32)
                + 2 * MID * Cin * 2             # w1 buffers
                + 2 * max(8, nclass) * t * 4    # output buffers (f32)
                + (1 << 20))                    # slack for compiler internals
    vmem_limit = None
    if vmem_est > 12 * (1 << 20):
        # cap below v7x's 64 MiB physical VMEM
        vmem_limit = min(48 * (1 << 20), max(16 * (1 << 20), int(vmem_est * 1.25)))

    flops = 2 * N * HW * Cin * MID + 2 * N * HW * MID * nclass
    bytes_accessed = (x3d.size * x_itemsize + w1t.size * 2 + w2t.size * 2
                      + shift.size * 4 + b2.size * 4 + N * nclass * HW * 4)

    out3d = pl.pallas_call(
        _seghead_kernel,
        out_shape=jax.ShapeDtypeStruct((N, nclass, HW), jnp.float32),
        grid_spec=pltpu.PrefetchScalarGridSpec(
            num_scalar_prefetch=0,
            grid=(N, n_hw),
            in_specs=[
                pl.BlockSpec((1, Cin, t), lambda n, j: (n, 0, j)),
                pl.BlockSpec((MID, Cin), lambda n, j: (0, 0)),
                pl.BlockSpec((MID, 1), lambda n, j: (0, 0)),
                pl.BlockSpec((nclass, MID), lambda n, j: (0, 0)),
                pl.BlockSpec((nclass, 1), lambda n, j: (0, 0)),
            ],
            out_specs=pl.BlockSpec((1, nclass, t), lambda n, j: (n, 0, j)),
        ),
        compiler_params=pltpu.CompilerParams(
            dimension_semantics=("parallel", "parallel"),
            vmem_limit_bytes=vmem_limit),
        cost_estimate=pl.CostEstimate(
            flops=flops, transcendentals=0, bytes_accessed=bytes_accessed),
    )(x3d, w1t, shift, w2t, b2)

    return out3d.reshape(N, nclass, H, W)


def make_params(key, in_channels, nclass):
    k1, k2, k3, k4, k5, k6, k7 = jax.random.split(key, 7)
    mid = MID
    eps = 1e-5
    w1 = jax.random.normal(k1, (in_channels, mid), jnp.float32) * 0.02
    gamma = 1.0 + 0.1 * jax.random.normal(k2, (mid,), jnp.float32)
    beta = 0.1 * jax.random.normal(k3, (mid,), jnp.float32)
    running_mean = 0.1 * jax.random.normal(k4, (mid,), jnp.float32)
    running_var = jnp.abs(jax.random.normal(k5, (mid,), jnp.float32)) + 0.5
    w2 = jax.random.normal(k6, (mid, nclass), jnp.float32) * 0.02
    b2 = 0.1 * jax.random.normal(k7, (nclass,), jnp.float32)

    bn_scale = gamma / jnp.sqrt(running_var + eps)
    bn_shift = beta - running_mean * bn_scale
    return {
        "w1": w1,
        "bn_scale": bn_scale.reshape(1, mid),
        "bn_shift": bn_shift.reshape(1, mid),
        "w2": w2,
        "b2": b2.reshape(1, nclass),
    }


def seghead_reference_f32(x_nchw, params):
    # Pure f32 reference for the module semantics (eval-mode BN folded).
    N, Cin, H, W = x_nchw.shape
    nclass = params["w2"].shape[1]
    x2d = jnp.transpose(x_nchw, (0, 2, 3, 1)).reshape(-1, Cin)
    h = x2d @ params["w1"]
    h = jnp.maximum(h * params["bn_scale"] + params["bn_shift"], 0.0)
    o = h @ params["w2"] + params["b2"]
    return jnp.transpose(o.reshape(N, H, W, nclass), (0, 3, 1, 2))


def seghead_reference_bf16(x_nchw, params):
    # Reference mirroring the kernel's bf16-operand / f32-accumulation math.
    N, Cin, H, W = x_nchw.shape
    nclass = params["w2"].shape[1]
    w1s = (params["w1"] * params["bn_scale"]).astype(jnp.bfloat16)
    w2b = params["w2"].astype(jnp.bfloat16)
    x2d = jnp.transpose(x_nchw, (0, 2, 3, 1)).reshape(-1, Cin).astype(jnp.bfloat16)
    h = jnp.dot(x2d, w1s, preferred_element_type=jnp.float32) + params["bn_shift"]
    h = jnp.maximum(h, 0.0)
    o = (jnp.dot(h.astype(jnp.bfloat16), w2b, preferred_element_type=jnp.float32)
         + params["b2"])
    return jnp.transpose(o.reshape(N, H, W, nclass), (0, 3, 1, 2))


if __name__ == "__main__":
    # Small shapes consistent with the module (mode='large' => in_channels=960).
    N, Cin, H, W = 2, 960, 32, 32   # HW=1024 -> grid (N=2, HW tiles=1) at t_hw=1024
    nclass = 8

    key = jax.random.PRNGKey(0)
    kx, kp = jax.random.split(key)
    x = jax.random.normal(kx, (N, Cin, H, W), jnp.float32)
    params = make_params(kp, Cin, nclass)

    fwd = jax.jit(seghead_forward)
    out = jax.block_until_ready(fwd(x, params))
    assert out.shape == (N, nclass, H, W)

    # Tight check against a reference with identical bf16 rounding ...
    ref16 = seghead_reference_bf16(x, params)
    assert jnp.allclose(out, ref16, atol=5e-3, rtol=5e-3), float(
        jnp.max(jnp.abs(out - ref16)))
    # ... and a looser semantic check against the pure-f32 module math.
    ref32 = seghead_reference_f32(x, params)
    assert jnp.allclose(out, ref32, atol=3e-2, rtol=3e-2), float(
        jnp.max(jnp.abs(out - ref32)))

    print("KERNEL_OK")
</pallas_src>

<mosaic_0001>
module attributes {stable_mosaic.version = 11 : i64} {
  func.func @_seghead_kernel(%arg0: i32, %arg1: i32, %arg2: memref<1x960x1024xf32, #tpu.memory_space<vmem>>, %arg3: memref<128x960xbf16, #tpu.memory_space<vmem>>, %arg4: memref<128x1xf32, #tpu.memory_space<vmem>>, %arg5: memref<8x128xbf16, #tpu.memory_space<vmem>>, %arg6: memref<8x1xf32, #tpu.memory_space<vmem>>, %arg7: memref<1x8x1024xf32, #tpu.memory_space<vmem>>) attributes {dimension_semantics = [#tpu.dimension_semantics<parallel>, #tpu.dimension_semantics<parallel>], iteration_bounds = array<i64: 2, 1>, scalar_prefetch = 0 : i64, scratch_operands = 0 : i64, tpu.core_type = #tpu.core_type<tc>, window_params = [{transform_indices = @transform_0, window_bounds = array<i64: 1, 960, 1024>}, {pipeline_mode = #tpu.pipeline_mode<synchronous>, transform_indices = @transform_1, window_bounds = array<i64: 128, 960>}, {pipeline_mode = #tpu.pipeline_mode<synchronous>, transform_indices = @transform_2, window_bounds = array<i64: 128, 1>}, {pipeline_mode = #tpu.pipeline_mode<synchronous>, transform_indices = @transform_3, window_bounds = array<i64: 8, 128>}, {pipeline_mode = #tpu.pipeline_mode<synchronous>, transform_indices = @transform_4, window_bounds = array<i64: 8, 1>}, {transform_indices = @transform_5, window_bounds = array<i64: 1, 8, 1024>}]} {
    %c0 = arith.constant 0 : index
    %c0_0 = arith.constant 0 : index
    %c0_1 = arith.constant 0 : index
    %0 = vector.load %arg2[%c0, %c0_0, %c0_1] : memref<1x960x1024xf32, #tpu.memory_space<vmem>>, vector<1x960x1024xf32>
    %1 = vector.shape_cast %0 : vector<1x960x1024xf32> to vector<960x1024xf32>
    %2 = arith.truncf %1 : vector<960x1024xf32> to vector<960x1024xbf16>
    %c0_2 = arith.constant 0 : index
    %c0_3 = arith.constant 0 : index
    %3 = vector.load %arg3[%c0_2, %c0_3] : memref<128x960xbf16, #tpu.memory_space<vmem>>, vector<128x960xbf16>
    %cst = arith.constant dense<0.000000e+00> : vector<128x1024xf32>
    %4 = tpu.matmul %3, %2, %cst {dimension_numbers = #tpu.dot_dimension_numbers<[1], [0], [0], [1], [0, 0, 1, 1], [], []>} : vector<128x960xbf16>, vector<960x1024xbf16>, vector<128x1024xf32> -> vector<128x1024xf32>
    %c0_4 = arith.constant 0 : index
    %c0_5 = arith.constant 0 : index
    %5 = vector.load %arg4[%c0_4, %c0_5] : memref<128x1xf32, #tpu.memory_space<vmem>>, vector<128x1xf32>
    %6 = vector.broadcast %5 : vector<128x1xf32> to vector<128x1024xf32>
    %7 = arith.addf %4, %6 : vector<128x1024xf32>
    %cst_6 = arith.constant 0.000000e+00 : f32
    %8 = vector.broadcast %cst_6 : f32 to vector<128x1024xf32>
    %9 = arith.maximumf %7, %8 : vector<128x1024xf32>
    %c0_7 = arith.constant 0 : index
    %c0_8 = arith.constant 0 : index
    %10 = vector.load %arg5[%c0_7, %c0_8] : memref<8x128xbf16, #tpu.memory_space<vmem>>, vector<8x128xbf16>
    %11 = arith.truncf %9 : vector<128x1024xf32> to vector<128x1024xbf16>
    %cst_9 = arith.constant dense<0.000000e+00> : vector<8x1024xf32>
    %12 = tpu.matmul %10, %11, %cst_9 {dimension_numbers = #tpu.dot_dimension_numbers<[1], [0], [0], [1], [0, 0, 1, 1], [], []>} : vector<8x128xbf16>, vector<128x1024xbf16>, vector<8x1024xf32> -> vector<8x1024xf32>
    %c0_10 = arith.constant 0 : index
    %c0_11 = arith.constant 0 : index
    %13 = vector.load %arg6[%c0_10, %c0_11] : memref<8x1xf32, #tpu.memory_space<vmem>>, vector<8x1xf32>
    %14 = vector.broadcast %13 : vector<8x1xf32> to vector<8x1024xf32>
    %15 = arith.addf %12, %14 : vector<8x1024xf32>
    %c0_12 = arith.constant 0 : index
    %c0_13 = arith.constant 0 : index
    %c0_14 = arith.constant 0 : index
    %16 = vector.load %arg7[%c0_12, %c0_13, %c0_14] : memref<1x8x1024xf32, #tpu.memory_space<vmem>>, vector<1x8x1024xf32>
    %17 = vector.shape_cast %16 : vector<1x8x1024xf32> to vector<8x1024xf32>
    %18 = vector.shape_cast %15 : vector<8x1024xf32> to vector<1x8x1024xf32>
    tpu.vector_store %arg7[%c0_12, %c0_13, %c0_14], %18 {strides = array<i32>} : memref<1x8x1024xf32, #tpu.memory_space<vmem>>, vector<1x8x1024xf32>,
    return
  }
  func.func @transform_0(%arg0: i32, %arg1: i32) -> (i32, i32, i32) {
    %c0_i32 = arith.constant 0 : i32
    %c0_i32_0 = arith.constant 0 : i32
    return %arg0, %c0_i32, %arg1 : i32, i32, i32
  }
  func.func @transform_1(%arg0: i32, %arg1: i32) -> (i32, i32) {
    %c0_i32 = arith.constant 0 : i32
    %c0_i32_0 = arith.constant 0 : i32
    %c0_i32_1 = arith.constant 0 : i32
    return %c0_i32, %c0_i32_0 : i32, i32
  }
  func.func @transform_2(%arg0: i32, %arg1: i32) -> (i32, i32) {
    %c0_i32 = arith.constant 0 : i32
    %c0_i32_0 = arith.constant 0 : i32
    %c0_i32_1 = arith.constant 0 : i32
    return %c0_i32, %c0_i32_0 : i32, i32
  }
  func.func @transform_3(%arg0: i32, %arg1: i32) -> (i32, i32) {
    %c0_i32 = arith.constant 0 : i32
    %c0_i32_0 = arith.constant 0 : i32
    %c0_i32_1 = arith.constant 0 : i32
    return %c0_i32, %c0_i32_0 : i32, i32
  }
  func.func @transform_4(%arg0: i32, %arg1: i32) -> (i32, i32) {
    %c0_i32 = arith.constant 0 : i32
    %c0_i32_0 = arith.constant 0 : i32
    %c0_i32_1 = arith.constant 0 : i32
    return %c0_i32, %c0_i32_0 : i32, i32
  }
  func.func @transform_5(%arg0: i32, %arg1: i32) -> (i32, i32, i32) {
    %c0_i32 = arith.constant 0 : i32
    %c0_i32_0 = arith.constant 0 : i32
    return %arg0, %c0_i32, %arg1 : i32, i32, i32
  }
}

</mosaic_0001>

<bundles_post_ra>
// kernel: seghead_forward.1
= control target key start
LH: loop header
LB: loop body
LE: loop exit
PB: predicated region body
PF: predicated region fallthrough
CT: control target
= control target key end

     0   :  { %s5170_s18 = smov 0   ;;  %s5172_s19 = smov 0   ;;  %s7112_s0 = inlined_call_operand.vmem [shape: f32[2,960,1024], index: 0, kind: input, shape index: {}]   ;;  %s7113_s1 = inlined_call_operand.vmem [shape: bf16[128,960], index: 1, kind: input, shape index: {}]   ;;  %s7114_s2 = inlined_call_operand.vmem [shape: f32[128,1], index: 2, kind: input, shape index: {}]   ;;  %s7115_s3 = inlined_call_operand.vmem [shape: bf16[8,128], index: 3, kind: input, shape index: {}]   ;;  %s7116_s4 = inlined_call_operand.vmem [shape: f32[8,1], index: 4, kind: input, shape index: {}]   ;;  %s7117_s5 = inlined_call_operand.vmem [shape: f32[2,8,1024], index: 5, kind: output, shape index: {}]  }
   0x1   :  { %s5174_s20 = smov 0  }
   0x2 LB: > { %s27_s21 = sadd.s32 1, %s5133_s19  ;;  %p4472_p0 = scmp.ge.s32.totalorder %s5137_s20, 1  ;;  %s5137_s20 = sphi %s5174_s20, %s15_s20   ;;  %s5133_s19 = sphi %s5172_s19, %s7210_s19   ;;  %s5129_s18 = sphi %s5170_s18, %s7209_s18  }
   0x3   : > { %p29_p1 = scmp.ge.s32.totalorder %s27_s21, 2  ;;  %p208_p2 = scmp.lt.s32.totalorder %s5137_s20, 3 }
   0x5   : > { %s7212_s21 = smov (%p29_p1, %s27_s21), 0  ;;  %p209_p3 = pnand %p4472_p0, %p208_p2 }
   0x7   : > { %212 = sbr.rel (%p209_p3) target bundleno = 1034 (0x40a), region = 40 }
   0xe   : > { %p245_p4 = scmp.lt.s32.totalorder %s5129_s18, 1  ;;  %v1705_v0 = vld [vmem:[%s7113_s1] sm:$0xff]  ;;  %vm2177_vm0 = vcmask 523264  }
   0xf   : > { %v1709_v1 = vld [vmem:[%s7113_s1 + $0x20] sm:$0xff] }
  0x10   : > { %v5194_v2 = vcombine.high %v1705_v0, %v1709_v1  ;;  %v5196_v3 = vcombine.low %v1705_v0, %v1709_v1  ;;  %s7214_s18 = smov (!%p245_p4, %s5129_s18), 1 }
  0x11   : > { %s5087_s26 = smul.u32 7680, %s7214_s18  ;;  %s4574_s28 = sshll.u32 %s7214_s18, 6 }
  0x12   : > { %2234 = vmatprep.mubr.bf16.mxu0 %v5194_v2  ;;  %2686 = vmatprep.mubr.bf16.mxu1 %v5194_v2  ;;  %s7091_s7 = scalar_lea.vmem %s7117_s5, %s4574_s28 }
  0x13   : > { %s5206_s29 = scalar_lea.vmem %s7112_s0, %s5087_s26 }
  0x14   : > { %v266_v4 = vld [vmem:[%s5206_s29 + $0x8] sm:$0xff]  ;;  %v268_v6 = vld [vmem:[%s5206_s29 + $0x18] sm:$0xff]  ;;  %v265_v9 = vld [vmem:[%s5206_s29] sm:$0xff] }
  0x15   : > { %v274_v5 = vld [vmem:[%s5206_s29 + $0x48] sm:$0xff]  ;;  %v276_v8 = vld [vmem:[%s5206_s29 + $0x58] sm:$0xff]  ;;  %v273_v10 = vld [vmem:[%s5206_s29 + $0x40] sm:$0xff] }
  0x16   : > { %v1226_v7 = vpack.c.bf16 %v274_v5, %v266_v4  ;;  %v1228_v11 = vpack.c.bf16 %v276_v8, %v268_v6  ;;  %v1225_v12 = vpack.c.bf16 %v273_v10, %v265_v9  ;;  %v267_v13 = vld [vmem:[%s5206_s29 + $0x10] sm:$0xff]  ;;  %v282_v15 = vld [vmem:[%s5206_s29 + $0x88] sm:$0xff]  ;;  %v284_v18 = vld [vmem:[%s5206_s29 + $0x98] sm:$0xff] }
  0x17   : > { %v275_v14 = vld [vmem:[%s5206_s29 + $0x50] sm:$0xff]  ;;  %v290_v17 = vld [vmem:[%s5206_s29 + $0xc8] sm:$0xff]  ;;  %v292_v19 = vld [vmem:[%s5206_s29 + $0xd8] sm:$0xff] }
  0x18   : > { %2202 = vmatprep.subr.bf16.mxu0 %v1226_v7  ;;  %v1227_v16 = vpack.c.bf16 %v275_v14, %v267_v13  ;;  %2654 = vmatprep.subr.bf16.mxu1 %v1228_v11  ;;  %v1234_v20 = vpack.c.bf16 %v290_v17, %v282_v15  ;;  %v1236_v21 = vpack.c.bf16 %v292_v19, %v284_v18  ;;  %v281_v22 = vld [vmem:[%s5206_s29 + $0x80] sm:$0xff]  ;;  %v283_v24 = vld [vmem:[%s5206_s29 + $0x90] sm:$0xff]  ;;  %v298_v27 = vld [vmem:[%s5206_s29 + $0x108] sm:$0xff] }
  0x19   : > { %2203 = vmatpush1.bf16.msra.mxu0 %v1225_v12  ;;  %v289_v23 = vld [vmem:[%s5206_s29 + $0xc0] sm:$0xff]  ;;  %v291_v26 = vld [vmem:[%s5206_s29 + $0xd0] sm:$0xff]  ;;  %v306_v28 = vld [vmem:[%s5206_s29 + $0x148] sm:$0xff] }
  0x1a   : > { %2655 = vmatpush1.bf16.msra.mxu1 %v1227_v16  ;;  %v1233_v25 = vpack.c.bf16 %v289_v23, %v281_v22  ;;  %2204 = vmatprep.subr.bf16.mxu0 %v1234_v20  ;;  %v1235_v29 = vpack.c.bf16 %v291_v26, %v283_v24  ;;  %v1242_v30 = vpack.c.bf16 %v306_v28, %v298_v27  ;;  %v300_v31 = vld [vmem:[%s5206_s29 + $0x118] sm:$0xff]  ;;  %v297_v33 = vld [vmem:[%s5206_s29 + $0x100] sm:$0xff]  ;;  %v299_v36 = vld [vmem:[%s5206_s29 + $0x110] sm:$0xff] }
  0x1b   : > { %2656 = vmatprep.subr.bf16.mxu1 %v1236_v21  ;;  %v308_v32 = vld [vmem:[%s5206_s29 + $0x158] sm:$0xff]  ;;  %v305_v35 = vld [vmem:[%s5206_s29 + $0x140] sm:$0xff]  ;;  %v307_v37 = vld [vmem:[%s5206_s29 + $0x150] sm:$0xff] }
  0x1c   : > { %v1244_v34 = vpack.c.bf16 %v308_v32, %v300_v31  ;;  %v1241_v38 = vpack.c.bf16 %v305_v35, %v297_v33  ;;  %v314_v39 = vld [vmem:[%s5206_s29 + $0x188] sm:$0xff]  ;;  %v316_v41 = vld [vmem:[%s5206_s29 + $0x198] sm:$0xff]  ;;  %v1243_v42 = vpack.c.bf16 %v307_v37, %v299_v36  ;;  %v313_v45 = vld [vmem:[%s5206_s29 + $0x180] sm:$0xff] }
  0x1d   : > { %2205 = vmatpush1.bf16.msra.mxu0 %v1233_v25  ;;  %v322_v40 = vld [vmem:[%s5206_s29 + $0x1c8] sm:$0xff]  ;;  %v324_v44 = vld [vmem:[%s5206_s29 + $0x1d8] sm:$0xff]  ;;  %v321_v46 = vld [vmem:[%s5206_s29 + $0x1c0] sm:$0xff] }
  0x1e   : > { %2657 = vmatpush1.bf16.msra.mxu1 %v1235_v29  ;;  %2206 = vmatprep.subr.bf16.mxu0 %v1242_v30  ;;  %v1250_v43 = vpack.c.bf16 %v322_v40, %v314_v39  ;;  %v1252_v47 = vpack.c.bf16 %v324_v44, %v316_v41  ;;  %v315_v48 = vld [vmem:[%s5206_s29 + $0x190] sm:$0xff]  ;;  %v330_v50 = vld [vmem:[%s5206_s29 + $0x208] sm:$0xff]  ;;  %v332_v52 = vld [vmem:[%s5206_s29 + $0x218] sm:$0xff]  ;;  %v1249_v54 = vpack.c.bf16 %v321_v46, %v313_v45 }
  0x1f   : > { %2658 = vmatprep.subr.bf16.mxu1 %v1244_v34  ;;  %v323_v49 = vld [vmem:[%s5206_s29 + $0x1d0] sm:$0xff]  ;;  %v338_v51 = vld [vmem:[%s5206_s29 + $0x248] sm:$0xff]  ;;  %v340_v53 = vld [vmem:[%s5206_s29 + $0x258] sm:$0xff] }
  0x20   : > { %v1251_v55 = vpack.c.bf16 %v323_v49, %v315_v48  ;;  %v1258_v56 = vpack.c.bf16 %v338_v51, %v330_v50  ;;  %v329_v57 = vld [vmem:[%s5206_s29 + $0x200] sm:$0xff]  ;;  %v331_v59 = vld [vmem:[%s5206_s29 + $0x210] sm:$0xff]  ;;  %v1260_v60 = vpack.c.bf16 %v340_v53, %v332_v52  ;;  %v346_v62 = vld [vmem:[%s5206_s29 + $0x288] sm:$0xff] }
  0x21   : > { %2207 = vmatpush1.bf16.msra.mxu0 %v1241_v38  ;;  %v337_v58 = vld [vmem:[%s5206_s29 + $0x240] sm:$0xff]  ;;  %v339_v61 = vld [vmem:[%s5206_s29 + $0x250] sm:$0xff]  ;;  %v354_v63 = vld [vmem:[%s5206_s29 + $0x2c8] sm:$0xff] }
  0x22   : > { %2659 = vmatpush1.bf16.msra.mxu1 %v1243_v42  ;;  %2208 = vmatprep.subr.bf16.mxu0 %v1250_v43  ;;  %v348_v0 = vld [vmem:[%s5206_s29 + $0x298] sm:$0xff]  ;;  %v1257_v4 = vpack.c.bf16 %v337_v58, %v329_v57  ;;  %v1259_v5 = vpack.c.bf16 %v339_v61, %v331_v59  ;;  %v1266_v6 = vpack.c.bf16 %v354_v63, %v346_v62  ;;  %v345_v7 = vld [vmem:[%s5206_s29 + $0x280] sm:$0xff]  ;;  %v347_v9 = vld [vmem:[%s5206_s29 + $0x290] sm:$0xff] }
  0x23   : > { %2660 = vmatprep.subr.bf16.mxu1 %v1252_v47  ;;  %v356_v1 = vld [vmem:[%s5206_s29 + $0x2d8] sm:$0xff]  ;;  %v353_v8 = vld [vmem:[%s5206_s29 + $0x2c0] sm:$0xff]  ;;  %v355_v11 = vld [vmem:[%s5206_s29 + $0x2d0] sm:$0xff] }
  0x24   : > { %v1268_v10 = vpack.c.bf16 %v356_v1, %v348_v0  ;;  %v362_v12 = vld [vmem:[%s5206_s29 + $0x308] sm:$0xff]  ;;  %v364_v14 = vld [vmem:[%s5206_s29 + $0x318] sm:$0xff]  ;;  %v1265_v16 = vpack.c.bf16 %v353_v8, %v345_v7  ;;  %v1267_v17 = vpack.c.bf16 %v355_v11, %v347_v9  ;;  %v361_v19 = vld [vmem:[%s5206_s29 + $0x300] sm:$0xff] }
  0x25   : > { %2209 = vmatpush1.bf16.msra.mxu0 %v1249_v54  ;;  %v370_v13 = vld [vmem:[%s5206_s29 + $0x348] sm:$0xff]  ;;  %v372_v15 = vld [vmem:[%s5206_s29 + $0x358] sm:$0xff]  ;;  %v369_v20 = vld [vmem:[%s5206_s29 + $0x340] sm:$0xff] }
  0x26   : > { %2661 = vmatpush1.bf16.msra.mxu1 %v1251_v55  ;;  %2210 = vmatprep.subr.bf16.mxu0 %v1258_v56  ;;  %v1274_v18 = vpack.c.bf16 %v370_v13, %v362_v12  ;;  %v363_v21 = vld [vmem:[%s5206_s29 + $0x310] sm:$0xff]  ;;  %v1276_v22 = vpack.c.bf16 %v372_v15, %v364_v14  ;;  %v378_v24 = vld [vmem:[%s5206_s29 + $0x388] sm:$0xff]  ;;  %v380_v26 = vld [vmem:[%s5206_s29 + $0x398] sm:$0xff]  ;;  %v1273_v28 = vpack.c.bf16 %v369_v20, %v361_v19 }
  0x27   : > { %2662 = vmatprep.subr.bf16.mxu1 %v1260_v60  ;;  %v371_v23 = vld [vmem:[%s5206_s29 + $0x350] sm:$0xff]  ;;  %v386_v25 = vld [vmem:[%s5206_s29 + $0x3c8] sm:$0xff]  ;;  %v388_v27 = vld [vmem:[%s5206_s29 + $0x3d8] sm:$0xff] }
  0x28   : > { %v1275_v29 = vpack.c.bf16 %v371_v23, %v363_v21  ;;  %v1282_v30 = vpack.c.bf16 %v386_v25, %v378_v24  ;;  %v377_v31 = vld [vmem:[%s5206_s29 + $0x380] sm:$0xff]  ;;  %v379_v33 = vld [vmem:[%s5206_s29 + $0x390] sm:$0xff]  ;;  %v1284_v34 = vpack.c.bf16 %v388_v27, %v380_v26  ;;  %v394_v36 = vld [vmem:[%s5206_s29 + $0x408] sm:$0xff] }
  0x29   : > { %2211 = vmatpush1.bf16.msra.mxu0 %v1257_v4  ;;  %v385_v32 = vld [vmem:[%s5206_s29 + $0x3c0] sm:$0xff]  ;;  %v387_v35 = vld [vmem:[%s5206_s29 + $0x3d0] sm:$0xff]  ;;  %v402_v37 = vld [vmem:[%s5206_s29 + $0x448] sm:$0xff] }
  0x2a   : > { %2663 = vmatpush1.bf16.msra.mxu1 %v1259_v5  ;;  %2212 = vmatprep.subr.bf16.mxu0 %v1266_v6  ;;  %v396_v38 = vld [vmem:[%s5206_s29 + $0x418] sm:$0xff]  ;;  %v1281_v40 = vpack.c.bf16 %v385_v32, %v377_v31  ;;  %v1283_v41 = vpack.c.bf16 %v387_v35, %v379_v33  ;;  %v1290_v42 = vpack.c.bf16 %v402_v37, %v394_v36  ;;  %v393_v43 = vld [vmem:[%s5206_s29 + $0x400] sm:$0xff]  ;;  %v395_v45 = vld [vmem:[%s5206_s29 + $0x410] sm:$0xff] }
  0x2b   : > { %2664 = vmatprep.subr.bf16.mxu1 %v1268_v10  ;;  %v404_v39 = vld [vmem:[%s5206_s29 + $0x458] sm:$0xff]  ;;  %v401_v44 = vld [vmem:[%s5206_s29 + $0x440] sm:$0xff]  ;;  %v403_v47 = vld [vmem:[%s5206_s29 + $0x450] sm:$0xff] }
  0x2c   : > { %v1292_v46 = vpack.c.bf16 %v404_v39, %v396_v38  ;;  %v410_v48 = vld [vmem:[%s5206_s29 + $0x488] sm:$0xff]  ;;  %v412_v50 = vld [vmem:[%s5206_s29 + $0x498] sm:$0xff]  ;;  %v1289_v52 = vpack.c.bf16 %v401_v44, %v393_v43  ;;  %v1291_v53 = vpack.c.bf16 %v403_v47, %v395_v45  ;;  %v409_v55 = vld [vmem:[%s5206_s29 + $0x480] sm:$0xff] }
  0x2d   : > { %2213 = vmatpush1.bf16.msra.mxu0 %v1265_v16  ;;  %v418_v49 = vld [vmem:[%s5206_s29 + $0x4c8] sm:$0xff]  ;;  %v420_v51 = vld [vmem:[%s5206_s29 + $0x4d8] sm:$0xff]  ;;  %v417_v56 = vld [vmem:[%s5206_s29 + $0x4c0] sm:$0xff] }
  0x2e   : > { %2665 = vmatpush1.bf16.msra.mxu1 %v1267_v17  ;;  %2214 = vmatprep.subr.bf16.mxu0 %v1274_v18  ;;  %v1298_v54 = vpack.c.bf16 %v418_v49, %v410_v48  ;;  %v411_v57 = vld [vmem:[%s5206_s29 + $0x490] sm:$0xff]  ;;  %v1300_v58 = vpack.c.bf16 %v420_v51, %v412_v50  ;;  %v426_v60 = vld [vmem:[%s5206_s29 + $0x508] sm:$0xff]  ;;  %v428_v62 = vld [vmem:[%s5206_s29 + $0x518] sm:$0xff]  ;;  %v1297_v0 = vpack.c.bf16 %v417_v56, %v409_v55 }
  0x2f   : > { %2666 = vmatprep.subr.bf16.mxu1 %v1276_v22  ;;  %v419_v59 = vld [vmem:[%s5206_s29 + $0x4d0] sm:$0xff]  ;;  %v434_v61 = vld [vmem:[%s5206_s29 + $0x548] sm:$0xff]  ;;  %v436_v63 = vld [vmem:[%s5206_s29 + $0x558] sm:$0xff] }
  0x30   : > { %v1299_v1 = vpack.c.bf16 %v419_v59, %v411_v57  ;;  %v1306_v4 = vpack.c.bf16 %v434_v61, %v426_v60  ;;  %v425_v5 = vld [vmem:[%s5206_s29 + $0x500] sm:$0xff]  ;;  %v427_v7 = vld [vmem:[%s5206_s29 + $0x510] sm:$0xff]  ;;  %v1308_v8 = vpack.c.bf16 %v436_v63, %v428_v62  ;;  %v442_v10 = vld [vmem:[%s5206_s29 + $0x588] sm:$0xff] }
  0x31   : > { %2215 = vmatpush1.bf16.msra.mxu0 %v1273_v28  ;;  %v433_v6 = vld [vmem:[%s5206_s29 + $0x540] sm:$0xff]  ;;  %v435_v9 = vld [vmem:[%s5206_s29 + $0x550] sm:$0xff]  ;;  %v450_v11 = vld [vmem:[%s5206_s29 + $0x5c8] sm:$0xff] }
  0x32   : > { %2667 = vmatpush1.bf16.msra.mxu1 %v1275_v29  ;;  %2216 = vmatprep.subr.bf16.mxu0 %v1282_v30  ;;  %v444_v12 = vld [vmem:[%s5206_s29 + $0x598] sm:$0xff]  ;;  %v1305_v14 = vpack.c.bf16 %v433_v6, %v425_v5  ;;  %v1307_v15 = vpack.c.bf16 %v435_v9, %v427_v7  ;;  %v1314_v16 = vpack.c.bf16 %v450_v11, %v442_v10  ;;  %v441_v17 = vld [vmem:[%s5206_s29 + $0x580] sm:$0xff]  ;;  %v443_v19 = vld [vmem:[%s5206_s29 + $0x590] sm:$0xff] }
  0x33   : > { %2668 = vmatprep.subr.bf16.mxu1 %v1284_v34  ;;  %v452_v13 = vld [vmem:[%s5206_s29 + $0x5d8] sm:$0xff]  ;;  %v449_v18 = vld [vmem:[%s5206_s29 + $0x5c0] sm:$0xff]  ;;  %v451_v21 = vld [vmem:[%s5206_s29 + $0x5d0] sm:$0xff] }
  0x34   : > { %v1316_v20 = vpack.c.bf16 %v452_v13, %v444_v12  ;;  %v458_v22 = vld [vmem:[%s5206_s29 + $0x608] sm:$0xff]  ;;  %v460_v24 = vld [vmem:[%s5206_s29 + $0x618] sm:$0xff]  ;;  %v1313_v26 = vpack.c.bf16 %v449_v18, %v441_v17  ;;  %v1315_v27 = vpack.c.bf16 %v451_v21, %v443_v19  ;;  %v457_v29 = vld [vmem:[%s5206_s29 + $0x600] sm:$0xff] }
  0x35   : > { %2217 = vmatpush1.bf16.msra.mxu0 %v1281_v40  ;;  %v466_v23 = vld [vmem:[%s5206_s29 + $0x648] sm:$0xff]  ;;  %v468_v25 = vld [vmem:[%s5206_s29 + $0x658] sm:$0xff]  ;;  %v465_v30 = vld [vmem:[%s5206_s29 + $0x640] sm:$0xff] }
  0x36   : > { %2669 = vmatpush1.bf16.msra.mxu1 %v1283_v41  ;;  %2218 = vmatprep.subr.bf16.mxu0 %v1290_v42  ;;  %v1322_v28 = vpack.c.bf16 %v466_v23, %v458_v22  ;;  %v459_v31 = vld [vmem:[%s5206_s29 + $0x610] sm:$0xff]  ;;  %v1324_v32 = vpack.c.bf16 %v468_v25, %v460_v24  ;;  %v474_v34 = vld [vmem:[%s5206_s29 + $0x688] sm:$0xff]  ;;  %v476_v36 = vld [vmem:[%s5206_s29 + $0x698] sm:$0xff]  ;;  %v1321_v38 = vpack.c.bf16 %v465_v30, %v457_v29 }
  0x37   : > { %2670 = vmatprep.subr.bf16.mxu1 %v1292_v46  ;;  %v467_v33 = vld [vmem:[%s5206_s29 + $0x650] sm:$0xff]  ;;  %v482_v35 = vld [vmem:[%s5206_s29 + $0x6c8] sm:$0xff]  ;;  %v484_v37 = vld [vmem:[%s5206_s29 + $0x6d8] sm:$0xff] }
  0x38   : > { %v1323_v39 = vpack.c.bf16 %v467_v33, %v459_v31  ;;  %v1330_v40 = vpack.c.bf16 %v482_v35, %v474_v34  ;;  %v473_v41 = vld [vmem:[%s5206_s29 + $0x680] sm:$0xff]  ;;  %v475_v43 = vld [vmem:[%s5206_s29 + $0x690] sm:$0xff]  ;;  %v1332_v44 = vpack.c.bf16 %v484_v37, %v476_v36  ;;  %v490_v46 = vld [vmem:[%s5206_s29 + $0x708] sm:$0xff] }
  0x39   : > { %2219 = vmatpush1.bf16.msra.mxu0 %v1289_v52  ;;  %v481_v42 = vld [vmem:[%s5206_s29 + $0x6c0] sm:$0xff]  ;;  %v483_v45 = vld [vmem:[%s5206_s29 + $0x6d0] sm:$0xff]  ;;  %v498_v47 = vld [vmem:[%s5206_s29 + $0x748] sm:$0xff] }
  0x3a   : > { %2671 = vmatpush1.bf16.msra.mxu1 %v1291_v53  ;;  %2220 = vmatprep.subr.bf16.mxu0 %v1298_v54  ;;  %v492_v48 = vld [vmem:[%s5206_s29 + $0x718] sm:$0xff]  ;;  %v1329_v50 = vpack.c.bf16 %v481_v42, %v473_v41  ;;  %v1331_v51 = vpack.c.bf16 %v483_v45, %v475_v43  ;;  %v1338_v52 = vpack.c.bf16 %v498_v47, %v490_v46  ;;  %v489_v53 = vld [vmem:[%s5206_s29 + $0x700] sm:$0xff]  ;;  %v491_v55 = vld [vmem:[%s5206_s29 + $0x710] sm:$0xff] }
  0x3b   : > { %2672 = vmatprep.subr.bf16.mxu1 %v1300_v58  ;;  %v500_v49 = vld [vmem:[%s5206_s29 + $0x758] sm:$0xff]  ;;  %v497_v54 = vld [vmem:[%s5206_s29 + $0x740] sm:$0xff]  ;;  %v499_v57 = vld [vmem:[%s5206_s29 + $0x750] sm:$0xff] }
  0x3c   : > { %v1340_v56 = vpack.c.bf16 %v500_v49, %v492_v48  ;;  %v506_v58 = vld [vmem:[%s5206_s29 + $0x788] sm:$0xff]  ;;  %v508_v60 = vld [vmem:[%s5206_s29 + $0x798] sm:$0xff]  ;;  %v1337_v62 = vpack.c.bf16 %v497_v54, %v489_v53  ;;  %v1339_v63 = vpack.c.bf16 %v499_v57, %v491_v55  ;;  %v507_v5 = vld [vmem:[%s5206_s29 + $0x790] sm:$0xff] }
  0x3d   : > { %2221 = vmatpush1.bf16.msra.mxu0 %v1297_v0  ;;  %v514_v59 = vld [vmem:[%s5206_s29 + $0x7c8] sm:$0xff]  ;;  %v516_v61 = vld [vmem:[%s5206_s29 + $0x7d8] sm:$0xff]  ;;  %v515_v7 = vld [vmem:[%s5206_s29 + $0x7d0] sm:$0xff] }
  0x3e   : > { %2673 = vmatpush1.bf16.msra.mxu1 %v1299_v1  ;;  %2222 = vmatprep.subr.bf16.mxu0 %v1306_v4  ;;  %v1346_v0 = vpack.c.bf16 %v514_v59, %v506_v58  ;;  %v505_v1 = vld [vmem:[%s5206_s29 + $0x780] sm:$0xff]  ;;  %v1348_v6 = vpack.c.bf16 %v516_v61, %v508_v60  ;;  %v530_v9 = vld [vmem:[%s5206_s29 + $0x848] sm:$0xff]  ;;  %v524_v10 = vld [vmem:[%s5206_s29 + $0x818] sm:$0xff]  ;;  %v1347_v13 = vpack.c.bf16 %v515_v7, %v507_v5 }
  0x3f   : > { %2674 = vmatprep.subr.bf16.mxu1 %v1308_v8  ;;  %v513_v4 = vld [vmem:[%s5206_s29 + $0x7c0] sm:$0xff]  ;;  %v522_v8 = vld [vmem:[%s5206_s29 + $0x808] sm:$0xff]  ;;  %v532_v11 = vld [vmem:[%s5206_s29 + $0x858] sm:$0xff] }
  0x40   : > { %v1345_v12 = vpack.c.bf16 %v513_v4, %v505_v1  ;;  %v523_v17 = vld [vmem:[%s5206_s29 + $0x810] sm:$0xff]  ;;  %v1713_v18 = vld [vmem:[%s7113_s1 + $0x40] sm:$0xff]  ;;  %v1356_v19 = vpack.c.bf16 %v532_v11, %v524_v10  ;;  %v538_v21 = vld [vmem:[%s5206_s29 + $0x888] sm:$0xff] }
  0x41   : > { %2223 = vmatpush1.bf16.msra.mxu0 %v1305_v14  ;;  %v1354_v14 = vpack.c.bf16 %v530_v9, %v522_v8  ;;  %v546_v22 = vld [vmem:[%s5206_s29 + $0x8c8] sm:$0xff]  ;;  %v540_v23 = vld [vmem:[%s5206_s29 + $0x898] sm:$0xff]  ;;  %v1717_v25 = vld [vmem:[%s7113_s1 + $0x60] sm:$0xff] }
  0x42   : > { %2675 = vmatpush1.bf16.msra.mxu1 %v1307_v15  ;;  %2224 = vmatprep.subr.bf16.mxu0 %v1314_v16  ;;  %v521_v15 = vld [vmem:[%s5206_s29 + $0x800] sm:$0xff]  ;;  %v548_v24 = vld [vmem:[%s5206_s29 + $0x8d8] sm:$0xff]  ;;  %v539_v31 = vld [vmem:[%s5206_s29 + $0x890] sm:$0xff]  ;;  %v5358_v34 = vcombine.high %v1713_v18, %v1717_v25 }
  0x43   : > { %2676 = vmatprep.subr.bf16.mxu1 %v1316_v20  ;;  %v529_v16 = vld [vmem:[%s5206_s29 + $0x840] sm:$0xff]  ;;  %v531_v20 = vld [vmem:[%s5206_s29 + $0x850] sm:$0xff]  ;;  %v554_v35 = vld [vmem:[%s5206_s29 + $0x908] sm:$0xff] }
  0x44   : > { %v537_v29 = vld [vmem:[%s5206_s29 + $0x880] sm:$0xff]  ;;  %v547_v33 = vld [vmem:[%s5206_s29 + $0x8d0] sm:$0xff]  ;;  %v562_v36 = vld [vmem:[%s5206_s29 + $0x948] sm:$0xff] }
  0x45   : > { %2225 = vmatpush1.bf16.msra.mxu0 %v1313_v26  ;;  %v1353_v26 = vpack.c.bf16 %v529_v16, %v521_v15  ;;  %v545_v30 = vld [vmem:[%s5206_s29 + $0x8c0] sm:$0xff]  ;;  %v556_v37 = vld [vmem:[%s5206_s29 + $0x918] sm:$0xff]  ;;  %v1370_v41 = vpack.c.bf16 %v562_v36, %v554_v35  ;;  %v563_v47 = vld [vmem:[%s5206_s29 + $0x950] sm:$0xff] }
  0x46   : > { %2677 = vmatpush1.bf16.msra.mxu1 %v1315_v27  ;;  %2226 = vmatprep.subr.bf16.mxu0 %v1322_v28  ;;  %v1355_v27 = vpack.c.bf16 %v531_v20, %v523_v17  ;;  %v1362_v28 = vpack.c.bf16 %v546_v22, %v538_v21  ;;  %v553_v42 = vld [vmem:[%s5206_s29 + $0x900] sm:$0xff]  ;;  %v570_v48 = vld [vmem:[%s5206_s29 + $0x988] sm:$0xff]  ;;  %v571_v59 = vld [vmem:[%s5206_s29 + $0x990] sm:$0xff] }
  0x47   : > { %2678 = vmatprep.subr.bf16.mxu1 %v1324_v32  ;;  %v1364_v32 = vpack.c.bf16 %v548_v24, %v540_v23  ;;  %v561_v43 = vld [vmem:[%s5206_s29 + $0x940] sm:$0xff]  ;;  %v578_v49 = vld [vmem:[%s5206_s29 + $0x9c8] sm:$0xff]  ;;  %v579_v61 = vld [vmem:[%s5206_s29 + $0x9d0] sm:$0xff] }
  0x48   : > { %v1721_v45 = vld [vmem:[%s7113_s1 + $0x80] sm:$0xff]  ;;  %v1369_v54 = vpack.c.bf16 %v561_v43, %v553_v42  ;;  %v588_v1 = vld [vmem:[%s5206_s29 + $0xa18] sm:$0xff]  ;;  %v587_v10 = vld [vmem:[%s5206_s29 + $0xa10] sm:$0xff] }
  0x49   : > { %2227 = vmatpush1.bf16.msra.mxu0 %v1321_v38  ;;  %v564_v38 = vld [vmem:[%s5206_s29 + $0x958] sm:$0xff]  ;;  %v1725_v53 = vld [vmem:[%s7113_s1 + $0xa0] sm:$0xff]  ;;  %v610_v15 = vld [vmem:[%s5206_s29 + $0xac8] sm:$0xff] }
  0x4a   : > { %2679 = vmatpush1.bf16.msra.mxu1 %v1323_v39  ;;  %2228 = vmatprep.subr.bf16.mxu0 %v1330_v40  ;;  %v1361_v39 = vpack.c.bf16 %v545_v30, %v537_v29  ;;  %v1363_v40 = vpack.c.bf16 %v547_v33, %v539_v31  ;;  %v1372_v46 = vpack.c.bf16 %v564_v38, %v556_v37  ;;  %v569_v57 = vld [vmem:[%s5206_s29 + $0x980] sm:$0xff]  ;;  %v596_v4 = vld [vmem:[%s5206_s29 + $0xa58] sm:$0xff]  ;;  %v618_v29 = vld [vmem:[%s5206_s29 + $0xb08] sm:$0xff] }
  0x4b   : > { %2680 = vmatprep.subr.bf16.mxu1 %v1332_v44  ;;  %v555_v44 = vld [vmem:[%s5206_s29 + $0x910] sm:$0xff]  ;;  %v577_v58 = vld [vmem:[%s5206_s29 + $0x9c0] sm:$0xff]  ;;  %v5407_v16 = vcombine.low %v1721_v45, %v1725_v53  ;;  %v604_v17 = vld [vmem:[%s5206_s29 + $0xa98] sm:$0xff] }
  0x4c   : > { %v1371_v55 = vpack.c.bf16 %v563_v47, %v555_v44  ;;  %v1377_v5 = vpack.c.bf16 %v577_v58, %v569_v57  ;;  %v585_v8 = vld [vmem:[%s5206_s29 + $0xa00] sm:$0xff]  ;;  %v626_v30 = vld [vmem:[%s5206_s29 + $0xb48] sm:$0xff]  ;;  %v620_v31 = vld [vmem:[%s5206_s29 + $0xb18] sm:$0xff] }
  0x4d   : > { %2229 = vmatpush1.bf16.msra.mxu0 %v1329_v50  ;;  %v5377_v50 = vcombine.low %v1713_v18, %v1717_v25  ;;  %v593_v9 = vld [vmem:[%s5206_s29 + $0xa40] sm:$0xff]  ;;  %v612_v18 = vld [vmem:[%s5206_s29 + $0xad8] sm:$0xff]  ;;  %v603_v25 = vld [vmem:[%s5206_s29 + $0xa90] sm:$0xff]  ;;  %v1402_v36 = vpack.c.bf16 %v626_v30, %v618_v29 }
  0x4e   : > { %2681 = vmatpush1.bf16.msra.mxu1 %v1331_v51  ;;  %2230 = vmatprep.subr.bf16.mxu0 %v1338_v52  ;;  %v572_v51 = vld [vmem:[%s5206_s29 + $0x998] sm:$0xff]  ;;  %v1729_v11 = vld [vmem:[%s7113_s1 + $0xc0] sm:$0xff]  ;;  %v1385_v20 = vpack.c.bf16 %v593_v9, %v585_v8  ;;  %v627_v42 = vld [vmem:[%s5206_s29 + $0xb50] sm:$0xff] }
  0x4f   : > { %2682 = vmatprep.subr.bf16.mxu1 %v1340_v56  ;;  %v580_v52 = vld [vmem:[%s5206_s29 + $0x9d8] sm:$0xff]  ;;  %v1378_v56 = vpack.c.bf16 %v578_v49, %v570_v48  ;;  %v601_v23 = vld [vmem:[%s5206_s29 + $0xa80] sm:$0xff]  ;;  %v634_v43 = vld [vmem:[%s5206_s29 + $0xb88] sm:$0xff] }
  0x50   : > { %v1380_v60 = vpack.c.bf16 %v580_v52, %v572_v51  ;;  %v609_v24 = vld [vmem:[%s5206_s29 + $0xac0] sm:$0xff]  ;;  %v642_v44 = vld [vmem:[%s5206_s29 + $0xbc8] sm:$0xff]  ;;  %v644_v47 = vld [vmem:[%s5206_s29 + $0xbd8] sm:$0xff] }
  0x51   : > { %2231 = vmatpush1.bf16.msra.mxu0 %v1337_v62  ;;  %v5388_v62 = vcombine.high %v1721_v45, %v1725_v53  ;;  %v1393_v33 = vpack.c.bf16 %v609_v24, %v601_v23  ;;  %v617_v37 = vld [vmem:[%s5206_s29 + $0xb00] sm:$0xff]  ;;  %v1410_v52 = vpack.c.bf16 %v642_v44, %v634_v43  ;;  %v643_v57 = vld [vmem:[%s5206_s29 + $0xbd0] sm:$0xff]  ;;  %v690_v29 = vld [vmem:[%s5206_s29 + $0xd48] sm:$0xff] }
  0x52   : > { %2683 = vmatpush1.bf16.msra.mxu1 %v1339_v63  ;;  %2232 = vmatprep.subr.bf16.mxu0 %v1346_v0  ;;  %v586_v63 = vld [vmem:[%s5206_s29 + $0xa08] sm:$0xff]  ;;  %v625_v38 = vld [vmem:[%s5206_s29 + $0xb40] sm:$0xff]  ;;  %v667_v23 = vld [vmem:[%s5206_s29 + $0xc90] sm:$0xff] }
  0x53   : > { %2684 = vmatprep.subr.bf16.mxu1 %v1348_v6  ;;  %v594_v0 = vld [vmem:[%s5206_s29 + $0xa48] sm:$0xff]  ;;  %v1379_v6 = vpack.c.bf16 %v579_v61, %v571_v59  ;;  %v1741_v48 = vld [vmem:[%s7113_s1 + $0x120] sm:$0xff]  ;;  %v1401_v49 = vpack.c.bf16 %v625_v38, %v617_v37  ;;  %v652_v61 = vld [vmem:[%s5206_s29 + $0xc18] sm:$0xff] }
  0x54   : > { %v1386_v7 = vpack.c.bf16 %v594_v0, %v586_v63  ;;  %v633_v53 = vld [vmem:[%s5206_s29 + $0xb80] sm:$0xff]  ;;  %v650_v59 = vld [vmem:[%s5206_s29 + $0xc08] sm:$0xff]  ;;  %v660_v63 = vld [vmem:[%s5206_s29 + $0xc58] sm:$0xff] }
  0x55   : > { %2233 = vmatpush1.bf16.msra.mxu0 %v1345_v12  ;;  %v1388_v12 = vpack.c.bf16 %v596_v4, %v588_v1  ;;  %v1745_v8 = vld [vmem:[%s7113_s1 + $0x140] sm:$0xff]  ;;  %v1420_v9 = vpack.c.bf16 %v660_v63, %v652_v61  ;;  %v684_v30 = vld [vmem:[%s5206_s29 + $0xd18] sm:$0xff]  ;;  %v683_v38 = vld [vmem:[%s5206_s29 + $0xd10] sm:$0xff] }
  0x56   : > { %2685 = vmatpush1.bf16.msra.mxu1 %v1347_v13  ;;  %2315 = vmatprep.subr.bf16.mxu0 %v1354_v14  ;;  %v595_v13 = vld [vmem:[%s5206_s29 + $0xa50] sm:$0xff]  ;;  %v602_v14 = vld [vmem:[%s5206_s29 + $0xa88] sm:$0xff]  ;;  %v689_v37 = vld [vmem:[%s5206_s29 + $0xd40] sm:$0xff] }
  0x57   : > { %2767 = vmatprep.subr.bf16.mxu1 %v1356_v19  ;;  %v1733_v19 = vld [vmem:[%s7113_s1 + $0xe0] sm:$0xff]  ;;  %v1387_v21 = vpack.c.bf16 %v595_v13, %v587_v10  ;;  %v1394_v22 = vpack.c.bf16 %v610_v15, %v602_v14  ;;  %v659_v10 = vld [vmem:[%s5206_s29 + $0xc50] sm:$0xff]  ;;  %v668_v14 = vld [vmem:[%s5206_s29 + $0xc98] sm:$0xff] }
  0x58   : > { %2235 = vmatmul.mubr.bf16.vlgmr.msra.gmra.mrb[0].mxu0 %v5196_v3  ;;  %v5437_v45 = vcombine.low %v1729_v11, %v1733_v19  ;;  %v676_v15 = vld [vmem:[%s5206_s29 + $0xcd8] sm:$0xff]  ;;  %v706_v43 = vld [vmem:[%s5206_s29 + $0xdc8] sm:$0xff] }
  0x59   : > { %2687 = vmatmul.mubr.bf16.vlgmr.msra.gmra.mrb[0].mxu1 %v5196_v3  ;;  %2316 = vmatpush1.bf16.msra.mxu0 %v1353_v26  ;;  %v1396_v26 = vpack.c.bf16 %v612_v18, %v604_v17  ;;  %v1749_v17 = vld [vmem:[%s7113_s1 + $0x160] sm:$0xff]  ;;  %v1428_v24 = vpack.c.bf16 %v676_v15, %v668_v14  ;;  %v722_v61 = vld [vmem:[%s5206_s29 + $0xe48] sm:$0xff]  ;;  %v716_v63 = vld [vmem:[%s5206_s29 + $0xe18] sm:$0xff] }
  0x5a   : > { %2768 = vmatpush1.bf16.msra.mxu1 %v1355_v27  ;;  %2317 = vmatprep.subr.bf16.mxu0 %v1362_v28  ;;  %v611_v27 = vld [vmem:[%s5206_s29 + $0xad0] sm:$0xff]  ;;  %v5418_v28 = vcombine.high %v1729_v11, %v1733_v19  ;;  %v666_v11 = vld [vmem:[%s5206_s29 + $0xc88] sm:$0xff]  ;;  %v5497_v44 = vcombine.low %v1745_v8, %v1749_v17 }
  0x5b   : > { %2769 = vmatprep.subr.bf16.mxu1 %v1364_v32  ;;  %2244 = vmatprep.mubr.bf16.mxu0 %v5358_v34  ;;  %v628_v32 = vld [vmem:[%s5206_s29 + $0xb58] sm:$0xff]  ;;  %v1395_v35 = vpack.c.bf16 %v611_v27, %v603_v25  ;;  %v675_v25 = vld [vmem:[%s5206_s29 + $0xcd0] sm:$0xff]  ;;  %v682_v27 = vld [vmem:[%s5206_s29 + $0xd08] sm:$0xff] }
  0x5c   : > { %2696 = vmatprep.mubr.bf16.mxu1 %v5358_v34  ;;  %v738_v14 = vld [vmem:[%s5206_s29 + $0xec8] sm:$0xff] }
  0x5d   : > { %2318 = vmatpush1.bf16.msra.mxu0 %v1361_v39  ;;  %v619_v39 = vld [vmem:[%s5206_s29 + $0xb10] sm:$0xff] }
  0x5e   : > { %2770 = vmatpush1.bf16.msra.mxu1 %v1363_v40  ;;  %2319 = vmatprep.subr.bf16.mxu0 %v1370_v41  ;;  %v1737_v40 = vld [vmem:[%s7113_s1 + $0x100] sm:$0xff]  ;;  %v1404_v41 = vpack.c.bf16 %v628_v32, %v620_v31  ;;  %v1403_v51 = vpack.c.bf16 %v627_v42, %v619_v39  ;;  %v692_v31 = vld [vmem:[%s5206_s29 + $0xd58] sm:$0xff]  ;;  %v698_v42 = vld [vmem:[%s5206_s29 + $0xd88] sm:$0xff] }
  0x5f   : > { %2771 = vmatprep.subr.bf16.mxu1 %v1372_v46  ;;  %v636_v46 = vld [vmem:[%s5206_s29 + $0xb98] sm:$0xff]  ;;  %v5448_v58 = vcombine.high %v1737_v40, %v1741_v48  ;;  %v5467_v13 = vcombine.low %v1737_v40, %v1741_v48  ;;  %v1753_v39 = vld [vmem:[%s7113_s1 + $0x180] sm:$0xff]  ;;  %v1436_v40 = vpack.c.bf16 %v692_v31, %v684_v30  ;;  %v746_v31 = vld [vmem:[%s5206_s29 + $0xf08] sm:$0xff] }
  0x60   : > { %2245 = vmatmul.mubr.bf16.gmra.mrb[4].mxu0 %v5377_v50  ;;  %v1757_v48 = vld [vmem:[%s7113_s1 + $0x1a0] sm:$0xff] }
  0x61   : > { %2697 = vmatmul.mubr.bf16.gmra.mrb[4].mxu1 %v5377_v50  ;;  %2320 = vmatpush1.bf16.msra.mxu0 %v1369_v54  ;;  %v641_v54 = vld [vmem:[%s5206_s29 + $0xbc0] sm:$0xff]  ;;  %v5527_v15 = vcombine.low %v1753_v39, %v1757_v48 }
  0x62   : > { %2772 = vmatpush1.bf16.msra.mxu1 %v1371_v55  ;;  %2321 = vmatprep.subr.bf16.mxu0 %v1378_v56  ;;  %v635_v55 = vld [vmem:[%s5206_s29 + $0xb90] sm:$0xff]  ;;  %v1412_v56 = vpack.c.bf16 %v644_v47, %v636_v46  ;;  %v1409_v0 = vpack.c.bf16 %v641_v54, %v633_v53  ;;  %v700_v46 = vld [vmem:[%s5206_s29 + $0xd98] sm:$0xff]  ;;  %v697_v53 = vld [vmem:[%s5206_s29 + $0xd80] sm:$0xff] }
  0x63   : > { %2773 = vmatprep.subr.bf16.mxu1 %v1380_v60  ;;  %2254 = vmatprep.mubr.bf16.mxu0 %v5388_v62  ;;  %v658_v60 = vld [vmem:[%s5206_s29 + $0xc48] sm:$0xff]  ;;  %v1411_v1 = vpack.c.bf16 %v643_v57, %v635_v55  ;;  %v708_v47 = vld [vmem:[%s5206_s29 + $0xdd8] sm:$0xff]  ;;  %v705_v54 = vld [vmem:[%s5206_s29 + $0xdc0] sm:$0xff] }
  0x64   : > { %2706 = vmatprep.mubr.bf16.mxu1 %v5388_v62  ;;  %v1418_v4 = vpack.c.bf16 %v658_v60, %v650_v59  ;;  %v699_v55 = vld [vmem:[%s5206_s29 + $0xd90] sm:$0xff]  ;;  %v5508_v59 = vcombine.high %v1753_v39, %v1757_v48  ;;  %v714_v60 = vld [vmem:[%s5206_s29 + $0xe08] sm:$0xff]  ;;  %v764_v48 = vld [vmem:[%s5206_s29 + $0xf98] sm:$0xff] }
  0x65   : > { %2322 = vmatpush1.bf16.msra.mxu0 %v1377_v5  ;;  %v649_v5 = vld [vmem:[%s5206_s29 + $0xc00] sm:$0xff]  ;;  %v707_v57 = vld [vmem:[%s5206_s29 + $0xdd0] sm:$0xff] }
  0x66   : > { %2774 = vmatpush1.bf16.msra.mxu1 %v1379_v6  ;;  %2323 = vmatprep.subr.bf16.mxu0 %v1386_v7  ;;  %v657_v6 = vld [vmem:[%s5206_s29 + $0xc40] sm:$0xff]  ;;  %v651_v7 = vld [vmem:[%s5206_s29 + $0xc10] sm:$0xff] }
  0x67   : > { %2775 = vmatprep.subr.bf16.mxu1 %v1388_v12  ;;  %v674_v12 = vld [vmem:[%s5206_s29 + $0xcc8] sm:$0xff]  ;;  %v1417_v18 = vpack.c.bf16 %v657_v6, %v649_v5  ;;  %v1419_v19 = vpack.c.bf16 %v659_v10, %v651_v7  ;;  %v1450_v5 = vpack.c.bf16 %v722_v61, %v714_v60  ;;  %v713_v6 = vld [vmem:[%s5206_s29 + $0xe00] sm:$0xff]  ;;  %v763_v61 = vld [vmem:[%s5206_s29 + $0xf90] sm:$0xff] }
  0x68   : > { %2255 = vmatmul.mubr.bf16.gmra.mrb[8].mxu0 %v5407_v16  ;;  %v721_v7 = vld [vmem:[%s5206_s29 + $0xe40] sm:$0xff] }
  0x69   : > { %2707 = vmatmul.mubr.bf16.gmra.mrb[8].mxu1 %v5407_v16  ;;  %2324 = vmatpush1.bf16.msra.mxu0 %v1385_v20  ;;  %v1426_v20 = vpack.c.bf16 %v674_v12, %v666_v11  ;;  %v723_v11 = vld [vmem:[%s5206_s29 + $0xe50] sm:$0xff]  ;;  %v730_v12 = vld [vmem:[%s5206_s29 + $0xe88] sm:$0xff]  ;;  %v769_v60 = vld [vmem:[%s5206_s29 + $0xfc0] sm:$0xff] }
  0x6a   : > { %2776 = vmatpush1.bf16.msra.mxu1 %v1387_v21  ;;  %2325 = vmatprep.subr.bf16.mxu0 %v1394_v22  ;;  %v665_v21 = vld [vmem:[%s5206_s29 + $0xc80] sm:$0xff] }
  0x6b   : > { %2777 = vmatprep.subr.bf16.mxu1 %v1396_v26  ;;  %2264 = vmatprep.mubr.bf16.mxu0 %v5418_v28  ;;  %v673_v22 = vld [vmem:[%s5206_s29 + $0xcc0] sm:$0xff]  ;;  %v5478_v26 = vcombine.high %v1745_v8, %v1749_v17  ;;  %v715_v8 = vld [vmem:[%s5206_s29 + $0xe10] sm:$0xff]  ;;  %v732_v17 = vld [vmem:[%s5206_s29 + $0xe98] sm:$0xff] }
  0x6c   : > { %2716 = vmatprep.mubr.bf16.mxu1 %v5418_v28  ;;  %v1425_v32 = vpack.c.bf16 %v673_v22, %v665_v21  ;;  %v1451_v21 = vpack.c.bf16 %v723_v11, %v715_v8  ;;  %v1458_v22 = vpack.c.bf16 %v738_v14, %v730_v12  ;;  %v785_v12 = vld [vmem:[%s5206_s29 + $0x1040] sm:$0xff]  ;;  %v779_v14 = vld [vmem:[%s5206_s29 + $0x1010] sm:$0xff] }
  0x6d   : > { %2326 = vmatpush1.bf16.msra.mxu0 %v1393_v33  ;;  %v1427_v33 = vpack.c.bf16 %v675_v25, %v667_v23  ;;  %v729_v23 = vld [vmem:[%s5206_s29 + $0xe80] sm:$0xff]  ;;  %v731_v25 = vld [vmem:[%s5206_s29 + $0xe90] sm:$0xff] }
  0x6e   : > { %2778 = vmatpush1.bf16.msra.mxu1 %v1395_v35  ;;  %2327 = vmatprep.subr.bf16.mxu0 %v1402_v36  ;;  %v1434_v35 = vpack.c.bf16 %v690_v29, %v682_v27  ;;  %v681_v36 = vld [vmem:[%s5206_s29 + $0xd00] sm:$0xff]  ;;  %v739_v29 = vld [vmem:[%s5206_s29 + $0xed0] sm:$0xff] }
  0x6f   : > { %2779 = vmatprep.subr.bf16.mxu1 %v1404_v41  ;;  %v691_v41 = vld [vmem:[%s5206_s29 + $0xd50] sm:$0xff] }
  0x70   : > { %2265 = vmatmul.mubr.bf16.gmra.mrb[12].mxu0 %v5437_v45 }
  0x71   : > { %2717 = vmatmul.mubr.bf16.gmra.mrb[12].mxu1 %v5437_v45  ;;  %2328 = vmatpush1.bf16.msra.mxu0 %v1401_v49  ;;  %v1433_v49 = vpack.c.bf16 %v689_v37, %v681_v36  ;;  %v745_v37 = vld [vmem:[%s5206_s29 + $0xf00] sm:$0xff] }
  0x72   : > { %2780 = vmatpush1.bf16.msra.mxu1 %v1403_v51  ;;  %2329 = vmatprep.subr.bf16.mxu0 %v1410_v52  ;;  %v1435_v51 = vpack.c.bf16 %v691_v41, %v683_v38  ;;  %v1442_v52 = vpack.c.bf16 %v706_v43, %v698_v42  ;;  %v1459_v38 = vpack.c.bf16 %v739_v29, %v731_v25  ;;  %v747_v41 = vld [vmem:[%s5206_s29 + $0xf10] sm:$0xff]  ;;  %v1718_v25 = vld [vmem:[%s7113_s1 + $0x68] sm:$0xff] }
  0x73   : > { %2781 = vmatprep.subr.bf16.mxu1 %v1412_v56  ;;  %2274 = vmatprep.mubr.bf16.mxu0 %v5448_v58  ;;  %v1444_v56 = vpack.c.bf16 %v708_v47, %v700_v46  ;;  %v755_v42 = vld [vmem:[%s5206_s29 + $0xf50] sm:$0xff]  ;;  %v762_v46 = vld [vmem:[%s5206_s29 + $0xf88] sm:$0xff] }
  0x74   : > { %2726 = vmatprep.mubr.bf16.mxu1 %v5448_v58  ;;  %v770_v47 = vld [vmem:[%s5206_s29 + $0xfc8] sm:$0xff] }
  0x75   : > { %2330 = vmatpush1.bf16.msra.mxu0 %v1409_v0  ;;  %v724_v0 = vld [vmem:[%s5206_s29 + $0xe58] sm:$0xff] }
  0x76   : > { %2782 = vmatpush1.bf16.msra.mxu1 %v1411_v1  ;;  %2331 = vmatprep.subr.bf16.mxu0 %v1418_v4  ;;  %v1441_v1 = vpack.c.bf16 %v705_v54, %v697_v53  ;;  %v1443_v4 = vpack.c.bf16 %v707_v57, %v699_v55  ;;  %v1452_v10 = vpack.c.bf16 %v724_v0, %v716_v63  ;;  %v1710_v53 = vld [vmem:[%s7113_s1 + $0x28] sm:$0xff]  ;;  %v761_v57 = vld [vmem:[%s5206_s29 + $0xf80] sm:$0xff]  ;;  %v771_v0 = vld [vmem:[%s5206_s29 + $0xfd0] sm:$0xff] }
  0x77   : > { %2783 = vmatprep.subr.bf16.mxu1 %v1420_v9  ;;  %v1761_v9 = vld [vmem:[%s7113_s1 + $0x1c0] sm:$0xff]  ;;  %v1467_v55 = vpack.c.bf16 %v755_v42, %v747_v41  ;;  %v1473_v8 = vpack.c.bf16 %v769_v60, %v761_v57  ;;  %v812_v41 = vld [vmem:[%s5206_s29 + $0x1118] sm:$0xff] }
  0x78   : > { %2275 = vmatmul.mubr.bf16.gmra.mrb[16].mxu0 %v5467_v13  ;;  %v820_v42 = vld [vmem:[%s5206_s29 + $0x1158] sm:$0xff] }
  0x79   : > { %2727 = vmatmul.mubr.bf16.gmra.mrb[16].mxu1 %v5467_v13  ;;  %2332 = vmatpush1.bf16.msra.mxu0 %v1417_v18  ;;  %v740_v18 = vld [vmem:[%s5206_s29 + $0xed8] sm:$0xff] }
  0x7a   : > { %2784 = vmatpush1.bf16.msra.mxu1 %v1419_v19  ;;  %2333 = vmatprep.subr.bf16.mxu0 %v1426_v20  ;;  %v1765_v19 = vld [vmem:[%s7113_s1 + $0x1e0] sm:$0xff]  ;;  %v1449_v20 = vpack.c.bf16 %v721_v7, %v713_v6  ;;  %v1460_v27 = vpack.c.bf16 %v740_v18, %v732_v17  ;;  %v780_v6 = vld [vmem:[%s5206_s29 + $0x1018] sm:$0xff]  ;;  %v787_v17 = vld [vmem:[%s5206_s29 + $0x1050] sm:$0xff] }
  0x7b   : > { %2785 = vmatprep.subr.bf16.mxu1 %v1428_v24  ;;  %2284 = vmatprep.mubr.bf16.mxu0 %v5478_v26  ;;  %v737_v24 = vld [vmem:[%s5206_s29 + $0xec0] sm:$0xff]  ;;  %v5538_v30 = vcombine.high %v1761_v9, %v1765_v19  ;;  %v788_v7 = vld [vmem:[%s5206_s29 + $0x1058] sm:$0xff]  ;;  %v1483_v29 = vpack.c.bf16 %v787_v17, %v779_v14  ;;  %v842_v14 = vld [vmem:[%s5206_s29 + $0x1208] sm:$0xff] }
  0x7c   : > { %2736 = vmatprep.mubr.bf16.mxu1 %v5478_v26  ;;  %v1457_v36 = vpack.c.bf16 %v737_v24, %v729_v23  ;;  %v1484_v18 = vpack.c.bf16 %v788_v7, %v780_v6  ;;  %v804_v23 = vld [vmem:[%s5206_s29 + $0x10d8] sm:$0xff]  ;;  %v1714_v24 = vld [vmem:[%s7113_s1 + $0x48] sm:$0xff]  ;;  %v825_v7 = vld [vmem:[%s5206_s29 + $0x1180] sm:$0xff] }
  0x7d   : > { %2334 = vmatpush1.bf16.msra.mxu0 %v1425_v32  ;;  %v754_v32 = vld [vmem:[%s5206_s29 + $0xf48] sm:$0xff]  ;;  %v828_v57 = vld [vmem:[%s5206_s29 + $0x1198] sm:$0xff]  ;;  %v5615_v60 = vcombine.low %v1714_v24, %v1718_v25 }
  0x7e   : > { %2786 = vmatpush1.bf16.msra.mxu1 %v1427_v33  ;;  %2335 = vmatprep.subr.bf16.mxu0 %v1434_v35  ;;  %v748_v33 = vld [vmem:[%s5206_s29 + $0xf18] sm:$0xff]  ;;  %v1466_v39 = vpack.c.bf16 %v754_v32, %v746_v31  ;;  %v793_v32 = vld [vmem:[%s5206_s29 + $0x1080] sm:$0xff]  ;;  %v850_v17 = vld [vmem:[%s5206_s29 + $0x1248] sm:$0xff] }
  0x7f   : > { %2787 = vmatprep.subr.bf16.mxu1 %v1436_v40  ;;  %v756_v35 = vld [vmem:[%s5206_s29 + $0xf58] sm:$0xff]  ;;  %v753_v40 = vld [vmem:[%s5206_s29 + $0xf40] sm:$0xff] }
  0x80   : > { %2285 = vmatmul.mubr.bf16.gmra.mrb[20].mxu0 %v5497_v44  ;;  %v1468_v43 = vpack.c.bf16 %v756_v35, %v748_v33  ;;  %v1465_v54 = vpack.c.bf16 %v753_v40, %v745_v37  ;;  %v801_v33 = vld [vmem:[%s5206_s29 + $0x10c0] sm:$0xff]  ;;  %v795_v35 = vld [vmem:[%s5206_s29 + $0x1090] sm:$0xff]  ;;  %v818_v40 = vld [vmem:[%s5206_s29 + $0x1148] sm:$0xff] }
  0x81   : > { %2737 = vmatmul.mubr.bf16.gmra.mrb[20].mxu1 %v5497_v44  ;;  %2336 = vmatpush1.bf16.msra.mxu0 %v1433_v49  ;;  %v5555_v49 = vcombine.low %v1761_v9, %v1765_v19  ;;  %v777_v9 = vld [vmem:[%s5206_s29 + $0x1000] sm:$0xff]  ;;  %v794_v19 = vld [vmem:[%s5206_s29 + $0x1088] sm:$0xff]  ;;  %v803_v37 = vld [vmem:[%s5206_s29 + $0x10d0] sm:$0xff] }
  0x82   : > { %2788 = vmatpush1.bf16.msra.mxu1 %v1435_v51  ;;  %2337 = vmatprep.subr.bf16.mxu0 %v1442_v52  ;;  %v772_v51 = vld [vmem:[%s5206_s29 + $0xfd8] sm:$0xff]  ;;  %v1706_v52 = vld [vmem:[%s7113_s1 + $0x8] sm:$0xff] }
  0x83   : > { %2789 = vmatprep.subr.bf16.mxu1 %v1444_v56  ;;  %2294 = vmatprep.mubr.bf16.mxu0 %v5508_v59  ;;  %v1474_v56 = vpack.c.bf16 %v770_v47, %v762_v46  ;;  %v1476_v63 = vpack.c.bf16 %v772_v51, %v764_v48  ;;  %v809_v46 = vld [vmem:[%s5206_s29 + $0x1100] sm:$0xff]  ;;  %v1491_v47 = vpack.c.bf16 %v803_v37, %v795_v35  ;;  %v860_v35 = vld [vmem:[%s5206_s29 + $0x1298] sm:$0xff] }
  0x84   : > { %2746 = vmatprep.mubr.bf16.mxu1 %v5508_v59  ;;  %v817_v51 = vld [vmem:[%s5206_s29 + $0x1140] sm:$0xff]  ;;  %v868_v37 = vld [vmem:[%s5206_s29 + $0x12d8] sm:$0xff] }
  0x85   : > { %2338 = vmatpush1.bf16.msra.mxu0 %v1441_v1  ;;  %v5568_v1 = vcombine.high %v1706_v52, %v1710_v53 }
  0x86   : > { %2790 = vmatpush1.bf16.msra.mxu1 %v1443_v4  ;;  %2339 = vmatprep.subr.bf16.mxu0 %v1450_v5  ;;  %v778_v4 = vld [vmem:[%s5206_s29 + $0x1008] sm:$0xff] }
  0x87   : > { %2791 = vmatprep.subr.bf16.mxu1 %v1452_v10  ;;  %v786_v5 = vld [vmem:[%s5206_s29 + $0x1048] sm:$0xff]  ;;  %v1475_v10 = vpack.c.bf16 %v771_v0, %v763_v61  ;;  %v836_v61 = vld [vmem:[%s5206_s29 + $0x11d8] sm:$0xff] }
  0x88   : > { %2295 = vmatmul.mubr.bf16.gmra.mrb[24].mxu0 %v5527_v15  ;;  %v1482_v11 = vpack.c.bf16 %v786_v5, %v778_v4  ;;  %v1726_v0 = vld [vmem:[%s7113_s1 + $0xa8] sm:$0xff]  ;;  %v1497_v4 = vpack.c.bf16 %v817_v51, %v809_v46  ;;  %v857_v46 = vld [vmem:[%s5206_s29 + $0x1280] sm:$0xff]  ;;  %v1524_v51 = vpack.c.bf16 %v868_v37, %v860_v35  ;;  %v908_v37 = vld [vmem:[%s5206_s29 + $0x1418] sm:$0xff] }
  0x89   : > { %2747 = vmatmul.mubr.bf16.gmra.mrb[24].mxu1 %v5527_v15  ;;  %2340 = vmatpush1.bf16.msra.mxu0 %v1449_v20  ;;  %v802_v20 = vld [vmem:[%s5206_s29 + $0x10c8] sm:$0xff] }
  0x8a   : > { %2792 = vmatpush1.bf16.msra.mxu1 %v1451_v21  ;;  %2341 = vmatprep.subr.bf16.mxu0 %v1458_v22  ;;  %v796_v21 = vld [vmem:[%s5206_s29 + $0x1098] sm:$0xff]  ;;  %v5584_v22 = vcombine.low %v1706_v52, %v1710_v53  ;;  %v1490_v31 = vpack.c.bf16 %v802_v20, %v794_v19  ;;  %v811_v52 = vld [vmem:[%s5206_s29 + $0x1110] sm:$0xff]  ;;  %v914_v35 = vld [vmem:[%s5206_s29 + $0x1448] sm:$0xff] }
  0x8b   : > { %2793 = vmatprep.subr.bf16.mxu1 %v1460_v27  ;;  %2304 = vmatprep.mubr.bf16.mxu0 %v5538_v30  ;;  %v1481_v27 = vpack.c.bf16 %v785_v12, %v777_v9  ;;  %v819_v53 = vld [vmem:[%s5206_s29 + $0x1150] sm:$0xff]  ;;  %v852_v19 = vld [vmem:[%s5206_s29 + $0x1258] sm:$0xff] }
  0x8c   : > { %2756 = vmatprep.mubr.bf16.mxu1 %v5538_v30  ;;  %v1499_v5 = vpack.c.bf16 %v819_v53, %v811_v52  ;;  %v827_v9 = vld [vmem:[%s5206_s29 + $0x1190] sm:$0xff] }
  0x8d   : > { %2342 = vmatpush1.bf16.msra.mxu0 %v1457_v36  ;;  %v1492_v36 = vpack.c.bf16 %v804_v23, %v796_v21  ;;  %v841_v21 = vld [vmem:[%s5206_s29 + $0x1200] sm:$0xff]  ;;  %v867_v52 = vld [vmem:[%s5206_s29 + $0x12d0] sm:$0xff] }
  0x8e   : > { %2794 = vmatpush1.bf16.msra.mxu1 %v1459_v38  ;;  %2343 = vmatprep.subr.bf16.mxu0 %v1466_v39  ;;  %v5598_v38 = vcombine.high %v1714_v24, %v1718_v25  ;;  %v810_v39 = vld [vmem:[%s5206_s29 + $0x1108] sm:$0xff]  ;;  %v1514_v24 = vpack.c.bf16 %v850_v17, %v842_v14  ;;  %v849_v25 = vld [vmem:[%s5206_s29 + $0x1240] sm:$0xff]  ;;  %v900_v17 = vld [vmem:[%s5206_s29 + $0x13d8] sm:$0xff] }
  0x8f   : > { %2795 = vmatprep.subr.bf16.mxu1 %v1468_v43  ;;  %v1489_v43 = vpack.c.bf16 %v801_v33, %v793_v32  ;;  %v1498_v48 = vpack.c.bf16 %v818_v40, %v810_v39  ;;  %v858_v32 = vld [vmem:[%s5206_s29 + $0x1288] sm:$0xff] }
  0x90   : > { %2305 = vmatmul.mubr.bf16.gmra.mrb[28].mxu0 %v5555_v49  ;;  %v866_v33 = vld [vmem:[%s5206_s29 + $0x12c8] sm:$0xff] }
  0x91   : > { %2757 = vmatmul.mubr.bf16.gmra.mrb[28].mxu1 %v5555_v49  ;;  %2344 = vmatpush1.bf16.msra.mxu0 %v1465_v54  ;;  %v1500_v54 = vpack.c.bf16 %v820_v42, %v812_v41  ;;  %v1730_v39 = vld [vmem:[%s7113_s1 + $0xc8] sm:$0xff]  ;;  %v1513_v41 = vpack.c.bf16 %v849_v25, %v841_v21  ;;  %v897_v25 = vld [vmem:[%s5206_s29 + $0x13c0] sm:$0xff] }
  0x92   : > { %2796 = vmatpush1.bf16.msra.mxu1 %v1467_v55  ;;  %2345 = vmatprep.subr.bf16.mxu0 %v1474_v56  ;;  %v826_v55 = vld [vmem:[%s5206_s29 + $0x1188] sm:$0xff] }
  0x93   : > { %2797 = vmatprep.subr.bf16.mxu1 %v1476_v63  ;;  %2347 = vmatprep.mubr.bf16.mxu0 %v5568_v1  ;;  %v834_v56 = vld [vmem:[%s5206_s29 + $0x11c8] sm:$0xff] }
  0x94   : > { %2799 = vmatprep.mubr.bf16.mxu1 %v5568_v1  ;;  %v1722_v63 = vld [vmem:[%s7113_s1 + $0x88] sm:$0xff]  ;;  %v1506_v6 = vpack.c.bf16 %v834_v56, %v826_v55  ;;  %v876_v56 = vld [vmem:[%s5206_s29 + $0x1318] sm:$0xff] }
  0x95   : > { %2346 = vmatpush1.bf16.msra.mxu0 %v1473_v8  ;;  %v833_v8 = vld [vmem:[%s5206_s29 + $0x11c0] sm:$0xff]  ;;  %v5628_v12 = vcombine.high %v1722_v63, %v1726_v0  ;;  %v1734_v40 = vld [vmem:[%s7113_s1 + $0xe8] sm:$0xff] }
  0x96   : > { %2798 = vmatpush1.bf16.msra.mxu1 %v1475_v10  ;;  %2428 = vmatprep.subr.bf16.mxu0 %v1482_v11  ;;  %v1508_v10 = vpack.c.bf16 %v836_v61, %v828_v57  ;;  %v835_v11 = vld [vmem:[%s5206_s29 + $0x11d0] sm:$0xff]  ;;  %v1505_v20 = vpack.c.bf16 %v833_v8, %v825_v7  ;;  %v5658_v53 = vcombine.high %v1730_v39, %v1734_v40  ;;  %v882_v55 = vld [vmem:[%s5206_s29 + $0x1348] sm:$0xff]  ;;  %v884_v57 = vld [vmem:[%s5206_s29 + $0x1358] sm:$0xff] }
  0x97   : > { %2880 = vmatprep.subr.bf16.mxu1 %v1484_v18  ;;  %v844_v18 = vld [vmem:[%s5206_s29 + $0x1218] sm:$0xff]  ;;  %v1507_v23 = vpack.c.bf16 %v835_v11, %v827_v9  ;;  %v883_v7 = vld [vmem:[%s5206_s29 + $0x1350] sm:$0xff]  ;;  %v1532_v8 = vpack.c.bf16 %v884_v57, %v876_v56  ;;  %v890_v9 = vld [vmem:[%s5206_s29 + $0x1388] sm:$0xff]  ;;  %v5675_v14 = vcombine.low %v1730_v39, %v1734_v40 }
  0x98   : > { %2348 = vmatmul.mubr.bf16.vlgmr.msra.gmra.mrb[0].mxu0 %v5584_v22  ;;  %v892_v11 = vld [vmem:[%s5206_s29 + $0x1398] sm:$0xff] }
  0x99   : > { %2800 = vmatmul.mubr.bf16.vlgmr.msra.gmra.mrb[0].mxu1 %v5584_v22  ;;  %2429 = vmatpush1.bf16.msra.mxu0 %v1481_v27  ;;  %v843_v27 = vld [vmem:[%s5206_s29 + $0x1210] sm:$0xff]  ;;  %v916_v39 = vld [vmem:[%s5206_s29 + $0x1458] sm:$0xff] }
  0x9a   : > { %2881 = vmatpush1.bf16.msra.mxu1 %v1483_v29  ;;  %2430 = vmatprep.subr.bf16.mxu0 %v1490_v31  ;;  %v851_v29 = vld [vmem:[%s5206_s29 + $0x1250] sm:$0xff]  ;;  %v1516_v31 = vpack.c.bf16 %v852_v19, %v844_v18  ;;  %v1738_v18 = vld [vmem:[%s7113_s1 + $0x108] sm:$0xff]  ;;  %v932_v57 = vld [vmem:[%s5206_s29 + $0x14d8] sm:$0xff] }
  0x9b   : > { %2882 = vmatprep.subr.bf16.mxu1 %v1492_v36  ;;  %2357 = vmatprep.mubr.bf16.mxu0 %v5598_v38  ;;  %v5645_v36 = vcombine.low %v1722_v63, %v1726_v0  ;;  %v1515_v42 = vpack.c.bf16 %v851_v29, %v843_v27  ;;  %v873_v63 = vld [vmem:[%s5206_s29 + $0x1300] sm:$0xff]  ;;  %v1742_v19 = vld [vmem:[%s7113_s1 + $0x128] sm:$0xff]  ;;  %v891_v27 = vld [vmem:[%s5206_s29 + $0x1390] sm:$0xff]  ;;  %v1540_v29 = vpack.c.bf16 %v900_v17, %v892_v11 }
  0x9c   : > { %2809 = vmatprep.mubr.bf16.mxu1 %v5598_v38  ;;  %v5705_v56 = vcombine.low %v1738_v18, %v1742_v19  ;;  %v938_v17 = vld [vmem:[%s5206_s29 + $0x1508] sm:$0xff] }
  0x9d   : > { %2431 = vmatpush1.bf16.msra.mxu0 %v1489_v43  ;;  %v1522_v43 = vpack.c.bf16 %v866_v33, %v858_v32  ;;  %v5688_v32 = vcombine.high %v1738_v18, %v1742_v19  ;;  %v906_v33 = vld [vmem:[%s5206_s29 + $0x1408] sm:$0xff]  ;;  %v940_v19 = vld [vmem:[%s5206_s29 + $0x1518] sm:$0xff] }
  0x9e   : > { %2883 = vmatpush1.bf16.msra.mxu1 %v1491_v47  ;;  %2432 = vmatprep.subr.bf16.mxu0 %v1498_v48  ;;  %v865_v47 = vld [vmem:[%s5206_s29 + $0x12c0] sm:$0xff]  ;;  %v859_v48 = vld [vmem:[%s5206_s29 + $0x1290] sm:$0xff]  ;;  %v946_v18 = vld [vmem:[%s5206_s29 + $0x1548] sm:$0xff] }
  0x9f   : > { %2884 = vmatprep.subr.bf16.mxu1 %v1500_v54  ;;  %v874_v54 = vld [vmem:[%s5206_s29 + $0x1308] sm:$0xff]  ;;  %v1521_v61 = vpack.c.bf16 %v865_v47, %v857_v46  ;;  %v1523_v0 = vpack.c.bf16 %v867_v52, %v859_v48  ;;  %v913_v46 = vld [vmem:[%s5206_s29 + $0x1440] sm:$0xff]  ;;  %v907_v47 = vld [vmem:[%s5206_s29 + $0x1410] sm:$0xff] }
  0xa0   : > { %2358 = vmatmul.mubr.bf16.gmra.mrb[4].mxu0 %v5615_v60  ;;  %v915_v48 = vld [vmem:[%s5206_s29 + $0x1450] sm:$0xff]  ;;  %v922_v52 = vld [vmem:[%s5206_s29 + $0x1488] sm:$0xff] }
  0xa1   : > { %2810 = vmatmul.mubr.bf16.gmra.mrb[4].mxu1 %v5615_v60  ;;  %2433 = vmatpush1.bf16.msra.mxu0 %v1497_v4  ;;  %v1530_v4 = vpack.c.bf16 %v882_v55, %v874_v54  ;;  %v930_v54 = vld [vmem:[%s5206_s29 + $0x14c8] sm:$0xff]  ;;  %v924_v55 = vld [vmem:[%s5206_s29 + $0x1498] sm:$0xff] }
  0xa2   : > { %2885 = vmatpush1.bf16.msra.mxu1 %v1499_v5  ;;  %2434 = vmatprep.subr.bf16.mxu0 %v1506_v6  ;;  %v881_v5 = vld [vmem:[%s5206_s29 + $0x1340] sm:$0xff]  ;;  %v875_v6 = vld [vmem:[%s5206_s29 + $0x1310] sm:$0xff] }
  0xa3   : > { %2886 = vmatprep.subr.bf16.mxu1 %v1508_v10  ;;  %2367 = vmatprep.mubr.bf16.mxu0 %v5628_v12  ;;  %v898_v10 = vld [vmem:[%s5206_s29 + $0x13c8] sm:$0xff]  ;;  %v1531_v21 = vpack.c.bf16 %v883_v7, %v875_v6  ;;  %v921_v6 = vld [vmem:[%s5206_s29 + $0x1480] sm:$0xff] }
  0xa4   : > { %2819 = vmatprep.mubr.bf16.mxu1 %v5628_v12  ;;  %v929_v7 = vld [vmem:[%s5206_s29 + $0x14c0] sm:$0xff] }
  0xa5   : > { %2435 = vmatpush1.bf16.msra.mxu0 %v1505_v20  ;;  %v1529_v20 = vpack.c.bf16 %v881_v5, %v873_v63  ;;  %v1750_v63 = vld [vmem:[%s7113_s1 + $0x168] sm:$0xff]  ;;  %v1554_v5 = vpack.c.bf16 %v930_v54, %v922_v52  ;;  %v961_v52 = vld [vmem:[%s5206_s29 + $0x15c0] sm:$0xff]  ;;  %v955_v54 = vld [vmem:[%s5206_s29 + $0x1590] sm:$0xff] }
  0xa6   : > { %2887 = vmatpush1.bf16.msra.mxu1 %v1507_v23  ;;  %2436 = vmatprep.subr.bf16.mxu0 %v1514_v24  ;;  %v1538_v23 = vpack.c.bf16 %v898_v10, %v890_v9  ;;  %v889_v24 = vld [vmem:[%s5206_s29 + $0x1380] sm:$0xff]  ;;  %v1556_v9 = vpack.c.bf16 %v932_v57, %v924_v55  ;;  %v931_v10 = vld [vmem:[%s5206_s29 + $0x14d0] sm:$0xff] }
  0xa7   : > { %2888 = vmatprep.subr.bf16.mxu1 %v1516_v31  ;;  %v899_v31 = vld [vmem:[%s5206_s29 + $0x13d0] sm:$0xff]  ;;  %v1537_v40 = vpack.c.bf16 %v897_v25, %v889_v24  ;;  %v1562_v25 = vpack.c.bf16 %v946_v18, %v938_v17 }
  0xa8   : > { %2368 = vmatmul.mubr.bf16.gmra.mrb[8].mxu0 %v5645_v36  ;;  %v963_v57 = vld [vmem:[%s5206_s29 + $0x15d0] sm:$0xff] }
  0xa9   : > { %2820 = vmatmul.mubr.bf16.gmra.mrb[8].mxu1 %v5645_v36  ;;  %2437 = vmatpush1.bf16.msra.mxu0 %v1513_v41  ;;  %v905_v41 = vld [vmem:[%s5206_s29 + $0x1400] sm:$0xff]  ;;  %v971_v17 = vld [vmem:[%s5206_s29 + $0x1610] sm:$0xff] }
  0xaa   : > { %2889 = vmatpush1.bf16.msra.mxu1 %v1515_v42  ;;  %2438 = vmatprep.subr.bf16.mxu0 %v1522_v43  ;;  %v1539_v42 = vpack.c.bf16 %v899_v31, %v891_v27  ;;  %v1546_v43 = vpack.c.bf16 %v914_v35, %v906_v33  ;;  %v945_v27 = vld [vmem:[%s5206_s29 + $0x1540] sm:$0xff]  ;;  %v947_v31 = vld [vmem:[%s5206_s29 + $0x1550] sm:$0xff]  ;;  %v954_v35 = vld [vmem:[%s5206_s29 + $0x1588] sm:$0xff] }
  0xab   : > { %2890 = vmatprep.subr.bf16.mxu1 %v1524_v51  ;;  %2377 = vmatprep.mubr.bf16.mxu0 %v5658_v53  ;;  %v1548_v51 = vpack.c.bf16 %v916_v39, %v908_v37  ;;  %v962_v37 = vld [vmem:[%s5206_s29 + $0x15c8] sm:$0xff]  ;;  %v956_v39 = vld [vmem:[%s5206_s29 + $0x1598] sm:$0xff]  ;;  %v979_v18 = vld [vmem:[%s5206_s29 + $0x1650] sm:$0xff] }
  0xac   : > { %2829 = vmatprep.mubr.bf16.mxu1 %v5658_v53 }
  0xad   : > { %2439 = vmatpush1.bf16.msra.mxu0 %v1521_v61  ;;  %v1746_v61 = vld [vmem:[%s7113_s1 + $0x148] sm:$0xff] }
  0xae   : > { %2891 = vmatpush1.bf16.msra.mxu1 %v1523_v0  ;;  %2440 = vmatprep.subr.bf16.mxu0 %v1530_v4  ;;  %v1545_v0 = vpack.c.bf16 %v913_v46, %v905_v41  ;;  %v1547_v4 = vpack.c.bf16 %v915_v48, %v907_v47  ;;  %v5718_v11 = vcombine.high %v1746_v61, %v1750_v63  ;;  %v964_v41 = vld [vmem:[%s5206_s29 + $0x15d8] sm:$0xff] }
  0xaf   : > { %2892 = vmatprep.subr.bf16.mxu1 %v1532_v8  ;;  %v923_v8 = vld [vmem:[%s5206_s29 + $0x1490] sm:$0xff]  ;;  %v1570_v48 = vpack.c.bf16 %v962_v37, %v954_v35  ;;  %v1572_v55 = vpack.c.bf16 %v964_v41, %v956_v39  ;;  %v985_v37 = vld [vmem:[%s5206_s29 + $0x1680] sm:$0xff] }
  0xb0   : > { %2378 = vmatmul.mubr.bf16.gmra.mrb[12].mxu0 %v5675_v14  ;;  %v1555_v24 = vpack.c.bf16 %v931_v10, %v923_v8  ;;  %v1571_v8 = vpack.c.bf16 %v963_v57, %v955_v54  ;;  %v977_v10 = vld [vmem:[%s5206_s29 + $0x1640] sm:$0xff]  ;;  %v987_v41 = vld [vmem:[%s5206_s29 + $0x1690] sm:$0xff] }
  0xb1   : > { %2830 = vmatmul.mubr.bf16.gmra.mrb[12].mxu1 %v5675_v14  ;;  %2441 = vmatpush1.bf16.msra.mxu0 %v1529_v20  ;;  %v948_v20 = vld [vmem:[%s5206_s29 + $0x1558] sm:$0xff]  ;;  %v993_v39 = vld [vmem:[%s5206_s29 + $0x16c0] sm:$0xff] }
  0xb2   : > { %2893 = vmatpush1.bf16.msra.mxu1 %v1531_v21  ;;  %2442 = vmatprep.subr.bf16.mxu0 %v1538_v23  ;;  %v1553_v21 = vpack.c.bf16 %v929_v7, %v921_v6  ;;  %v937_v23 = vld [vmem:[%s5206_s29 + $0x1500] sm:$0xff]  ;;  %v1564_v33 = vpack.c.bf16 %v948_v20, %v940_v19  ;;  %v986_v20 = vld [vmem:[%s5206_s29 + $0x1688] sm:$0xff]  ;;  %v1585_v54 = vpack.c.bf16 %v993_v39, %v985_v37 }
  0xb3   : > { %2894 = vmatprep.subr.bf16.mxu1 %v1540_v29  ;;  %2387 = vmatprep.mubr.bf16.mxu0 %v5688_v32  ;;  %v939_v29 = vld [vmem:[%s5206_s29 + $0x1510] sm:$0xff]  ;;  %v1561_v46 = vpack.c.bf16 %v945_v27, %v937_v23  ;;  %v969_v7 = vld [vmem:[%s5206_s29 + $0x1600] sm:$0xff]  ;;  %v988_v23 = vld [vmem:[%s5206_s29 + $0x1698] sm:$0xff] }
  0xb4   : > { %2839 = vmatprep.mubr.bf16.mxu1 %v5688_v32  ;;  %v1563_v47 = vpack.c.bf16 %v947_v31, %v939_v29  ;;  %v1762_v27 = vld [vmem:[%s7113_s1 + $0x1c8] sm:$0xff]  ;;  %v1577_v31 = vpack.c.bf16 %v977_v10, %v969_v7 }
  0xb5   : > { %2443 = vmatpush1.bf16.msra.mxu0 %v1537_v40  ;;  %v5735_v40 = vcombine.low %v1746_v61, %v1750_v63  ;;  %v970_v63 = vld [vmem:[%s5206_s29 + $0x1608] sm:$0xff] }
  0xb6   : > { %2895 = vmatpush1.bf16.msra.mxu1 %v1539_v42  ;;  %2444 = vmatprep.subr.bf16.mxu0 %v1546_v43  ;;  %v1754_v42 = vld [vmem:[%s7113_s1 + $0x188] sm:$0xff] }
  0xb7   : > { %2896 = vmatprep.subr.bf16.mxu1 %v1548_v51  ;;  %v1758_v43 = vld [vmem:[%s7113_s1 + $0x1a8] sm:$0xff]  ;;  %v953_v51 = vld [vmem:[%s5206_s29 + $0x1580] sm:$0xff] }
  0xb8   : > { %2388 = vmatmul.mubr.bf16.gmra.mrb[16].mxu0 %v5705_v56  ;;  %v5748_v61 = vcombine.high %v1754_v42, %v1758_v43  ;;  %v1569_v6 = vpack.c.bf16 %v961_v52, %v953_v51  ;;  %v1766_v29 = vld [vmem:[%s7113_s1 + $0x1e8] sm:$0xff]  ;;  %v1004_v51 = vld [vmem:[%s5206_s29 + $0x1718] sm:$0xff] }
  0xb9   : > { %2840 = vmatmul.mubr.bf16.gmra.mrb[16].mxu1 %v5705_v56  ;;  %2445 = vmatpush1.bf16.msra.mxu0 %v1545_v0  ;;  %v978_v0 = vld [vmem:[%s5206_s29 + $0x1648] sm:$0xff]  ;;  %v1012_v52 = vld [vmem:[%s5206_s29 + $0x1758] sm:$0xff]  ;;  %v5795_v10 = vcombine.low %v1762_v27, %v1766_v29 }
  0xba   : > { %2897 = vmatpush1.bf16.msra.mxu1 %v1547_v4  ;;  %2446 = vmatprep.subr.bf16.mxu0 %v1554_v5  ;;  %v972_v4 = vld [vmem:[%s5206_s29 + $0x1618] sm:$0xff]  ;;  %v1018_v7 = vld [vmem:[%s5206_s29 + $0x1788] sm:$0xff] }
  0xbb   : > { %2898 = vmatprep.subr.bf16.mxu1 %v1556_v9  ;;  %2397 = vmatprep.mubr.bf16.mxu0 %v5718_v11  ;;  %v980_v5 = vld [vmem:[%s5206_s29 + $0x1658] sm:$0xff]  ;;  %v1578_v9 = vpack.c.bf16 %v978_v0, %v970_v63  ;;  %v1009_v0 = vld [vmem:[%s5206_s29 + $0x1740] sm:$0xff]  ;;  %v1034_v37 = vld [vmem:[%s5206_s29 + $0x1808] sm:$0xff] }
  0xbc   : > { %2849 = vmatprep.mubr.bf16.mxu1 %v5718_v11  ;;  %v1580_v19 = vpack.c.bf16 %v980_v5, %v972_v4  ;;  %v1003_v4 = vld [vmem:[%s5206_s29 + $0x1710] sm:$0xff]  ;;  %v1042_v39 = vld [vmem:[%s5206_s29 + $0x1848] sm:$0xff] }
  0xbd   : > { %2447 = vmatpush1.bf16.msra.mxu0 %v1553_v21  ;;  %v994_v21 = vld [vmem:[%s5206_s29 + $0x16c8] sm:$0xff]  ;;  %v1011_v5 = vld [vmem:[%s5206_s29 + $0x1750] sm:$0xff] }
  0xbe   : > { %2899 = vmatpush1.bf16.msra.mxu1 %v1555_v24  ;;  %2448 = vmatprep.subr.bf16.mxu0 %v1562_v25  ;;  %v5765_v24 = vcombine.low %v1754_v42, %v1758_v43  ;;  %v996_v25 = vld [vmem:[%s5206_s29 + $0x16d8] sm:$0xff]  ;;  %v1586_v35 = vpack.c.bf16 %v994_v21, %v986_v20  ;;  %v995_v43 = vld [vmem:[%s5206_s29 + $0x16d0] sm:$0xff]  ;;  %v1595_v21 = vpack.c.bf16 %v1011_v5, %v1003_v4 }
  0xbf   : > { %2900 = vmatprep.subr.bf16.mxu1 %v1564_v33  ;;  %v1579_v33 = vpack.c.bf16 %v979_v18, %v971_v17  ;;  %v1588_v42 = vpack.c.bf16 %v996_v25, %v988_v23  ;;  %v1587_v57 = vpack.c.bf16 %v995_v43, %v987_v41  ;;  %v1028_v17 = vld [vmem:[%s5206_s29 + $0x17d8] sm:$0xff]  ;;  %v1707_v18 = vld [vmem:[%s7113_s1 + $0x10] sm:$0xff]  ;;  %v1017_v25 = vld [vmem:[%s5206_s29 + $0x1780] sm:$0xff] }
  0xc0   : > { %2398 = vmatmul.mubr.bf16.gmra.mrb[20].mxu0 %v5735_v40  ;;  %v1036_v41 = vld [vmem:[%s5206_s29 + $0x1818] sm:$0xff] }
  0xc1   : > { %2850 = vmatmul.mubr.bf16.gmra.mrb[20].mxu1 %v5735_v40  ;;  %2449 = vmatpush1.bf16.msra.mxu0 %v1561_v46  ;;  %v5778_v46 = vcombine.high %v1762_v27, %v1766_v29  ;;  %v1025_v27 = vld [vmem:[%s5206_s29 + $0x17c0] sm:$0xff]  ;;  %v1019_v29 = vld [vmem:[%s5206_s29 + $0x1790] sm:$0xff]  ;;  %v1052_v4 = vld [vmem:[%s5206_s29 + $0x1898] sm:$0xff] }
  0xc2   : > { %2901 = vmatpush1.bf16.msra.mxu1 %v1563_v47  ;;  %2450 = vmatprep.subr.bf16.mxu0 %v1570_v48  ;;  %v1002_v47 = vld [vmem:[%s5206_s29 + $0x1708] sm:$0xff]  ;;  %v1601_v43 = vpack.c.bf16 %v1025_v27, %v1017_v25  ;;  %v1059_v27 = vld [vmem:[%s5206_s29 + $0x18d0] sm:$0xff] }
  0xc3   : > { %2902 = vmatprep.subr.bf16.mxu1 %v1572_v55  ;;  %2407 = vmatprep.mubr.bf16.mxu0 %v5748_v61  ;;  %v1010_v48 = vld [vmem:[%s5206_s29 + $0x1748] sm:$0xff]  ;;  %v1001_v55 = vld [vmem:[%s5206_s29 + $0x1700] sm:$0xff] }
  0xc4   : > { %2859 = vmatprep.mubr.bf16.mxu1 %v5748_v61  ;;  %v1594_v63 = vpack.c.bf16 %v1010_v48, %v1002_v47  ;;  %v1593_v20 = vpack.c.bf16 %v1009_v0, %v1001_v55  ;;  %v1033_v47 = vld [vmem:[%s5206_s29 + $0x1800] sm:$0xff]  ;;  %v1043_v55 = vld [vmem:[%s5206_s29 + $0x1850] sm:$0xff]  ;;  %v1058_v0 = vld [vmem:[%s5206_s29 + $0x18c8] sm:$0xff] }
  0xc5   : > { %2451 = vmatpush1.bf16.msra.mxu0 %v1569_v6  ;;  %v1596_v6 = vpack.c.bf16 %v1012_v52, %v1004_v51  ;;  %v1610_v51 = vpack.c.bf16 %v1042_v39, %v1034_v37  ;;  %v1041_v52 = vld [vmem:[%s5206_s29 + $0x1840] sm:$0xff]  ;;  %v1076_v37 = vld [vmem:[%s5206_s29 + $0x1958] sm:$0xff] }
  0xc6   : > { %2903 = vmatpush1.bf16.msra.mxu1 %v1571_v8  ;;  %2452 = vmatprep.subr.bf16.mxu0 %v1578_v9  ;;  %v1026_v8 = vld [vmem:[%s5206_s29 + $0x17c8] sm:$0xff]  ;;  %v1020_v9 = vld [vmem:[%s5206_s29 + $0x1798] sm:$0xff] }
  0xc7   : > { %2904 = vmatprep.subr.bf16.mxu1 %v1580_v19  ;;  %v1711_v19 = vld [vmem:[%s7113_s1 + $0x30] sm:$0xff]  ;;  %v1602_v23 = vpack.c.bf16 %v1026_v8, %v1018_v7 }
  0xc8   : > { %2408 = vmatmul.mubr.bf16.gmra.mrb[24].mxu0 %v5765_v24  ;;  %v5824_v5 = vcombine.low %v1707_v18, %v1711_v19  ;;  %v1715_v7 = vld [vmem:[%s7113_s1 + $0x50] sm:$0xff] }
  0xc9   : > { %2860 = vmatmul.mubr.bf16.gmra.mrb[24].mxu1 %v5765_v24  ;;  %2453 = vmatpush1.bf16.msra.mxu0 %v1577_v31  ;;  %v1604_v31 = vpack.c.bf16 %v1028_v17, %v1020_v9  ;;  %v1719_v8 = vld [vmem:[%s7113_s1 + $0x70] sm:$0xff]  ;;  %v1609_v9 = vpack.c.bf16 %v1041_v52, %v1033_v47  ;;  %v1073_v47 = vld [vmem:[%s5206_s29 + $0x1940] sm:$0xff] }
  0xca   : > { %2905 = vmatpush1.bf16.msra.mxu1 %v1579_v33  ;;  %2454 = vmatprep.subr.bf16.mxu0 %v1586_v35  ;;  %v1027_v33 = vld [vmem:[%s5206_s29 + $0x17d0] sm:$0xff]  ;;  %v5808_v35 = vcombine.high %v1707_v18, %v1711_v19  ;;  %v1049_v19 = vld [vmem:[%s5206_s29 + $0x1880] sm:$0xff]  ;;  %v5837_v25 = vcombine.high %v1715_v7, %v1719_v8 }
  0xcb   : > { %2906 = vmatprep.subr.bf16.mxu1 %v1588_v42  ;;  %2417 = vmatprep.mubr.bf16.mxu0 %v5778_v46  ;;  %v1044_v42 = vld [vmem:[%s5206_s29 + $0x1858] sm:$0xff]  ;;  %v1603_v48 = vpack.c.bf16 %v1027_v33, %v1019_v29  ;;  %v1066_v29 = vld [vmem:[%s5206_s29 + $0x1908] sm:$0xff]  ;;  %v1075_v52 = vld [vmem:[%s5206_s29 + $0x1950] sm:$0xff] }
  0xcc   : > { %2869 = vmatprep.mubr.bf16.mxu1 %v5778_v46  ;;  %v1068_v33 = vld [vmem:[%s5206_s29 + $0x1918] sm:$0xff] }
  0xcd   : > { %2455 = vmatpush1.bf16.msra.mxu0 %v1585_v54  ;;  %v1035_v54 = vld [vmem:[%s5206_s29 + $0x1810] sm:$0xff] }
  0xce   : > { %2907 = vmatpush1.bf16.msra.mxu1 %v1587_v57  ;;  %2456 = vmatprep.subr.bf16.mxu0 %v1594_v63  ;;  %v1612_v57 = vpack.c.bf16 %v1044_v42, %v1036_v41  ;;  %v1050_v63 = vld [vmem:[%s5206_s29 + $0x1888] sm:$0xff]  ;;  %v1611_v17 = vpack.c.bf16 %v1043_v55, %v1035_v54  ;;  %v1723_v54 = vld [vmem:[%s7113_s1 + $0x90] sm:$0xff] }
  0xcf   : > { %2908 = vmatprep.subr.bf16.mxu1 %v1596_v6  ;;  %v1060_v6 = vld [vmem:[%s5206_s29 + $0x18d8] sm:$0xff]  ;;  %v1618_v18 = vpack.c.bf16 %v1058_v0, %v1050_v63  ;;  %v1727_v55 = vld [vmem:[%s7113_s1 + $0xb0] sm:$0xff]  ;;  %v1082_v63 = vld [vmem:[%s5206_s29 + $0x1988] sm:$0xff] }
  0xd0   : > { %2418 = vmatmul.mubr.bf16.gmra.mrb[28].mxu0 %v5795_v10  ;;  %v1090_v0 = vld [vmem:[%s5206_s29 + $0x19c8] sm:$0xff] }
  0xd1   : > { %2870 = vmatmul.mubr.bf16.gmra.mrb[28].mxu1 %v5795_v10  ;;  %2457 = vmatpush1.bf16.msra.mxu0 %v1593_v20  ;;  %v1057_v20 = vld [vmem:[%s5206_s29 + $0x18c0] sm:$0xff] }
  0xd2   : > { %2909 = vmatpush1.bf16.msra.mxu1 %v1595_v21  ;;  %2458 = vmatprep.subr.bf16.mxu0 %v1602_v23  ;;  %v1051_v21 = vld [vmem:[%s5206_s29 + $0x1890] sm:$0xff]  ;;  %v1620_v23 = vpack.c.bf16 %v1060_v6, %v1052_v4  ;;  %v1617_v39 = vpack.c.bf16 %v1057_v20, %v1049_v19  ;;  %v1084_v6 = vld [vmem:[%s5206_s29 + $0x1998] sm:$0xff]  ;;  %v1081_v19 = vld [vmem:[%s5206_s29 + $0x1980] sm:$0xff] }
  0xd3   : > { %2910 = vmatprep.subr.bf16.mxu1 %v1604_v31  ;;  %2460 = vmatprep.mubr.bf16.mxu0 %v5808_v35  ;;  %v1074_v31 = vld [vmem:[%s5206_s29 + $0x1948] sm:$0xff]  ;;  %v1619_v41 = vpack.c.bf16 %v1059_v27, %v1051_v21  ;;  %v1089_v20 = vld [vmem:[%s5206_s29 + $0x19c0] sm:$0xff]  ;;  %v1091_v21 = vld [vmem:[%s5206_s29 + $0x19d0] sm:$0xff] }
  0xd4   : > { %2912 = vmatprep.mubr.bf16.mxu1 %v5808_v35  ;;  %v1626_v42 = vpack.c.bf16 %v1074_v31, %v1066_v29  ;;  %v1106_v27 = vld [vmem:[%s5206_s29 + $0x1a48] sm:$0xff]  ;;  %v1100_v31 = vld [vmem:[%s5206_s29 + $0x1a18] sm:$0xff] }
  0xd5   : > { %2459 = vmatpush1.bf16.msra.mxu0 %v1601_v43  ;;  %v1065_v43 = vld [vmem:[%s5206_s29 + $0x1900] sm:$0xff] }
  0xd6   : > { %2911 = vmatpush1.bf16.msra.mxu1 %v1603_v48  ;;  %2541 = vmatprep.subr.bf16.mxu0 %v1610_v51  ;;  %v1067_v48 = vld [vmem:[%s5206_s29 + $0x1910] sm:$0xff]  ;;  %v1628_v51 = vpack.c.bf16 %v1076_v37, %v1068_v33  ;;  %v1625_v4 = vpack.c.bf16 %v1073_v47, %v1065_v43  ;;  %v1108_v33 = vld [vmem:[%s5206_s29 + $0x1a58] sm:$0xff]  ;;  %v1633_v37 = vpack.c.bf16 %v1089_v20, %v1081_v19 }
  0xd7   : > { %2993 = vmatprep.subr.bf16.mxu1 %v1612_v57  ;;  %v5858_v57 = vcombine.low %v1715_v7, %v1719_v8  ;;  %v1083_v7 = vld [vmem:[%s5206_s29 + $0x1990] sm:$0xff]  ;;  %v1634_v8 = vpack.c.bf16 %v1090_v0, %v1082_v63  ;;  %v1644_v47 = vpack.c.bf16 %v1108_v33, %v1100_v31  ;;  %v5887_v63 = vcombine.low %v1723_v54, %v1727_v55  ;;  %v1124_v19 = vld [vmem:[%s5206_s29 + $0x1ad8] sm:$0xff]  ;;  %v1138_v31 = vld [vmem:[%s5206_s29 + $0x1b48] sm:$0xff] }
  0xd8   : > { %2461 = vmatmul.mubr.bf16.vlgmr.msra.gmra.mrb[0].mxu0 %v5824_v5  ;;  %v1735_v43 = vld [vmem:[%s7113_s1 + $0xf0] sm:$0xff]  ;;  %v1132_v33 = vld [vmem:[%s5206_s29 + $0x1b18] sm:$0xff] }
  0xd9   : > { %2913 = vmatmul.mubr.bf16.vlgmr.msra.gmra.mrb[0].mxu1 %v5824_v5  ;;  %2542 = vmatpush1.bf16.msra.mxu0 %v1609_v9  ;;  %v1092_v9 = vld [vmem:[%s5206_s29 + $0x19d8] sm:$0xff]  ;;  %7164 = vst [vmem:[#allocation2_spill] sm:$0xff] %v5887_v63  ;;  %v1107_v0 = vld [vmem:[%s5206_s29 + $0x1a50] sm:$0xff] }
  0xda   : > { %2994 = vmatpush1.bf16.msra.mxu1 %v1611_v17  ;;  %2543 = vmatprep.subr.bf16.mxu0 %v1618_v18  ;;  %v1627_v17 = vpack.c.bf16 %v1075_v52, %v1067_v48  ;;  %v5864_v18 = vcombine.high %v1723_v54, %v1727_v55  ;;  %v1636_v29 = vpack.c.bf16 %v1092_v9, %v1084_v6  ;;  %v1097_v48 = vld [vmem:[%s5206_s29 + $0x1a00] sm:$0xff]  ;;  %v1099_v52 = vld [vmem:[%s5206_s29 + $0x1a10] sm:$0xff]  ;;  %v1122_v6 = vld [vmem:[%s5206_s29 + $0x1ac8] sm:$0xff] }
  0xdb   : > { %2995 = vmatprep.subr.bf16.mxu1 %v1620_v23  ;;  %2470 = vmatprep.mubr.bf16.mxu0 %v5837_v25  ;;  %v1098_v23 = vld [vmem:[%s5206_s29 + $0x1a08] sm:$0xff]  ;;  %v1643_v55 = vpack.c.bf16 %v1107_v0, %v1099_v52  ;;  %v1129_v52 = vld [vmem:[%s5206_s29 + $0x1b00] sm:$0xff] }
  0xdc   : > { %2922 = vmatprep.mubr.bf16.mxu1 %v5837_v25  ;;  %v1137_v0 = vld [vmem:[%s5206_s29 + $0x1b40] sm:$0xff] }
  0xdd   : > { %2544 = vmatpush1.bf16.msra.mxu0 %v1617_v39  ;;  %v1635_v39 = vpack.c.bf16 %v1091_v21, %v1083_v7  ;;  %v1113_v7 = vld [vmem:[%s5206_s29 + $0x1a80] sm:$0xff]  ;;  %v1115_v21 = vld [vmem:[%s5206_s29 + $0x1a90] sm:$0xff] }
  0xde   : > { %2996 = vmatpush1.bf16.msra.mxu1 %v1619_v41  ;;  %2545 = vmatprep.subr.bf16.mxu0 %v1626_v42  ;;  %v1642_v41 = vpack.c.bf16 %v1106_v27, %v1098_v23  ;;  %v1731_v42 = vld [vmem:[%s7113_s1 + $0xd0] sm:$0xff] }
  0xdf   : > { %2997 = vmatprep.subr.bf16.mxu1 %v1628_v51  ;;  %v1105_v51 = vld [vmem:[%s5206_s29 + $0x1a40] sm:$0xff]  ;;  %v5892_v9 = vcombine.high %v1731_v42, %v1735_v43  ;;  %v1123_v27 = vld [vmem:[%s5206_s29 + $0x1ad0] sm:$0xff] }
  0xe0   : > { %2471 = vmatmul.mubr.bf16.gmra.mrb[4].mxu0 %v5858_v57  ;;  %v1641_v54 = vpack.c.bf16 %v1105_v51, %v1097_v48  ;;  %v1651_v48 = vpack.c.bf16 %v1123_v27, %v1115_v21  ;;  %v1156_v21 = vld [vmem:[%s5206_s29 + $0x1bd8] sm:$0xff]  ;;  %v1145_v27 = vld [vmem:[%s5206_s29 + $0x1b80] sm:$0xff] }
  0xe1   : > { %2923 = vmatmul.mubr.bf16.gmra.mrb[4].mxu1 %v5858_v57  ;;  %2546 = vmatpush1.bf16.msra.mxu0 %v1625_v4  ;;  %v1114_v4 = vld [vmem:[%s5206_s29 + $0x1a88] sm:$0xff]  ;;  %7165 = vst [vmem:[#allocation3_spill] sm:$0xff] %v5892_v9 }
  0xe2   : > { %2998 = vmatpush1.bf16.msra.mxu1 %v1627_v17  ;;  %2480 = vmatprep.mubr.bf16.mxu0 %v5864_v18  ;;  %v1116_v17 = vld [vmem:[%s5206_s29 + $0x1a98] sm:$0xff]  ;;  %v1650_v20 = vpack.c.bf16 %v1122_v6, %v1114_v4  ;;  %v1131_v4 = vld [vmem:[%s5206_s29 + $0x1b10] sm:$0xff]  ;;  %v5917_v6 = vcombine.low %v1731_v42, %v1735_v43  ;;  %v1657_v42 = vpack.c.bf16 %v1137_v0, %v1129_v52 }
  0xe3   : > { %2932 = vmatprep.mubr.bf16.mxu1 %v5864_v18  ;;  %2547 = vmatprep.subr.bf16.mxu0 %v1634_v8  ;;  %v1121_v8 = vld [vmem:[%s5206_s29 + $0x1ac0] sm:$0xff]  ;;  %v1652_v23 = vpack.c.bf16 %v1124_v19, %v1116_v17  ;;  %v1139_v19 = vld [vmem:[%s5206_s29 + $0x1b50] sm:$0xff] }
  0xe4   : > { %2999 = vmatprep.subr.bf16.mxu1 %v1636_v29  ;;  %v1130_v29 = vld [vmem:[%s5206_s29 + $0x1b08] sm:$0xff]  ;;  %7166 = vst [vmem:[#allocation4_spill] sm:$0xff] %v5917_v6  ;;  %v1659_v43 = vpack.c.bf16 %v1139_v19, %v1131_v4  ;;  %v1751_v52 = vld [vmem:[%s7113_s1 + $0x170] sm:$0xff]  ;;  %v1161_v19 = vld [vmem:[%s5206_s29 + $0x1c00] sm:$0xff] }
  0xe5   : > { %2548 = vmatpush1.bf16.msra.mxu0 %v1633_v37  ;;  %v1140_v37 = vld [vmem:[%s5206_s29 + $0x1b58] sm:$0xff]  ;;  %v1658_v51 = vpack.c.bf16 %v1138_v31, %v1130_v29  ;;  %v1153_v29 = vld [vmem:[%s5206_s29 + $0x1bc0] sm:$0xff]  ;;  %v1147_v31 = vld [vmem:[%s5206_s29 + $0x1b90] sm:$0xff] }
  0xe6   : > { %3000 = vmatpush1.bf16.msra.mxu1 %v1635_v39  ;;  %2549 = vmatprep.subr.bf16.mxu0 %v1642_v41  ;;  %v1649_v39 = vpack.c.bf16 %v1121_v8, %v1113_v7  ;;  %v1739_v41 = vld [vmem:[%s7113_s1 + $0x110] sm:$0xff]  ;;  %v1660_v17 = vpack.c.bf16 %v1140_v37, %v1132_v33  ;;  %v1154_v7 = vld [vmem:[%s5206_s29 + $0x1bc8] sm:$0xff]  ;;  %v7120_v8 = vmov 0   ;;  %v1665_v0 = vpack.c.bf16 %v1153_v29, %v1145_v27  ;;  %v1185_v29 = vld [vmem:[%s5206_s29 + $0x1cc0] sm:$0xff] }
  0xe7   : > { %3001 = vmatprep.subr.bf16.mxu1 %v1644_v47  ;;  %v1743_v47 = vld [vmem:[%s7113_s1 + $0x130] sm:$0xff]  ;;  %5113 = vset.pattern.permute.xlu0 %v7120_v8 }
  0xe8   : > { %2481 = vmatmul.mubr.bf16.gmra.mrb[8].mxu0 %v5887_v63  ;;  %5114 = vset.pattern.permute.xlu1 %v7120_v8  ;;  %v1155_v37 = vld [vmem:[%s5206_s29 + $0x1bd0] sm:$0xff]  ;;  %v1170_v8 = vld [vmem:[%s5206_s29 + $0x1c48] sm:$0xff] }
  0xe9   : > { %2933 = vmatmul.mubr.bf16.gmra.mrb[8].mxu1 %v5887_v63  ;;  %2490 = vmatprep.mubr.bf16.mxu0 %v5892_v9  ;;  %v1667_v4 = vpack.c.bf16 %v1155_v37, %v1147_v31  ;;  %v1179_v31 = vld [vmem:[%s5206_s29 + $0x1c90] sm:$0xff] }
  0xea   : > { %2550 = vmatpush1.bf16.msra.mxu0 %v1641_v54  ;;  %2942 = vmatprep.mubr.bf16.mxu1 %v5892_v9  ;;  %v1146_v54 = vld [vmem:[%s5206_s29 + $0x1b88] sm:$0xff]  ;;  %v1187_v37 = vld [vmem:[%s5206_s29 + $0x1cd0] sm:$0xff] }
  0xeb   : > { %3002 = vmatpush1.bf16.msra.mxu1 %v1643_v55  ;;  %2551 = vmatprep.subr.bf16.mxu0 %v1650_v20  ;;  %v5923_v55 = vcombine.high %v1739_v41, %v1743_v47  ;;  %v1148_v20 = vld [vmem:[%s5206_s29 + $0x1b98] sm:$0xff]  ;;  %v1162_v9 = vld [vmem:[%s5206_s29 + $0x1c08] sm:$0xff] }
  0xec   : > { %3003 = vmatprep.subr.bf16.mxu1 %v1652_v23  ;;  %v1666_v23 = vpack.c.bf16 %v1154_v7, %v1146_v54  ;;  %v1668_v33 = vpack.c.bf16 %v1156_v21, %v1148_v20  ;;  %v1169_v54 = vld [vmem:[%s5206_s29 + $0x1c40] sm:$0xff]  ;;  %v1163_v7 = vld [vmem:[%s5206_s29 + $0x1c10] sm:$0xff]  ;;  %v5949_v20 = vcombine.low %v1739_v41, %v1743_v47 }
  0xed   : > { %7167 = vst [vmem:[#allocation5_spill] sm:$0xff] %v5923_v55 }
  0xee   : > { %2552 = vmatpush1.bf16.msra.mxu0 %v1649_v39  ;;  %v1164_v39 = vld [vmem:[%s5206_s29 + $0x1c18] sm:$0xff]  ;;  %7168 = vst [vmem:[#allocation6_spill] sm:$0xff] %v5949_v20 }
  0xef   : > { %3004 = vmatpush1.bf16.msra.mxu1 %v1651_v48  ;;  %2553 = vmatprep.subr.bf16.mxu0 %v1658_v51  ;;  %v1172_v48 = vld [vmem:[%s5206_s29 + $0x1c58] sm:$0xff]  ;;  %v1747_v51 = vld [vmem:[%s7113_s1 + $0x150] sm:$0xff] }
  0xf0   : > { %2491 = vmatmul.mubr.bf16.gmra.mrb[12].mxu0 %v5917_v6  ;;  %3005 = vmatprep.subr.bf16.mxu1 %v1660_v17  ;;  %v1674_v17 = vpack.c.bf16 %v1170_v8, %v1162_v9  ;;  %v1676_v21 = vpack.c.bf16 %v1172_v48, %v1164_v39  ;;  %v5954_v27 = vcombine.high %v1747_v51, %v1751_v52  ;;  %v1188_v9 = vld [vmem:[%s5206_s29 + $0x1cd8] sm:$0xff]  ;;  %v1194_v39 = vld [vmem:[%s5206_s29 + $0x1d08] sm:$0xff] }
  0xf1   : > { %2943 = vmatmul.mubr.bf16.gmra.mrb[12].mxu1 %v5917_v6  ;;  %2500 = vmatprep.mubr.bf16.mxu0 %v5923_v55  ;;  %v1186_v6 = vld [vmem:[%s5206_s29 + $0x1cc8] sm:$0xff]  ;;  %v1673_v8 = vpack.c.bf16 %v1169_v54, %v1161_v19  ;;  %v1683_v19 = vpack.c.bf16 %v1187_v37, %v1179_v31  ;;  %v1209_v31 = vld [vmem:[%s5206_s29 + $0x1d80] sm:$0xff]  ;;  %v1211_v37 = vld [vmem:[%s5206_s29 + $0x1d90] sm:$0xff] }
  0xf2   : > { %2952 = vmatprep.mubr.bf16.mxu1 %v5923_v55  ;;  %2554 = vmatpush1.bf16.msra.mxu0 %v1657_v42  ;;  %v1171_v42 = vld [vmem:[%s5206_s29 + $0x1c50] sm:$0xff]  ;;  %v1178_v55 = vld [vmem:[%s5206_s29 + $0x1c88] sm:$0xff]  ;;  %7169 = vst [vmem:[#allocation7_spill] sm:$0xff] %v5954_v27 }
  0xf3   : > { %3006 = vmatpush1.bf16.msra.mxu1 %v1659_v43  ;;  %2555 = vmatprep.subr.bf16.mxu0 %v1666_v23  ;;  %v1180_v43 = vld [vmem:[%s5206_s29 + $0x1c98] sm:$0xff]  ;;  %v1675_v41 = vpack.c.bf16 %v1171_v42, %v1163_v7  ;;  %v1682_v47 = vpack.c.bf16 %v1186_v6, %v1178_v55  ;;  %v1177_v23 = vld [vmem:[%s5206_s29 + $0x1c80] sm:$0xff]  ;;  %v1202_v48 = vld [vmem:[%s5206_s29 + $0x1d48] sm:$0xff] }
  0xf4   : > { %3007 = vmatprep.subr.bf16.mxu1 %v1668_v33  ;;  %v1684_v33 = vpack.c.bf16 %v1188_v9, %v1180_v43  ;;  %v1755_v6 = vld [vmem:[%s7113_s1 + $0x190] sm:$0xff]  ;;  %v1690_v54 = vpack.c.bf16 %v1202_v48, %v1194_v39  ;;  %v1193_v7 = vld [vmem:[%s5206_s29 + $0x1d00] sm:$0xff]  ;;  %v5979_v43 = vcombine.low %v1747_v51, %v1751_v52 }
  0xf5   : > { %v1759_v55 = vld [vmem:[%s7113_s1 + $0x1b0] sm:$0xff] }
  0xf6   : > { %2556 = vmatpush1.bf16.msra.mxu0 %v1665_v0  ;;  %v1196_v0 = vld [vmem:[%s5206_s29 + $0x1d18] sm:$0xff]  ;;  %v1195_v42 = vld [vmem:[%s5206_s29 + $0x1d10] sm:$0xff]  ;;  %v5984_v63 = vcombine.high %v1755_v6, %v1759_v55 }
  0xf7   : > { %3008 = vmatpush1.bf16.msra.mxu1 %v1667_v4  ;;  %2557 = vmatprep.subr.bf16.mxu0 %v1674_v17  ;;  %v1204_v4 = vld [vmem:[%s5206_s29 + $0x1d58] sm:$0xff]  ;;  %v1681_v17 = vpack.c.bf16 %v1185_v29, %v1177_v23  ;;  %v1219_v48 = vld [vmem:[%s5206_s29 + $0x1dd0] sm:$0xff] }
  0xf8   : > { %2501 = vmatmul.mubr.bf16.gmra.mrb[16].mxu0 %v5949_v20  ;;  %3009 = vmatprep.subr.bf16.mxu1 %v1676_v21  ;;  %v1201_v21 = vld [vmem:[%s5206_s29 + $0x1d40] sm:$0xff]  ;;  %v1692_v9 = vpack.c.bf16 %v1204_v4, %v1196_v0  ;;  %v1212_v23 = vld [vmem:[%s5206_s29 + $0x1d98] sm:$0xff]  ;;  %v270_v0 = vld [vmem:[%s5206_s29 + $0x28] sm:$0xff] }
  0xf9   : > { %2953 = vmatmul.mubr.bf16.gmra.mrb[16].mxu1 %v5949_v20  ;;  %2510 = vmatprep.mubr.bf16.mxu0 %v5954_v27  ;;  %v1218_v20 = vld [vmem:[%s5206_s29 + $0x1dc8] sm:$0xff]  ;;  %v1689_v51 = vpack.c.bf16 %v1201_v21, %v1193_v7  ;;  %v1699_v21 = vpack.c.bf16 %v1219_v48, %v1211_v37  ;;  %v269_v37 = vld [vmem:[%s5206_s29 + $0x20] sm:$0xff]  ;;  %v271_v48 = vld [vmem:[%s5206_s29 + $0x30] sm:$0xff] }
  0xfa   : > { %2962 = vmatprep.mubr.bf16.mxu1 %v5954_v27  ;;  %2558 = vmatpush1.bf16.msra.mxu0 %v1673_v8  ;;  %v1203_v8 = vld [vmem:[%s5206_s29 + $0x1d50] sm:$0xff]  ;;  %v1210_v27 = vld [vmem:[%s5206_s29 + $0x1d88] sm:$0xff] }
  0xfb   : > { %3010 = vmatpush1.bf16.msra.mxu1 %v1675_v41  ;;  %2559 = vmatprep.subr.bf16.mxu0 %v1682_v47  ;;  %v1220_v41 = vld [vmem:[%s5206_s29 + $0x1dd8] sm:$0xff]  ;;  %v1769_v47 = vld [vmem:[%s7114_s2] sm:$0xff]  ;;  %v1691_v52 = vpack.c.bf16 %v1203_v8, %v1195_v42  ;;  %v1698_v29 = vpack.c.bf16 %v1218_v20, %v1210_v27  ;;  %v278_v4 = vld [vmem:[%s5206_s29 + $0x68] sm:$0xff]  ;;  %v6015_v8 = vcombine.low %v1755_v6, %v1759_v55 }
  0xfc   : > { %3011 = vmatprep.subr.bf16.mxu1 %v1684_v33  ;;  %1787 = vperm.xlu0 %5113, %v1769_v47   ;;  %v1217_v33 = vld [vmem:[%s5206_s29 + $0x1dc0] sm:$0xff]  ;;  %v1700_v39 = vpack.c.bf16 %v1220_v41, %v1212_v23  ;;  %v1770_v20 = vld [vmem:[%s7114_s2 + $0x8] sm:$0xff]  ;;  %v1763_v27 = vld [vmem:[%s7113_s1 + $0x1d0] sm:$0xff]  ;;  %v1230_v42 = vpack.c.bf16 %v278_v4, %v270_v0 }
  0xfd   : > { %v1697_v7 = vpack.c.bf16 %v1217_v33, %v1209_v31  ;;  %7170 = vst [vmem:[#allocation8_spill] sm:$0xff] %v6015_v8  ;;  %v1772_v47 = vld [vmem:[%s7114_s2 + $0x18] sm:$0xff]  ;;  %v1775_v33 = vld [vmem:[%s7114_s2 + $0x30] sm:$0xff] }
  0xfe   : > { %2560 = vmatpush1.bf16.msra.mxu0 %v1681_v17  ;;  %v272_v17 = vld [vmem:[%s5206_s29 + $0x38] sm:$0xff]  ;;  %v279_v0 = vld [vmem:[%s5206_s29 + $0x70] sm:$0xff] }
  0xff   : > { %3012 = vmatpush1.bf16.msra.mxu1 %v1683_v19  ;;  %2561 = vmatprep.subr.bf16.mxu0 %v1690_v54  ;;  %v280_v19 = vld [vmem:[%s5206_s29 + $0x78] sm:$0xff]  ;;  %v1767_v54 = vld [vmem:[%s7113_s1 + $0x1f0] sm:$0xff] }
 0x100   : > { %2511 = vmatmul.mubr.bf16.gmra.mrb[20].mxu0 %v5979_v43  ;;  %3013 = vmatprep.subr.bf16.mxu1 %v1692_v9  ;;  %v1771_v9 = vld [vmem:[%s7114_s2 + $0x10] sm:$0xff]  ;;  %v1232_v23 = vpack.c.bf16 %v280_v19, %v272_v17  ;;  %v6017_v41 = vcombine.high %v1763_v27, %v1767_v54  ;;  %v1708_v6 = vld [vmem:[%s7113_s1 + $0x18] sm:$0xff]  ;;  %v286_v17 = vld [vmem:[%s5206_s29 + $0xa8] sm:$0xff] }
 0x101   : > { %2963 = vmatmul.mubr.bf16.gmra.mrb[20].mxu1 %v5979_v43  ;;  %2520 = vmatprep.mubr.bf16.mxu0 %v5984_v63  ;;  %v1712_v55 = vld [vmem:[%s7113_s1 + $0x38] sm:$0xff]  ;;  %v294_v19 = vld [vmem:[%s5206_s29 + $0xe8] sm:$0xff] }
 0x102   : > { %2972 = vmatprep.mubr.bf16.mxu1 %v5984_v63  ;;  %2562 = vmatpush1.bf16.msra.mxu0 %v1689_v51  ;;  %7171 = vst [vmem:[#allocation9_spill] sm:$0xff] %v6017_v41  ;;  %v1773_v51 = vld [vmem:[%s7114_s2 + $0x20] sm:$0xff]  ;;  %v6040_v31 = vcombine.high %v1708_v6, %v1712_v55  ;;  %v1776_v4 = vld [vmem:[%s7114_s2 + $0x38] sm:$0xff] }
 0x103   : > { %3014 = vmatpush1.bf16.msra.mxu1 %v1691_v52  ;;  %2563 = vmatprep.subr.bf16.mxu0 %v1698_v29  ;;  %v6035_v52 = vcombine.low %v1763_v27, %v1767_v54  ;;  %v1774_v29 = vld [vmem:[%s7114_s2 + $0x28] sm:$0xff]  ;;  %v6061_v27 = vcombine.low %v1708_v6, %v1712_v55  ;;  %v296_v54 = vld [vmem:[%s5206_s29 + $0xf8] sm:$0xff]  ;;  %v287_v6 = vld [vmem:[%s5206_s29 + $0xb0] sm:$0xff] }
 0x104   : > { %3015 = vmatprep.subr.bf16.mxu1 %v1700_v39  ;;  %1792 = vperm.xlu0 %5113, %v1770_v20   ;;  %7173 = vst [vmem:[#allocation11_spill] sm:$0xff] %v6040_v31  ;;  %v277_v39 = vld [vmem:[%s5206_s29 + $0x60] sm:$0xff]  ;;  %v288_v20 = vld [vmem:[%s5206_s29 + $0xb8] sm:$0xff] }
 0x105   : > { %1797 = vperm.xlu1 %5114, %v1771_v9   ;;  %7172 = vst [vmem:[#allocation10_spill] sm:$0xff] %v6035_v52  ;;  %7174 = vst [vmem:[#allocation12_spill] sm:$0xff] %v6061_v27  ;;  %v285_v9 = vld [vmem:[%s5206_s29 + $0xa0] sm:$0xff] }
 0x106   : > { %2564 = vmatpush1.bf16.msra.mxu0 %v1697_v7  ;;  %v1716_v7 = vld [vmem:[%s7113_s1 + $0x58] sm:$0xff]  ;;  %v1777_v55 = vld [vmem:[%s7114_s2 + $0x40] sm:$0xff] }
 0x107   : > { %3016 = vmatpush1.bf16.msra.mxu1 %v1699_v21  ;;  %3106 = vmatprep.subr.bf16.mxu0 %v1230_v42  ;;  %v1720_v21 = vld [vmem:[%s7113_s1 + $0x78] sm:$0xff]  ;;  %v1229_v42 = vpack.c.bf16 %v277_v39, %v269_v37 }
 0x108   : > { %2521 = vmatmul.mubr.bf16.gmra.mrb[24].mxu0 %v6015_v8  ;;  %3558 = vmatprep.subr.bf16.mxu1 %v1232_v23  ;;  %v1231_v23 = vpack.c.bf16 %v279_v0, %v271_v48  ;;  %v304_v37 = vld [vmem:[%s5206_s29 + $0x138] sm:$0xff]  ;;  %v301_v0 = vld [vmem:[%s5206_s29 + $0x120] sm:$0xff] }
 0x109   : > { %2973 = vmatmul.mubr.bf16.gmra.mrb[24].mxu1 %v6015_v8  ;;  %2530 = vmatprep.mubr.bf16.mxu0 %v6017_v41  ;;  %v312_v39 = vld [vmem:[%s5206_s29 + $0x178] sm:$0xff]  ;;  %v318_v8 = vld [vmem:[%s5206_s29 + $0x1a8] sm:$0xff] }
 0x10a   : > { %2982 = vmatprep.mubr.bf16.mxu1 %v6017_v41  ;;  %1802 = vperm.xlu1 %5114, %v1772_v47   ;;  %v1238_v47 = vpack.c.bf16 %v294_v19, %v286_v17  ;;  %v309_v17 = vld [vmem:[%s5206_s29 + $0x160] sm:$0xff]  ;;  %v1778_v19 = vld [vmem:[%s7114_s2 + $0x48] sm:$0xff]  ;;  %v311_v41 = vld [vmem:[%s5206_s29 + $0x170] sm:$0xff] }
 0x10b   : > { %1807 = vperm.xlu0 %5113, %v1773_v51   ;;  %v293_v51 = vld [vmem:[%s5206_s29 + $0xe0] sm:$0xff] }
 0x10c   : > { %v1237_v48 = vpack.c.bf16 %v293_v51, %v285_v9  ;;  %v326_v9 = vld [vmem:[%s5206_s29 + $0x1e8] sm:$0xff]  ;;  %v320_v51 = vld [vmem:[%s5206_s29 + $0x1b8] sm:$0xff] }
 0x10e   : > { %1812 = vperm.xlu1 %5114, %v1774_v29   ;;  %v1240_v29 = vpack.c.bf16 %v296_v54, %v288_v20 }
 0x10f   : > { %1817 = vperm.xlu0 %5113, %v1775_v33   ;;  %v295_v33 = vld [vmem:[%s5206_s29 + $0xf0] sm:$0xff] }
 0x110   : > { %2531 = vmatmul.mubr.bf16.gmra.mrb[28].mxu0 %v6035_v52  ;;  %v1239_v20 = vpack.c.bf16 %v295_v33, %v287_v6  ;;  %v1245_v6 = vpack.c.bf16 %v309_v17, %v301_v0  ;;  %v325_v33 = vld [vmem:[%s5206_s29 + $0x1e0] sm:$0xff]  ;;  %v327_v0 = vld [vmem:[%s5206_s29 + $0x1f0] sm:$0xff] }
 0x111   : > { %2983 = vmatmul.mubr.bf16.gmra.mrb[28].mxu1 %v6035_v52  ;;  %4540 = vmatprep.mubr.msk.bf16.mxu0 %vm2177_vm0, %v6040_v31  ;;  %v310_v52 = vld [vmem:[%s5206_s29 + $0x168] sm:$0xff] }
 0x112   : > { %4548 = vmatprep.mubr.msk.bf16.mxu1 %vm2177_vm0, %v6040_v31  ;;  %1822 = vperm.xlu1 %5114, %v1776_v4   ;;  %v6077_v4 = vcombine.high %v1716_v7, %v1720_v21  ;;  %v302_v31 = vld [vmem:[%s5206_s29 + $0x128] sm:$0xff] }
 0x113   : > { %1827 = vperm.xlu0 %5113, %v1777_v55   ;;  %v1246_v54 = vpack.c.bf16 %v310_v52, %v302_v31  ;;  %v303_v55 = vld [vmem:[%s5206_s29 + $0x130] sm:$0xff]  ;;  %v1724_v52 = vld [vmem:[%s7113_s1 + $0x98] sm:$0xff] }
 0x114   : > { %7175 = vst [vmem:[#allocation13_spill] sm:$0xff] %v6077_v4  ;;  %v1728_v31 = vld [vmem:[%s7113_s1 + $0xb8] sm:$0xff] }
 0x115   : > { %v6118_v17 = vcombine.high %v1724_v52, %v1728_v31 }
 0x116   : > { %1832 = vperm.xlu1 %5114, %v1778_v19   ;;  %v334_v19 = vld [vmem:[%s5206_s29 + $0x228] sm:$0xff] }
 0x117   : > { %7177 = vst [vmem:[#allocation15_spill] sm:$0xff] %v6118_v17 }
 0x118   : > { %2574 = vmatmul.mubr.bf16.vlgmr.msra.gmra.mrb[0].mxu0 %v6061_v27 }
 0x119   : > { %3026 = vmatmul.mubr.bf16.vlgmr.msra.gmra.mrb[0].mxu1 %v6061_v27  ;;  %3107 = vmatpush1.bf16.msra.mxu0 %v1229_v42  ;;  %v1248_v42 = vpack.c.bf16 %v312_v39, %v304_v37  ;;  %v328_v27 = vld [vmem:[%s5206_s29 + $0x1f8] sm:$0xff]  ;;  %v319_v37 = vld [vmem:[%s5206_s29 + $0x1b0] sm:$0xff] }
 0x11a   : > { %3559 = vmatpush1.bf16.msra.mxu1 %v1231_v23  ;;  %3108 = vmatprep.subr.bf16.mxu0 %v1238_v47  ;;  %v6100_v23 = vcombine.low %v1716_v7, %v1720_v21  ;;  %v1779_v47 = vld [vmem:[%s7114_s2 + $0x50] sm:$0xff]  ;;  %v317_v7 = vld [vmem:[%s5206_s29 + $0x1a0] sm:$0xff]  ;;  %v1247_v21 = vpack.c.bf16 %v311_v41, %v303_v55  ;;  %v1780_v39 = vld [vmem:[%s7114_s2 + $0x58] sm:$0xff] }
 0x11b   : > { %3560 = vmatprep.subr.bf16.mxu1 %v1240_v29  ;;  %4541 = vmatprep.mubr.msk.bf16.mxu0 %vm2177_vm0, %v6077_v4  ;;  %v1254_v29 = vpack.c.bf16 %v326_v9, %v318_v8  ;;  %v336_v8 = vld [vmem:[%s5206_s29 + $0x238] sm:$0xff]  ;;  %v341_v55 = vld [vmem:[%s5206_s29 + $0x260] sm:$0xff]  ;;  %v1255_v9 = vpack.c.bf16 %v327_v0, %v319_v37 }
 0x11c   : > { %4549 = vmatprep.mubr.msk.bf16.mxu1 %vm2177_vm0, %v6077_v4  ;;  %7176 = vst [vmem:[#allocation14_spill] sm:$0xff] %v6100_v23  ;;  %1837 = vperm.xlu0 %5113, %v1779_v47   ;;  %v344_v41 = vld [vmem:[%s5206_s29 + $0x278] sm:$0xff]  ;;  %v343_v47 = vld [vmem:[%s5206_s29 + $0x270] sm:$0xff]  ;;  %v350_v4 = vld [vmem:[%s5206_s29 + $0x2a8] sm:$0xff] }
 0x11d   : > { %3109 = vmatpush1.bf16.msra.mxu0 %v1237_v48  ;;  %v1256_v48 = vpack.c.bf16 %v328_v27, %v320_v51  ;;  %1842 = vperm.xlu1 %5114, %v1780_v39   ;;  %v333_v27 = vld [vmem:[%s5206_s29 + $0x220] sm:$0xff]  ;;  %v1736_v37 = vld [vmem:[%s7113_s1 + $0xf8] sm:$0xff] }
 0x11e   : > { %3561 = vmatpush1.bf16.msra.mxu1 %v1239_v20  ;;  %3110 = vmatprep.subr.bf16.mxu0 %v1246_v54  ;;  %v342_v20 = vld [vmem:[%s5206_s29 + $0x268] sm:$0xff]  ;;  %v1253_v54 = vpack.c.bf16 %v325_v33, %v317_v7  ;;  %v1781_v39 = vld [vmem:[%s7114_s2 + $0x60] sm:$0xff]  ;;  %v352_v33 = vld [vmem:[%s5206_s29 + $0x2b8] sm:$0xff]  ;;  %v1261_v0 = vpack.c.bf16 %v341_v55, %v333_v27 }
 0x11f   : > { %3562 = vmatprep.subr.bf16.mxu1 %v1248_v42  ;;  %v335_v42 = vld [vmem:[%s5206_s29 + $0x230] sm:$0xff]  ;;  %v1262_v51 = vpack.c.bf16 %v342_v20, %v334_v19  ;;  %v358_v7 = vld [vmem:[%s5206_s29 + $0x2e8] sm:$0xff]  ;;  %v349_v19 = vld [vmem:[%s5206_s29 + $0x2a0] sm:$0xff] }
 0x120   : > { %2584 = vmatmul.mubr.bf16.gmra.mrb[4].mxu0 %v6100_v23  ;;  %1847 = vperm.xlu0 %5113, %v1781_v39   ;;  %v357_v20 = vld [vmem:[%s5206_s29 + $0x2e0] sm:$0xff]  ;;  %v359_v39 = vld [vmem:[%s5206_s29 + $0x2f0] sm:$0xff]  ;;  %v374_v27 = vld [vmem:[%s5206_s29 + $0x368] sm:$0xff] }
 0x121   : > { %3036 = vmatmul.mubr.bf16.gmra.mrb[4].mxu1 %v6100_v23  ;;  %3111 = vmatpush1.bf16.msra.mxu0 %v1245_v6  ;;  %v1264_v6 = vpack.c.bf16 %v344_v41, %v336_v8  ;;  %v360_v23 = vld [vmem:[%s5206_s29 + $0x2f8] sm:$0xff]  ;;  %v351_v8 = vld [vmem:[%s5206_s29 + $0x2b0] sm:$0xff] }
 0x122   : > { %3563 = vmatpush1.bf16.msra.mxu1 %v1247_v21  ;;  %3112 = vmatprep.subr.bf16.mxu0 %v1254_v29  ;;  %v6141_v21 = vcombine.low %v1724_v52, %v1728_v31  ;;  %v1732_v29 = vld [vmem:[%s7113_s1 + $0xd8] sm:$0xff]  ;;  %v1263_v52 = vpack.c.bf16 %v343_v47, %v335_v42  ;;  %v1270_v31 = vpack.c.bf16 %v358_v7, %v350_v4  ;;  %v365_v42 = vld [vmem:[%s5206_s29 + $0x320] sm:$0xff]  ;;  %v367_v7 = vld [vmem:[%s5206_s29 + $0x330] sm:$0xff] }
 0x123   : > { %3564 = vmatprep.subr.bf16.mxu1 %v1256_v48  ;;  %4542 = vmatprep.mubr.msk.bf16.mxu0 %vm2177_vm0, %v6118_v17  ;;  %v1782_v48 = vld [vmem:[%s7114_s2 + $0x68] sm:$0xff]  ;;  %v1272_v41 = vpack.c.bf16 %v360_v23, %v352_v33  ;;  %v368_v55 = vld [vmem:[%s5206_s29 + $0x338] sm:$0xff]  ;;  %v1269_v4 = vpack.c.bf16 %v357_v20, %v349_v19  ;;  %v373_v23 = vld [vmem:[%s5206_s29 + $0x360] sm:$0xff]  ;;  %v1271_v47 = vpack.c.bf16 %v359_v39, %v351_v8 }
 0x124   : > { %4550 = vmatprep.mubr.msk.bf16.mxu1 %vm2177_vm0, %v6118_v17  ;;  %7178 = vst [vmem:[#allocation16_spill] sm:$0xff] %v6141_v21  ;;  %1852 = vperm.xlu1 %5114, %v1782_v48   ;;  %v6156_v17 = vcombine.high %v1732_v29, %v1736_v37  ;;  %v375_v33 = vld [vmem:[%s5206_s29 + $0x370] sm:$0xff]  ;;  %v1784_v48 = vld [vmem:[%s7114_s2 + $0x78] sm:$0xff]  ;;  %v382_v19 = vld [vmem:[%s5206_s29 + $0x3a8] sm:$0xff]  ;;  %v1277_v39 = vpack.c.bf16 %v373_v23, %v365_v42 }
 0x125   : > { %3113 = vmatpush1.bf16.msra.mxu0 %v1253_v54  ;;  %v366_v54 = vld [vmem:[%s5206_s29 + $0x328] sm:$0xff]  ;;  %v1740_v8 = vld [vmem:[%s7113_s1 + $0x118] sm:$0xff] }
 0x126   : > { %3565 = vmatpush1.bf16.msra.mxu1 %v1255_v9  ;;  %3114 = vmatprep.subr.bf16.mxu0 %v1262_v51  ;;  %7179 = vst [vmem:[#allocation17_spill] sm:$0xff] %v6156_v17  ;;  %v376_v9 = vld [vmem:[%s5206_s29 + $0x378] sm:$0xff]  ;;  %v1783_v51 = vld [vmem:[%s7114_s2 + $0x70] sm:$0xff]  ;;  %v390_v20 = vld [vmem:[%s5206_s29 + $0x3e8] sm:$0xff] }
 0x127   : > { %3566 = vmatprep.subr.bf16.mxu1 %v1264_v6  ;;  %v1278_v6 = vpack.c.bf16 %v374_v27, %v366_v54  ;;  %1857 = vperm.xlu0 %5113, %v1783_v51   ;;  %v381_v54 = vld [vmem:[%s5206_s29 + $0x3a0] sm:$0xff]  ;;  %v406_v42 = vld [vmem:[%s5206_s29 + $0x468] sm:$0xff]  ;;  %v400_v23 = vld [vmem:[%s5206_s29 + $0x438] sm:$0xff] }
 0x128   : > { %2594 = vmatmul.mubr.bf16.gmra.mrb[8].mxu0 %v6141_v21  ;;  %1862 = vperm.xlu1 %5114, %v1784_v48   ;;  %v389_v27 = vld [vmem:[%s5206_s29 + $0x3e0] sm:$0xff] }
 0x129   : > { %3046 = vmatmul.mubr.bf16.gmra.mrb[8].mxu1 %v6141_v21  ;;  %3115 = vmatpush1.bf16.msra.mxu0 %v1261_v0  ;;  %v1280_v0 = vpack.c.bf16 %v376_v9, %v368_v55  ;;  %v384_v21 = vld [vmem:[%s5206_s29 + $0x3b8] sm:$0xff]  ;;  %v383_v55 = vld [vmem:[%s5206_s29 + $0x3b0] sm:$0xff]  ;;  %v405_v48 = vld [vmem:[%s5206_s29 + $0x460] sm:$0xff] }
 0x12a   : > { %3567 = vmatpush1.bf16.msra.mxu1 %v1263_v52  ;;  %3116 = vmatprep.subr.bf16.mxu0 %v1270_v31  ;;  %v6181_v52 = vcombine.low %v1732_v29, %v1736_v37  ;;  %v392_v31 = vld [vmem:[%s5206_s29 + $0x3f8] sm:$0xff]  ;;  %v1279_v29 = vpack.c.bf16 %v375_v33, %v367_v7  ;;  %v1286_v37 = vpack.c.bf16 %v390_v20, %v382_v19  ;;  %v407_v19 = vld [vmem:[%s5206_s29 + $0x470] sm:$0xff] }
 0x12b   : > { %3568 = vmatprep.subr.bf16.mxu1 %v1272_v41  ;;  %4543 = vmatprep.mubr.msk.bf16.mxu0 %vm2177_vm0, %v6156_v17  ;;  %v1744_v41 = vld [vmem:[%s7113_s1 + $0x138] sm:$0xff]  ;;  %v1288_v9 = vpack.c.bf16 %v392_v31, %v384_v21  ;;  %v397_v21 = vld [vmem:[%s5206_s29 + $0x420] sm:$0xff]  ;;  %v414_v31 = vld [vmem:[%s5206_s29 + $0x4a8] sm:$0xff] }
 0x12c   : > { %4551 = vmatprep.mubr.msk.bf16.mxu1 %vm2177_vm0, %v6156_v17  ;;  %7180 = vst [vmem:[#allocation18_spill] sm:$0xff] %v6181_v52  ;;  %v391_v17 = vld [vmem:[%s5206_s29 + $0x3f0] sm:$0xff]  ;;  %v6194_v51 = vcombine.high %v1740_v8, %v1744_v41 }
 0x12d   : > { %3117 = vmatpush1.bf16.msra.mxu0 %v1269_v4  ;;  %v398_v4 = vld [vmem:[%s5206_s29 + $0x428] sm:$0xff]  ;;  %v1287_v7 = vpack.c.bf16 %v391_v17, %v383_v55  ;;  %v6213_v17 = vcombine.low %v1740_v8, %v1744_v41  ;;  %v1293_v55 = vpack.c.bf16 %v405_v48, %v397_v21  ;;  %v413_v41 = vld [vmem:[%s5206_s29 + $0x4a0] sm:$0xff]  ;;  %v432_v21 = vld [vmem:[%s5206_s29 + $0x538] sm:$0xff] }
 0x12e   : > { %3569 = vmatpush1.bf16.msra.mxu1 %v1271_v47  ;;  %3118 = vmatprep.subr.bf16.mxu0 %v1278_v6  ;;  %7181 = vst [vmem:[#allocation19_spill] sm:$0xff] %v6194_v51  ;;  %v408_v47 = vld [vmem:[%s5206_s29 + $0x478] sm:$0xff]  ;;  %v1285_v6 = vpack.c.bf16 %v389_v27, %v381_v54  ;;  %v1294_v33 = vpack.c.bf16 %v406_v42, %v398_v4  ;;  %v421_v4 = vld [vmem:[%s5206_s29 + $0x4e0] sm:$0xff]  ;;  %v415_v42 = vld [vmem:[%s5206_s29 + $0x4b0] sm:$0xff] }
 0x12f   : > { %3570 = vmatprep.subr.bf16.mxu1 %v1280_v0  ;;  %v399_v0 = vld [vmem:[%s5206_s29 + $0x430] sm:$0xff]  ;;  %v1296_v20 = vpack.c.bf16 %v408_v47, %v400_v23  ;;  %v416_v54 = vld [vmem:[%s5206_s29 + $0x4b8] sm:$0xff]  ;;  %7182 = vst [vmem:[#allocation20_spill] sm:$0xff] %v6213_v17  ;;  %v429_v48 = vld [vmem:[%s5206_s29 + $0x520] sm:$0xff] }
 0x130   : > { %2604 = vmatmul.mubr.bf16.gmra.mrb[12].mxu0 %v6181_v52  ;;  %v1752_v27 = vld [vmem:[%s7113_s1 + $0x178] sm:$0xff]  ;;  %v423_v47 = vld [vmem:[%s5206_s29 + $0x4f0] sm:$0xff] }
 0x131   : > { %3056 = vmatmul.mubr.bf16.gmra.mrb[12].mxu1 %v6181_v52  ;;  %3119 = vmatpush1.bf16.msra.mxu0 %v1277_v39  ;;  %v422_v39 = vld [vmem:[%s5206_s29 + $0x4e8] sm:$0xff] }
 0x132   : > { %3571 = vmatpush1.bf16.msra.mxu1 %v1279_v29  ;;  %3120 = vmatprep.subr.bf16.mxu0 %v1286_v37  ;;  %v424_v29 = vld [vmem:[%s5206_s29 + $0x4f8] sm:$0xff]  ;;  %v1302_v8 = vpack.c.bf16 %v422_v39, %v414_v31  ;;  %v438_v52 = vld [vmem:[%s5206_s29 + $0x568] sm:$0xff]  ;;  %v431_v31 = vld [vmem:[%s5206_s29 + $0x530] sm:$0xff] }
 0x133   : > { %3572 = vmatprep.subr.bf16.mxu1 %v1288_v9  ;;  %4544 = vmatprep.mubr.msk.bf16.mxu0 %vm2177_vm0, %v6194_v51  ;;  %v1748_v37 = vld [vmem:[%s7113_s1 + $0x158] sm:$0xff]  ;;  %v1295_v9 = vpack.c.bf16 %v407_v19, %v399_v0  ;;  %v1304_v23 = vpack.c.bf16 %v424_v29, %v416_v54  ;;  %v1303_v0 = vpack.c.bf16 %v423_v47, %v415_v42  ;;  %v439_v39 = vld [vmem:[%s5206_s29 + $0x570] sm:$0xff]  ;;  %v446_v29 = vld [vmem:[%s5206_s29 + $0x5a8] sm:$0xff] }
 0x134   : > { %4552 = vmatprep.mubr.msk.bf16.mxu1 %vm2177_vm0, %v6194_v51  ;;  %v6226_v51 = vcombine.high %v1748_v37, %v1752_v27  ;;  %v453_v47 = vld [vmem:[%s5206_s29 + $0x5e0] sm:$0xff] }
 0x135   : > { %3121 = vmatpush1.bf16.msra.mxu0 %v1285_v6  ;;  %v430_v6 = vld [vmem:[%s5206_s29 + $0x528] sm:$0xff] }
 0x136   : > { %3573 = vmatpush1.bf16.msra.mxu1 %v1287_v7  ;;  %3122 = vmatprep.subr.bf16.mxu0 %v1294_v33  ;;  %7183 = vst [vmem:[#allocation21_spill] sm:$0xff] %v6226_v51  ;;  %v440_v7 = vld [vmem:[%s5206_s29 + $0x578] sm:$0xff]  ;;  %v1301_v33 = vpack.c.bf16 %v421_v4, %v413_v41  ;;  %v1310_v19 = vpack.c.bf16 %v438_v52, %v430_v6  ;;  %v447_v6 = vld [vmem:[%s5206_s29 + $0x5b0] sm:$0xff] }
 0x137   : > { %3574 = vmatprep.subr.bf16.mxu1 %v1296_v20  ;;  %v437_v20 = vld [vmem:[%s5206_s29 + $0x560] sm:$0xff]  ;;  %v1312_v54 = vpack.c.bf16 %v440_v7, %v432_v21  ;;  %v448_v41 = vld [vmem:[%s5206_s29 + $0x5b8] sm:$0xff]  ;;  %v455_v7 = vld [vmem:[%s5206_s29 + $0x5f0] sm:$0xff] }
 0x138   : > { %2614 = vmatmul.mubr.bf16.gmra.mrb[16].mxu0 %v6213_v17  ;;  %v456_v52 = vld [vmem:[%s5206_s29 + $0x5f8] sm:$0xff]  ;;  %v1309_v42 = vpack.c.bf16 %v437_v20, %v429_v48  ;;  %v461_v20 = vld [vmem:[%s5206_s29 + $0x620] sm:$0xff] }
 0x139   : > { %3066 = vmatmul.mubr.bf16.gmra.mrb[16].mxu1 %v6213_v17  ;;  %3123 = vmatpush1.bf16.msra.mxu0 %v1293_v55  ;;  %v454_v55 = vld [vmem:[%s5206_s29 + $0x5e8] sm:$0xff]  ;;  %v1760_v4 = vld [vmem:[%s7113_s1 + $0x1b8] sm:$0xff]  ;;  %v1320_v21 = vpack.c.bf16 %v456_v52, %v448_v41 }
 0x13a   : > { %3575 = vmatpush1.bf16.msra.mxu1 %v1295_v9  ;;  %3124 = vmatprep.subr.bf16.mxu0 %v1302_v8  ;;  %v6245_v9 = vcombine.low %v1748_v37, %v1752_v27  ;;  %v1756_v8 = vld [vmem:[%s7113_s1 + $0x198] sm:$0xff]  ;;  %v1318_v37 = vpack.c.bf16 %v454_v55, %v446_v29  ;;  %v445_v27 = vld [vmem:[%s5206_s29 + $0x5a0] sm:$0xff]  ;;  %v470_v17 = vld [vmem:[%s5206_s29 + $0x668] sm:$0xff] }
 0x13b   : > { %3576 = vmatprep.subr.bf16.mxu1 %v1304_v23  ;;  %4545 = vmatprep.mubr.msk.bf16.mxu0 %vm2177_vm0, %v6226_v51  ;;  %v1311_v23 = vpack.c.bf16 %v439_v39, %v431_v31  ;;  %v464_v48 = vld [vmem:[%s5206_s29 + $0x638] sm:$0xff]  ;;  %v1319_v31 = vpack.c.bf16 %v455_v7, %v447_v6  ;;  %v463_v29 = vld [vmem:[%s5206_s29 + $0x630] sm:$0xff]  ;;  %v478_v52 = vld [vmem:[%s5206_s29 + $0x6a8] sm:$0xff] }
 0x13c   : > { %4553 = vmatprep.mubr.msk.bf16.mxu1 %vm2177_vm0, %v6226_v51  ;;  %7184 = vst [vmem:[#allocation22_spill] sm:$0xff] %v6245_v9  ;;  %v6258_v51 = vcombine.high %v1756_v8, %v1760_v4  ;;  %v471_v55 = vld [vmem:[%s5206_s29 + $0x670] sm:$0xff]  ;;  %v485_v7 = vld [vmem:[%s5206_s29 + $0x6e0] sm:$0xff] }
 0x13d   : > { %3125 = vmatpush1.bf16.msra.mxu0 %v1301_v33  ;;  %v462_v33 = vld [vmem:[%s5206_s29 + $0x628] sm:$0xff] }
 0x13e   : > { %3577 = vmatpush1.bf16.msra.mxu1 %v1303_v0  ;;  %3126 = vmatprep.subr.bf16.mxu0 %v1310_v19  ;;  %7185 = vst [vmem:[#allocation23_spill] sm:$0xff] %v6258_v51  ;;  %v472_v0 = vld [vmem:[%s5206_s29 + $0x678] sm:$0xff]  ;;  %v1317_v19 = vpack.c.bf16 %v453_v47, %v445_v27  ;;  %v1326_v39 = vpack.c.bf16 %v470_v17, %v462_v33  ;;  %v479_v33 = vld [vmem:[%s5206_s29 + $0x6b0] sm:$0xff] }
 0x13f   : > { %3578 = vmatprep.subr.bf16.mxu1 %v1312_v54  ;;  %v469_v54 = vld [vmem:[%s5206_s29 + $0x660] sm:$0xff]  ;;  %v1328_v41 = vpack.c.bf16 %v472_v0, %v464_v48  ;;  %v480_v27 = vld [vmem:[%s5206_s29 + $0x6b8] sm:$0xff]  ;;  %v487_v0 = vld [vmem:[%s5206_s29 + $0x6f0] sm:$0xff] }
 0x140   : > { %2624 = vmatmul.mubr.bf16.gmra.mrb[20].mxu0 %v6245_v9  ;;  %v488_v17 = vld [vmem:[%s5206_s29 + $0x6f8] sm:$0xff]  ;;  %v1325_v6 = vpack.c.bf16 %v469_v54, %v461_v20  ;;  %v1335_v54 = vpack.c.bf16 %v487_v0, %v479_v33  ;;  %v517_v0 = vld [vmem:[%s5206_s29 + $0x7e0] sm:$0xff] }
 0x141   : > { %3076 = vmatmul.mubr.bf16.gmra.mrb[20].mxu1 %v6245_v9  ;;  %3127 = vmatpush1.bf16.msra.mxu0 %v1309_v42  ;;  %v486_v42 = vld [vmem:[%s5206_s29 + $0x6e8] sm:$0xff]  ;;  %v1768_v47 = vld [vmem:[%s7113_s1 + $0x1f8] sm:$0xff]  ;;  %v1336_v48 = vpack.c.bf16 %v488_v17, %v480_v27  ;;  %v503_v27 = vld [vmem:[%s5206_s29 + $0x770] sm:$0xff] }
 0x142   : > { %3579 = vmatpush1.bf16.msra.mxu1 %v1311_v23  ;;  %3128 = vmatprep.subr.bf16.mxu0 %v1318_v37  ;;  %v6277_v23 = vcombine.low %v1756_v8, %v1760_v4  ;;  %v1764_v37 = vld [vmem:[%s7113_s1 + $0x1d8] sm:$0xff]  ;;  %v1334_v8 = vpack.c.bf16 %v486_v42, %v478_v52  ;;  %v477_v4 = vld [vmem:[%s5206_s29 + $0x6a0] sm:$0xff]  ;;  %v494_v9 = vld [vmem:[%s5206_s29 + $0x728] sm:$0xff] }
 0x143   : > { %3580 = vmatprep.subr.bf16.mxu1 %v1320_v21  ;;  %4546 = vmatprep.mubr.msk.bf16.mxu0 %vm2177_vm0, %v6258_v51  ;;  %v1327_v21 = vpack.c.bf16 %v471_v55, %v463_v29  ;;  %v496_v20 = vld [vmem:[%s5206_s29 + $0x738] sm:$0xff]  ;;  %v493_v55 = vld [vmem:[%s5206_s29 + $0x720] sm:$0xff]  ;;  %v495_v52 = vld [vmem:[%s5206_s29 + $0x730] sm:$0xff] }
 0x144   : > { %4554 = vmatprep.mubr.msk.bf16.mxu1 %vm2177_vm0, %v6258_v51  ;;  %v6290_v51 = vcombine.high %v1764_v37, %v1768_v47  ;;  %v510_v17 = vld [vmem:[%s5206_s29 + $0x7a8] sm:$0xff] }
 0x145   : > { %3129 = vmatpush1.bf16.msra.mxu0 %v1317_v19  ;;  %v502_v19 = vld [vmem:[%s5206_s29 + $0x768] sm:$0xff] }
 0x146   : > { %3581 = vmatpush1.bf16.msra.mxu1 %v1319_v31  ;;  %3130 = vmatprep.subr.bf16.mxu0 %v1326_v39  ;;  %v504_v31 = vld [vmem:[%s5206_s29 + $0x778] sm:$0xff]  ;;  %v1333_v39 = vpack.c.bf16 %v485_v7, %v477_v4  ;;  %v1342_v29 = vpack.c.bf16 %v502_v19, %v494_v9  ;;  %v6308_v9 = vcombine.low %v1764_v37, %v1768_v47  ;;  %v511_v19 = vld [vmem:[%s5206_s29 + $0x7b0] sm:$0xff]  ;;  %v526_v47 = vld [vmem:[%s5206_s29 + $0x828] sm:$0xff] }
 0x147   : > { %3582 = vmatprep.subr.bf16.mxu1 %v1328_v41  ;;  %v501_v41 = vld [vmem:[%s5206_s29 + $0x760] sm:$0xff]  ;;  %v1344_v42 = vpack.c.bf16 %v504_v31, %v496_v20  ;;  %v1343_v7 = vpack.c.bf16 %v503_v27, %v495_v52  ;;  %v519_v37 = vld [vmem:[%s5206_s29 + $0x7f0] sm:$0xff]  ;;  %v534_v31 = vld [vmem:[%s5206_s29 + $0x868] sm:$0xff] }
 0x148   : > { %2634 = vmatmul.mubr.bf16.gmra.mrb[24].mxu0 %v6277_v23  ;;  %v1341_v4 = vpack.c.bf16 %v501_v41, %v493_v55  ;;  %v1351_v55 = vpack.c.bf16 %v519_v37, %v511_v19  ;;  %v1358_v41 = vpack.c.bf16 %v534_v31, %v526_v47  ;;  %v525_v52 = vld [vmem:[%s5206_s29 + $0x820] sm:$0xff]  ;;  %v527_v27 = vld [vmem:[%s5206_s29 + $0x830] sm:$0xff]  ;;  %v558_v31 = vld [vmem:[%s5206_s29 + $0x928] sm:$0xff] }
 0x149   : > { %3086 = vmatmul.mubr.bf16.gmra.mrb[24].mxu1 %v6277_v23  ;;  %3131 = vmatpush1.bf16.msra.mxu0 %v1325_v6  ;;  %v518_v6 = vld [vmem:[%s5206_s29 + $0x7e8] sm:$0xff]  ;;  %v541_v19 = vld [vmem:[%s5206_s29 + $0x8a0] sm:$0xff]  ;;  %v543_v37 = vld [vmem:[%s5206_s29 + $0x8b0] sm:$0xff] }
 0x14a   : > { %3583 = vmatpush1.bf16.msra.mxu1 %v1327_v21  ;;  %3132 = vmatprep.subr.bf16.mxu0 %v1334_v8  ;;  %v512_v21 = vld [vmem:[%s5206_s29 + $0x7b8] sm:$0xff]  ;;  %v1350_v33 = vpack.c.bf16 %v518_v6, %v510_v17  ;;  %v535_v6 = vld [vmem:[%s5206_s29 + $0x870] sm:$0xff] }
 0x14b   : > { %3584 = vmatprep.subr.bf16.mxu1 %v1336_v48  ;;  %4547 = vmatprep.mubr.msk.bf16.mxu0 %vm2177_vm0, %v6290_v51  ;;  %v520_v8 = vld [vmem:[%s5206_s29 + $0x7f8] sm:$0xff]  ;;  %v509_v48 = vld [vmem:[%s5206_s29 + $0x7a0] sm:$0xff] }
 0x14c   : > { %4555 = vmatprep.mubr.msk.bf16.mxu1 %vm2177_vm0, %v6290_v51  ;;  %v1352_v20 = vpack.c.bf16 %v520_v8, %v512_v21  ;;  %v542_v21 = vld [vmem:[%s5206_s29 + $0x8a8] sm:$0xff] }
 0x14d   : > { %3133 = vmatpush1.bf16.msra.mxu0 %v1333_v39  ;;  %v528_v39 = vld [vmem:[%s5206_s29 + $0x838] sm:$0xff]  ;;  %v550_v8 = vld [vmem:[%s5206_s29 + $0x8e8] sm:$0xff] }
 0x14e   : > { %3585 = vmatpush1.bf16.msra.mxu1 %v1335_v54  ;;  %3134 = vmatprep.subr.bf16.mxu0 %v1342_v29  ;;  %v536_v54 = vld [vmem:[%s5206_s29 + $0x878] sm:$0xff]  ;;  %v1349_v29 = vpack.c.bf16 %v517_v0, %v509_v48  ;;  %v1359_v48 = vpack.c.bf16 %v535_v6, %v527_v27  ;;  %v1366_v0 = vpack.c.bf16 %v550_v8, %v542_v21  ;;  %v565_v27 = vld [vmem:[%s5206_s29 + $0x960] sm:$0xff]  ;;  %v567_v21 = vld [vmem:[%s5206_s29 + $0x970] sm:$0xff] }
 0x14f   : > { %3586 = vmatprep.subr.bf16.mxu1 %v1344_v42  ;;  %v533_v42 = vld [vmem:[%s5206_s29 + $0x860] sm:$0xff]  ;;  %v1360_v17 = vpack.c.bf16 %v536_v54, %v528_v39  ;;  %v566_v39 = vld [vmem:[%s5206_s29 + $0x968] sm:$0xff]  ;;  %v560_v54 = vld [vmem:[%s5206_s29 + $0x938] sm:$0xff] }
 0x150   : > { %2644 = vmatmul.mubr.bf16.gmra.mrb[28].mxu0 %v6308_v9  ;;  %v574_v8 = vld [vmem:[%s5206_s29 + $0x9a8] sm:$0xff] }
 0x151   : > { %3096 = vmatmul.mubr.bf16.gmra.mrb[28].mxu1 %v6308_v9  ;;  %3135 = vmatpush1.bf16.msra.mxu0 %v1341_v4  ;;  %v544_v4 = vld [vmem:[%s5206_s29 + $0x8b8] sm:$0xff] }
 0x152   : > { %3587 = vmatpush1.bf16.msra.mxu1 %v1343_v7  ;;  %3136 = vmatprep.subr.bf16.mxu0 %v1350_v33  ;;  %v552_v7 = vld [vmem:[%s5206_s29 + $0x8f8] sm:$0xff]  ;;  %v1357_v33 = vpack.c.bf16 %v533_v42, %v525_v52  ;;  %v1374_v52 = vpack.c.bf16 %v566_v39, %v558_v31  ;;  %v557_v42 = vld [vmem:[%s5206_s29 + $0x920] sm:$0xff]  ;;  %v598_v31 = vld [vmem:[%s5206_s29 + $0xa68] sm:$0xff] }
 0x153   : > { %3588 = vmatprep.subr.bf16.mxu1 %v1352_v20  ;;  %3138 = vmatprep.mubr.bf16.mxu0 %v5194_v2  ;;  %v549_v20 = vld [vmem:[%s5206_s29 + $0x8e0] sm:$0xff]  ;;  %v1368_v47 = vpack.c.bf16 %v552_v7, %v544_v4  ;;  %v576_v4 = vld [vmem:[%s5206_s29 + $0x9b8] sm:$0xff] }
 0x154   : > { %3590 = vmatprep.mubr.bf16.mxu1 %v5194_v2  ;;  %v551_v2 = vld [vmem:[%s5206_s29 + $0x8f0] sm:$0xff]  ;;  %v584_v7 = vld [vmem:[%s5206_s29 + $0x9f8] sm:$0xff] }
 0x155   : > { %3137 = vmatpush1.bf16.msra.mxu0 %v1349_v29  ;;  %v568_v29 = vld [vmem:[%s5206_s29 + $0x978] sm:$0xff] }
 0x156   : > { %3589 = vmatpush1.bf16.msra.mxu1 %v1351_v55  ;;  %3219 = vmatprep.subr.bf16.mxu0 %v1358_v41  ;;  %v1365_v55 = vpack.c.bf16 %v549_v20, %v541_v19  ;;  %v1367_v41 = vpack.c.bf16 %v551_v2, %v543_v37  ;;  %v1376_v6 = vpack.c.bf16 %v568_v29, %v560_v54  ;;  %v573_v19 = vld [vmem:[%s5206_s29 + $0x9a0] sm:$0xff]  ;;  %v575_v37 = vld [vmem:[%s5206_s29 + $0x9b0] sm:$0xff]  ;;  %v590_v2 = vld [vmem:[%s5206_s29 + $0xa28] sm:$0xff] }
 0x157   : > { %3671 = vmatprep.subr.bf16.mxu1 %v1360_v17  ;;  %v559_v17 = vld [vmem:[%s5206_s29 + $0x930] sm:$0xff]  ;;  %v581_v20 = vld [vmem:[%s5206_s29 + $0x9e0] sm:$0xff]  ;;  %v592_v39 = vld [vmem:[%s5206_s29 + $0xa38] sm:$0xff] }
 0x158   : > { %3139 = vmatmul.mubr.bf16.vlgmr.msra.gmra.mrb[32].mxu0 %v5196_v3  ;;  %v600_v54 = vld [vmem:[%s5206_s29 + $0xa78] sm:$0xff]  ;;  %v1381_v29 = vpack.c.bf16 %v581_v20, %v573_v19  ;;  %v607_v19 = vld [vmem:[%s5206_s29 + $0xab0] sm:$0xff] }
 0x159   : > { %3220 = vmatpush1.bf16.msra.mxu0 %v1357_v33  ;;  %3591 = vmatmul.mubr.bf16.vlgmr.msra.gmra.mrb[32].mxu1 %v5196_v3  ;;  %v582_v3 = vld [vmem:[%s5206_s29 + $0x9e8] sm:$0xff]  ;;  %v1373_v33 = vpack.c.bf16 %v565_v27, %v557_v42  ;;  %v597_v42 = vld [vmem:[%s5206_s29 + $0xa60] sm:$0xff]  ;;  %v591_v27 = vld [vmem:[%s5206_s29 + $0xa30] sm:$0xff] }
 0x15a   : > { %3672 = vmatpush1.bf16.msra.mxu1 %v1359_v48  ;;  %3221 = vmatprep.subr.bf16.mxu0 %v1366_v0  ;;  %v1375_v48 = vpack.c.bf16 %v567_v21, %v559_v17  ;;  %v1382_v0 = vpack.c.bf16 %v582_v3, %v574_v8  ;;  %v1392_v17 = vpack.c.bf16 %v600_v54, %v592_v39  ;;  %v606_v21 = vld [vmem:[%s5206_s29 + $0xaa8] sm:$0xff]  ;;  %v608_v8 = vld [vmem:[%s5206_s29 + $0xab8] sm:$0xff] }
 0x15b   : > { %3673 = vmatprep.subr.bf16.mxu1 %v1368_v47  ;;  %3148 = vmatprep.mubr.bf16.mxu0 %v5358_v34  ;;  %v1384_v47 = vpack.c.bf16 %v584_v7, %v576_v4  ;;  %v616_v3 = vld [vmem:[%s5206_s29 + $0xaf8] sm:$0xff] }
 0x15c   : > { %3600 = vmatprep.mubr.bf16.mxu1 %v5358_v34  ;;  %v583_v34 = vld [vmem:[%s5206_s29 + $0x9f0] sm:$0xff]  ;;  %v1400_v20 = vpack.c.bf16 %v616_v3, %v608_v8  ;;  %v637_v3 = vld [vmem:[%s5206_s29 + $0xba0] sm:$0xff] }
 0x15d   : > { %3222 = vmatpush1.bf16.msra.mxu0 %v1365_v55  ;;  %v1383_v55 = vpack.c.bf16 %v583_v34, %v575_v37  ;;  %v622_v37 = vld [vmem:[%s5206_s29 + $0xb28] sm:$0xff]  ;;  %v624_v34 = vld [vmem:[%s5206_s29 + $0xb38] sm:$0xff] }
 0x15e   : > { %3674 = vmatpush1.bf16.msra.mxu1 %v1367_v41  ;;  %3223 = vmatprep.subr.bf16.mxu0 %v1374_v52  ;;  %v1390_v41 = vpack.c.bf16 %v598_v31, %v590_v2  ;;  %v589_v52 = vld [vmem:[%s5206_s29 + $0xa20] sm:$0xff]  ;;  %v632_v2 = vld [vmem:[%s5206_s29 + $0xb78] sm:$0xff] }
 0x15f   : > { %3675 = vmatprep.subr.bf16.mxu1 %v1376_v6  ;;  %v599_v6 = vld [vmem:[%s5206_s29 + $0xa70] sm:$0xff]  ;;  %v1389_v4 = vpack.c.bf16 %v597_v42, %v589_v52  ;;  %v1408_v52 = vpack.c.bf16 %v632_v2, %v624_v34  ;;  %v653_v34 = vld [vmem:[%s5206_s29 + $0xc20] sm:$0xff] }
 0x160   : > { %3149 = vmatmul.mubr.bf16.gmra.mrb[36].mxu0 %v5377_v50  ;;  %v1391_v7 = vpack.c.bf16 %v599_v6, %v591_v27  ;;  %v631_v42 = vld [vmem:[%s5206_s29 + $0xb70] sm:$0xff]  ;;  %v638_v27 = vld [vmem:[%s5206_s29 + $0xba8] sm:$0xff]  ;;  %v648_v6 = vld [vmem:[%s5206_s29 + $0xbf8] sm:$0xff] }
 0x161   : > { %3224 = vmatpush1.bf16.msra.mxu0 %v1373_v33  ;;  %3601 = vmatmul.mubr.bf16.gmra.mrb[36].mxu1 %v5377_v50  ;;  %v614_v50 = vld [vmem:[%s5206_s29 + $0xae8] sm:$0xff]  ;;  %v661_v2 = vld [vmem:[%s5206_s29 + $0xc60] sm:$0xff] }
 0x162   : > { %3676 = vmatpush1.bf16.msra.mxu1 %v1375_v48  ;;  %3225 = vmatprep.subr.bf16.mxu0 %v1382_v0  ;;  %v1398_v33 = vpack.c.bf16 %v614_v50, %v606_v21  ;;  %v605_v48 = vld [vmem:[%s5206_s29 + $0xaa0] sm:$0xff] }
 0x163   : > { %3677 = vmatprep.subr.bf16.mxu1 %v1384_v47  ;;  %3158 = vmatprep.mubr.bf16.mxu0 %v5388_v62  ;;  %v613_v0 = vld [vmem:[%s5206_s29 + $0xae0] sm:$0xff]  ;;  %v630_v47 = vld [vmem:[%s5206_s29 + $0xb68] sm:$0xff] }
 0x164   : > { %3610 = vmatprep.mubr.bf16.mxu1 %v5388_v62  ;;  %v615_v62 = vld [vmem:[%s5206_s29 + $0xaf0] sm:$0xff]  ;;  %v1397_v31 = vpack.c.bf16 %v613_v0, %v605_v48  ;;  %v1406_v54 = vpack.c.bf16 %v630_v47, %v622_v37  ;;  %v654_v48 = vld [vmem:[%s5206_s29 + $0xc28] sm:$0xff] }
 0x165   : > { %3226 = vmatpush1.bf16.msra.mxu0 %v1381_v29  ;;  %v1399_v39 = vpack.c.bf16 %v615_v62, %v607_v19  ;;  %v621_v29 = vld [vmem:[%s5206_s29 + $0xb20] sm:$0xff]  ;;  %v662_v0 = vld [vmem:[%s5206_s29 + $0xc68] sm:$0xff]  ;;  %v656_v19 = vld [vmem:[%s5206_s29 + $0xc38] sm:$0xff] }
 0x166   : > { %3678 = vmatpush1.bf16.msra.mxu1 %v1383_v55  ;;  %3227 = vmatprep.subr.bf16.mxu0 %v1390_v41  ;;  %v629_v55 = vld [vmem:[%s5206_s29 + $0xb60] sm:$0xff]  ;;  %v623_v41 = vld [vmem:[%s5206_s29 + $0xb30] sm:$0xff]  ;;  %v1422_v47 = vpack.c.bf16 %v662_v0, %v654_v48 }
 0x167   : > { %3679 = vmatprep.subr.bf16.mxu1 %v1392_v17  ;;  %v640_v17 = vld [vmem:[%s5206_s29 + $0xbb8] sm:$0xff]  ;;  %v1405_v21 = vpack.c.bf16 %v629_v55, %v621_v29  ;;  %v1407_v50 = vpack.c.bf16 %v631_v42, %v623_v41  ;;  %v670_v29 = vld [vmem:[%s5206_s29 + $0xca8] sm:$0xff]  ;;  %v685_v48 = vld [vmem:[%s5206_s29 + $0xd20] sm:$0xff] }
 0x168   : > { %3159 = vmatmul.mubr.bf16.gmra.mrb[40].mxu0 %v5407_v16  ;;  %v672_v55 = vld [vmem:[%s5206_s29 + $0xcb8] sm:$0xff]  ;;  %v693_v0 = vld [vmem:[%s5206_s29 + $0xd60] sm:$0xff] }
 0x169   : > { %3228 = vmatpush1.bf16.msra.mxu0 %v1389_v4  ;;  %3611 = vmatmul.mubr.bf16.gmra.mrb[40].mxu1 %v5407_v16  ;;  %v646_v16 = vld [vmem:[%s5206_s29 + $0xbe8] sm:$0xff]  ;;  %v645_v4 = vld [vmem:[%s5206_s29 + $0xbe0] sm:$0xff]  ;;  %v680_v41 = vld [vmem:[%s5206_s29 + $0xcf8] sm:$0xff] }
 0x16a   : > { %3680 = vmatpush1.bf16.msra.mxu1 %v1391_v7  ;;  %3229 = vmatprep.subr.bf16.mxu0 %v1398_v33  ;;  %v1414_v8 = vpack.c.bf16 %v646_v16, %v638_v27  ;;  %v639_v7 = vld [vmem:[%s5206_s29 + $0xbb0] sm:$0xff]  ;;  %v1416_v33 = vpack.c.bf16 %v648_v6, %v640_v17  ;;  %v1413_v62 = vpack.c.bf16 %v645_v4, %v637_v3  ;;  %v669_v16 = vld [vmem:[%s5206_s29 + $0xca0] sm:$0xff]  ;;  %v688_v3 = vld [vmem:[%s5206_s29 + $0xd38] sm:$0xff] }
 0x16b   : > { %3681 = vmatprep.subr.bf16.mxu1 %v1400_v20  ;;  %3168 = vmatprep.mubr.bf16.mxu0 %v5418_v28  ;;  %v664_v20 = vld [vmem:[%s5206_s29 + $0xc78] sm:$0xff]  ;;  %v677_v17 = vld [vmem:[%s5206_s29 + $0xce0] sm:$0xff]  ;;  %v671_v6 = vld [vmem:[%s5206_s29 + $0xcb0] sm:$0xff] }
 0x16c   : > { %3620 = vmatprep.mubr.bf16.mxu1 %v5418_v28  ;;  %v647_v28 = vld [vmem:[%s5206_s29 + $0xbf0] sm:$0xff]  ;;  %v696_v4 = vld [vmem:[%s5206_s29 + $0xd78] sm:$0xff] }
 0x16d   : > { %3230 = vmatpush1.bf16.msra.mxu0 %v1397_v31  ;;  %v1415_v37 = vpack.c.bf16 %v647_v28, %v639_v7  ;;  %v655_v31 = vld [vmem:[%s5206_s29 + $0xc30] sm:$0xff]  ;;  %v1429_v7 = vpack.c.bf16 %v677_v17, %v669_v16 }
 0x16e   : > { %3682 = vmatpush1.bf16.msra.mxu1 %v1399_v39  ;;  %3231 = vmatprep.subr.bf16.mxu0 %v1406_v54  ;;  %v1424_v39 = vpack.c.bf16 %v664_v20, %v656_v19  ;;  %v663_v54 = vld [vmem:[%s5206_s29 + $0xc70] sm:$0xff]  ;;  %v1440_v20 = vpack.c.bf16 %v696_v4, %v688_v3  ;;  %v734_v4 = vld [vmem:[%s5206_s29 + $0xea8] sm:$0xff] }
 0x16f   : > { %3683 = vmatprep.subr.bf16.mxu1 %v1408_v52  ;;  %v1421_v52 = vpack.c.bf16 %v661_v2, %v653_v34  ;;  %v1423_v42 = vpack.c.bf16 %v663_v54, %v655_v31  ;;  %v687_v19 = vld [vmem:[%s5206_s29 + $0xd30] sm:$0xff]  ;;  %v712_v34 = vld [vmem:[%s5206_s29 + $0xdf8] sm:$0xff]  ;;  %v1437_v2 = vpack.c.bf16 %v693_v0, %v685_v48  ;;  %v701_v54 = vld [vmem:[%s5206_s29 + $0xda0] sm:$0xff] }
 0x170   : > { %3169 = vmatmul.mubr.bf16.gmra.mrb[44].mxu0 %v5437_v45  ;;  %v727_v3 = vld [vmem:[%s5206_s29 + $0xe70] sm:$0xff] }
 0x171   : > { %3232 = vmatpush1.bf16.msra.mxu0 %v1405_v21  ;;  %3621 = vmatmul.mubr.bf16.gmra.mrb[44].mxu1 %v5437_v45  ;;  %v678_v45 = vld [vmem:[%s5206_s29 + $0xce8] sm:$0xff]  ;;  %v1432_v21 = vpack.c.bf16 %v680_v41, %v672_v55 }
 0x172   : > { %3684 = vmatpush1.bf16.msra.mxu1 %v1407_v50  ;;  %3233 = vmatprep.subr.bf16.mxu0 %v1414_v8  ;;  %v1430_v27 = vpack.c.bf16 %v678_v45, %v670_v29  ;;  %v686_v50 = vld [vmem:[%s5206_s29 + $0xd28] sm:$0xff]  ;;  %v709_v29 = vld [vmem:[%s5206_s29 + $0xde0] sm:$0xff]  ;;  %v703_v45 = vld [vmem:[%s5206_s29 + $0xdb0] sm:$0xff] }
 0x173   : > { %3685 = vmatprep.subr.bf16.mxu1 %v1416_v33  ;;  %3178 = vmatprep.mubr.bf16.mxu0 %v5448_v58  ;;  %v694_v8 = vld [vmem:[%s5206_s29 + $0xd68] sm:$0xff]  ;;  %v1445_v16 = vpack.c.bf16 %v709_v29, %v701_v54  ;;  %v749_v29 = vld [vmem:[%s5206_s29 + $0xf20] sm:$0xff] }
 0x174   : > { %3630 = vmatprep.mubr.bf16.mxu1 %v5448_v58  ;;  %v679_v58 = vld [vmem:[%s5206_s29 + $0xcf0] sm:$0xff]  ;;  %v1438_v28 = vpack.c.bf16 %v694_v8, %v686_v50  ;;  %v718_v41 = vld [vmem:[%s5206_s29 + $0xe28] sm:$0xff] }
 0x175   : > { %3234 = vmatpush1.bf16.msra.mxu0 %v1413_v62  ;;  %v1431_v33 = vpack.c.bf16 %v679_v58, %v671_v6  ;;  %v695_v62 = vld [vmem:[%s5206_s29 + $0xd70] sm:$0xff]  ;;  %v725_v58 = vld [vmem:[%s5206_s29 + $0xe60] sm:$0xff] }
 0x176   : > { %3686 = vmatpush1.bf16.msra.mxu1 %v1415_v37  ;;  %3235 = vmatprep.subr.bf16.mxu0 %v1422_v47  ;;  %v702_v37 = vld [vmem:[%s5206_s29 + $0xda8] sm:$0xff]  ;;  %v704_v47 = vld [vmem:[%s5206_s29 + $0xdb8] sm:$0xff]  ;;  %v1439_v31 = vpack.c.bf16 %v695_v62, %v687_v19  ;;  %v719_v50 = vld [vmem:[%s5206_s29 + $0xe30] sm:$0xff] }
 0x177   : > { %3687 = vmatprep.subr.bf16.mxu1 %v1424_v39  ;;  %v1448_v55 = vpack.c.bf16 %v712_v34, %v704_v47  ;;  %v1455_v48 = vpack.c.bf16 %v727_v3, %v719_v50  ;;  %v733_v19 = vld [vmem:[%s5206_s29 + $0xea0] sm:$0xff]  ;;  %v735_v62 = vld [vmem:[%s5206_s29 + $0xeb0] sm:$0xff]  ;;  %v758_v47 = vld [vmem:[%s5206_s29 + $0xf68] sm:$0xff] }
 0x178   : > { %3179 = vmatmul.mubr.bf16.gmra.mrb[48].mxu0 %v5467_v13  ;;  %v752_v34 = vld [vmem:[%s5206_s29 + $0xf38] sm:$0xff]  ;;  %v767_v50 = vld [vmem:[%s5206_s29 + $0xfb0] sm:$0xff]  ;;  %v782_v3 = vld [vmem:[%s5206_s29 + $0x1028] sm:$0xff] }
 0x179   : > { %3236 = vmatpush1.bf16.msra.mxu0 %v1421_v52  ;;  %3631 = vmatmul.mubr.bf16.gmra.mrb[48].mxu1 %v5467_v13  ;;  %v710_v13 = vld [vmem:[%s5206_s29 + $0xde8] sm:$0xff] }
 0x17a   : > { %3688 = vmatpush1.bf16.msra.mxu1 %v1423_v42  ;;  %3237 = vmatprep.subr.bf16.mxu0 %v1430_v27  ;;  %v1446_v39 = vpack.c.bf16 %v710_v13, %v702_v37  ;;  %v726_v52 = vld [vmem:[%s5206_s29 + $0xe68] sm:$0xff]  ;;  %v720_v42 = vld [vmem:[%s5206_s29 + $0xe38] sm:$0xff] }
 0x17b   : > { %3689 = vmatprep.subr.bf16.mxu1 %v1432_v21  ;;  %3188 = vmatprep.mubr.bf16.mxu0 %v5478_v26  ;;  %v728_v27 = vld [vmem:[%s5206_s29 + $0xe78] sm:$0xff]  ;;  %v1454_v6 = vpack.c.bf16 %v726_v52, %v718_v41  ;;  %v717_v21 = vld [vmem:[%s5206_s29 + $0xe20] sm:$0xff]  ;;  %v750_v13 = vld [vmem:[%s5206_s29 + $0xf28] sm:$0xff] }
 0x17c   : > { %3640 = vmatprep.mubr.bf16.mxu1 %v5478_v26  ;;  %v711_v26 = vld [vmem:[%s5206_s29 + $0xdf0] sm:$0xff]  ;;  %v1456_v8 = vpack.c.bf16 %v728_v27, %v720_v42  ;;  %v1470_v54 = vpack.c.bf16 %v758_v47, %v750_v13  ;;  %v766_v52 = vld [vmem:[%s5206_s29 + $0xfa8] sm:$0xff]  ;;  %v768_v42 = vld [vmem:[%s5206_s29 + $0xfb8] sm:$0xff] }
 0x17d   : > { %3238 = vmatpush1.bf16.msra.mxu0 %v1429_v7  ;;  %v1447_v17 = vpack.c.bf16 %v711_v26, %v703_v45  ;;  %v736_v7 = vld [vmem:[%s5206_s29 + $0xeb8] sm:$0xff]  ;;  %v757_v45 = vld [vmem:[%s5206_s29 + $0xf60] sm:$0xff]  ;;  %v759_v41 = vld [vmem:[%s5206_s29 + $0xf70] sm:$0xff] }
 0x17e   : > { %3690 = vmatpush1.bf16.msra.mxu1 %v1431_v33  ;;  %3239 = vmatprep.subr.bf16.mxu0 %v1438_v28  ;;  %v744_v33 = vld [vmem:[%s5206_s29 + $0xef8] sm:$0xff]  ;;  %v1453_v28 = vpack.c.bf16 %v725_v58, %v717_v21  ;;  %v765_v21 = vld [vmem:[%s5206_s29 + $0xfa0] sm:$0xff] }
 0x17f   : > { %3691 = vmatprep.subr.bf16.mxu1 %v1440_v20  ;;  %v741_v20 = vld [vmem:[%s5206_s29 + $0xee0] sm:$0xff]  ;;  %v1464_v37 = vpack.c.bf16 %v744_v33, %v736_v7  ;;  %v776_v27 = vld [vmem:[%s5206_s29 + $0xff8] sm:$0xff] }
 0x180   : > { %3189 = vmatmul.mubr.bf16.gmra.mrb[52].mxu0 %v5497_v44  ;;  %v773_v58 = vld [vmem:[%s5206_s29 + $0xfe0] sm:$0xff]  ;;  %v792_v7 = vld [vmem:[%s5206_s29 + $0x1078] sm:$0xff] }
 0x181   : > { %3240 = vmatpush1.bf16.msra.mxu0 %v1437_v2  ;;  %3641 = vmatmul.mubr.bf16.gmra.mrb[52].mxu1 %v5497_v44  ;;  %v742_v44 = vld [vmem:[%s5206_s29 + $0xee8] sm:$0xff]  ;;  %v760_v2 = vld [vmem:[%s5206_s29 + $0xf78] sm:$0xff]  ;;  %v1477_v33 = vpack.c.bf16 %v773_v58, %v765_v21  ;;  %v823_v58 = vld [vmem:[%s5206_s29 + $0x1170] sm:$0xff] }
 0x182   : > { %3692 = vmatpush1.bf16.msra.mxu1 %v1439_v31  ;;  %3241 = vmatprep.subr.bf16.mxu0 %v1446_v39  ;;  %v1462_v0 = vpack.c.bf16 %v742_v44, %v734_v4  ;;  %v1461_v31 = vpack.c.bf16 %v741_v20, %v733_v19  ;;  %v1472_v26 = vpack.c.bf16 %v760_v2, %v752_v34  ;;  %v790_v4 = vld [vmem:[%s5206_s29 + $0x1068] sm:$0xff]  ;;  %v784_v44 = vld [vmem:[%s5206_s29 + $0x1038] sm:$0xff]  ;;  %v789_v19 = vld [vmem:[%s5206_s29 + $0x1060] sm:$0xff] }
 0x183   : > { %3693 = vmatprep.subr.bf16.mxu1 %v1448_v55  ;;  %3198 = vmatprep.mubr.bf16.mxu0 %v5508_v59  ;;  %v751_v55 = vld [vmem:[%s5206_s29 + $0xf30] sm:$0xff]  ;;  %v800_v13 = vld [vmem:[%s5206_s29 + $0x10b8] sm:$0xff] }
 0x184   : > { %3650 = vmatprep.mubr.bf16.mxu1 %v5508_v59  ;;  %v743_v59 = vld [vmem:[%s5206_s29 + $0xef0] sm:$0xff]  ;;  %v808_v47 = vld [vmem:[%s5206_s29 + $0x10f8] sm:$0xff] }
 0x185   : > { %3242 = vmatpush1.bf16.msra.mxu0 %v1445_v16  ;;  %v1463_v39 = vpack.c.bf16 %v743_v59, %v735_v62  ;;  %v1469_v16 = vpack.c.bf16 %v757_v45, %v749_v29  ;;  %v783_v20 = vld [vmem:[%s5206_s29 + $0x1030] sm:$0xff]  ;;  %v1488_v62 = vpack.c.bf16 %v792_v7, %v784_v44  ;;  %v798_v59 = vld [vmem:[%s5206_s29 + $0x10a8] sm:$0xff]  ;;  %v1496_v45 = vpack.c.bf16 %v808_v47, %v800_v13  ;;  %v829_v7 = vld [vmem:[%s5206_s29 + $0x11a0] sm:$0xff] }
 0x186   : > { %3694 = vmatpush1.bf16.msra.mxu1 %v1447_v17  ;;  %3243 = vmatprep.subr.bf16.mxu0 %v1454_v6  ;;  %v1471_v17 = vpack.c.bf16 %v759_v41, %v751_v55  ;;  %v799_v29 = vld [vmem:[%s5206_s29 + $0x10b0] sm:$0xff]  ;;  %v814_v55 = vld [vmem:[%s5206_s29 + $0x1128] sm:$0xff]  ;;  %v816_v41 = vld [vmem:[%s5206_s29 + $0x1138] sm:$0xff] }
 0x187   : > { %3695 = vmatprep.subr.bf16.mxu1 %v1456_v8  ;;  %v1480_v8 = vpack.c.bf16 %v776_v27, %v768_v42  ;;  %v845_v13 = vld [vmem:[%s5206_s29 + $0x1220] sm:$0xff] }
 0x188   : > { %3199 = vmatmul.mubr.bf16.gmra.mrb[56].mxu0 %v5527_v15  ;;  %v853_v47 = vld [vmem:[%s5206_s29 + $0x1260] sm:$0xff] }
 0x189   : > { %3244 = vmatpush1.bf16.msra.mxu0 %v1453_v28  ;;  %3651 = vmatmul.mubr.bf16.gmra.mrb[56].mxu1 %v5527_v15  ;;  %v774_v15 = vld [vmem:[%s5206_s29 + $0xfe8] sm:$0xff] }
 0x18a   : > { %3696 = vmatpush1.bf16.msra.mxu1 %v1455_v48  ;;  %3245 = vmatprep.subr.bf16.mxu0 %v1462_v0  ;;  %v1478_v6 = vpack.c.bf16 %v774_v15, %v766_v52  ;;  %v1486_v48 = vpack.c.bf16 %v790_v4, %v782_v3  ;;  %v781_v0 = vld [vmem:[%s5206_s29 + $0x1020] sm:$0xff]  ;;  %v824_v52 = vld [vmem:[%s5206_s29 + $0x1178] sm:$0xff] }
 0x18b   : > { %3697 = vmatprep.subr.bf16.mxu1 %v1464_v37  ;;  %3208 = vmatprep.mubr.bf16.mxu0 %v5538_v30  ;;  %v791_v37 = vld [vmem:[%s5206_s29 + $0x1070] sm:$0xff]  ;;  %v1485_v34 = vpack.c.bf16 %v789_v19, %v781_v0  ;;  %v1504_v21 = vpack.c.bf16 %v824_v52, %v816_v41  ;;  %v846_v0 = vld [vmem:[%s5206_s29 + $0x1228] sm:$0xff]  ;;  %v869_v41 = vld [vmem:[%s5206_s29 + $0x12e0] sm:$0xff] }
 0x18c   : > { %3660 = vmatprep.mubr.bf16.mxu1 %v5538_v30  ;;  %v775_v30 = vld [vmem:[%s5206_s29 + $0xff0] sm:$0xff]  ;;  %v1487_v2 = vpack.c.bf16 %v791_v37, %v783_v20  ;;  %v854_v19 = vld [vmem:[%s5206_s29 + $0x1268] sm:$0xff]  ;;  %v848_v20 = vld [vmem:[%s5206_s29 + $0x1238] sm:$0xff] }
 0x18d   : > { %3246 = vmatpush1.bf16.msra.mxu0 %v1461_v31  ;;  %v1479_v28 = vpack.c.bf16 %v775_v30, %v767_v50  ;;  %v830_v50 = vld [vmem:[%s5206_s29 + $0x11a8] sm:$0xff]  ;;  %v840_v30 = vld [vmem:[%s5206_s29 + $0x11f8] sm:$0xff]  ;;  %v863_v52 = vld [vmem:[%s5206_s29 + $0x12b0] sm:$0xff] }
 0x18e   : > { %3698 = vmatpush1.bf16.msra.mxu1 %v1463_v39  ;;  %3247 = vmatprep.subr.bf16.mxu0 %v1470_v54  ;;  %v797_v39 = vld [vmem:[%s5206_s29 + $0x10a0] sm:$0xff] }
 0x18f   : > { %3699 = vmatprep.subr.bf16.mxu1 %v1472_v26  ;;  %v805_v54 = vld [vmem:[%s5206_s29 + $0x10e0] sm:$0xff]  ;;  %v822_v26 = vld [vmem:[%s5206_s29 + $0x1168] sm:$0xff] }
 0x190   : > { %3209 = vmatmul.mubr.bf16.gmra.mrb[60].mxu0 %v5555_v49  ;;  %v1493_v15 = vpack.c.bf16 %v805_v54, %v797_v39  ;;  %v1502_v27 = vpack.c.bf16 %v822_v26, %v814_v55  ;;  %v862_v39 = vld [vmem:[%s5206_s29 + $0x12a8] sm:$0xff]  ;;  %v864_v54 = vld [vmem:[%s5206_s29 + $0x12b8] sm:$0xff]  ;;  %v861_v26 = vld [vmem:[%s5206_s29 + $0x12a0] sm:$0xff] }
 0x191   : > { %3248 = vmatpush1.bf16.msra.mxu0 %v1469_v16  ;;  %3661 = vmatmul.mubr.bf16.gmra.mrb[60].mxu1 %v5555_v49  ;;  %v806_v49 = vld [vmem:[%s5206_s29 + $0x10e8] sm:$0xff]  ;;  %v813_v16 = vld [vmem:[%s5206_s29 + $0x1120] sm:$0xff] }
 0x192   : > { %3700 = vmatpush1.bf16.msra.mxu1 %v1471_v17  ;;  %3249 = vmatprep.subr.bf16.mxu0 %v1478_v6  ;;  %v1494_v31 = vpack.c.bf16 %v806_v49, %v798_v59  ;;  %v821_v17 = vld [vmem:[%s5206_s29 + $0x1160] sm:$0xff]  ;;  %v815_v6 = vld [vmem:[%s5206_s29 + $0x1130] sm:$0xff]  ;;  %v1518_v49 = vpack.c.bf16 %v854_v19, %v846_v0 }
 0x193   : > { %3701 = vmatprep.subr.bf16.mxu1 %v1480_v8  ;;  %3251 = vmatprep.mubr.bf16.mxu0 %v5568_v1  ;;  %v832_v8 = vld [vmem:[%s5206_s29 + $0x11b8] sm:$0xff]  ;;  %v1501_v3 = vpack.c.bf16 %v821_v17, %v813_v16  ;;  %v1503_v4 = vpack.c.bf16 %v823_v58, %v815_v6  ;;  %v1525_v6 = vpack.c.bf16 %v869_v41, %v861_v26  ;;  %v901_v0 = vld [vmem:[%s5206_s29 + $0x13e0] sm:$0xff]  ;;  %v895_v19 = vld [vmem:[%s5206_s29 + $0x13b0] sm:$0xff] }
 0x194   : > { %3703 = vmatprep.mubr.bf16.mxu1 %v5568_v1  ;;  %v807_v1 = vld [vmem:[%s5206_s29 + $0x10f0] sm:$0xff]  ;;  %v880_v16 = vld [vmem:[%s5206_s29 + $0x1338] sm:$0xff] }
 0x195   : > { %3250 = vmatpush1.bf16.msra.mxu0 %v1477_v33  ;;  %v1495_v42 = vpack.c.bf16 %v807_v1, %v799_v29  ;;  %v837_v33 = vld [vmem:[%s5206_s29 + $0x11e0] sm:$0xff]  ;;  %v872_v29 = vld [vmem:[%s5206_s29 + $0x12f8] sm:$0xff] }
 0x196   : > { %3702 = vmatpush1.bf16.msra.mxu1 %v1479_v28  ;;  %3332 = vmatprep.subr.bf16.mxu0 %v1486_v48  ;;  %v831_v28 = vld [vmem:[%s5206_s29 + $0x11b0] sm:$0xff]  ;;  %v1512_v48 = vpack.c.bf16 %v840_v30, %v832_v8  ;;  %v1509_v37 = vpack.c.bf16 %v837_v33, %v829_v7  ;;  %v888_v17 = vld [vmem:[%s5206_s29 + $0x1378] sm:$0xff] }
 0x197   : > { %3784 = vmatprep.subr.bf16.mxu1 %v1488_v62  ;;  %v856_v62 = vld [vmem:[%s5206_s29 + $0x1278] sm:$0xff]  ;;  %v879_v8 = vld [vmem:[%s5206_s29 + $0x1330] sm:$0xff]  ;;  %v1536_v30 = vpack.c.bf16 %v888_v17, %v880_v16  ;;  %v950_v16 = vld [vmem:[%s5206_s29 + $0x1568] sm:$0xff] }
 0x198   : > { %3252 = vmatmul.mubr.bf16.vlgmr.msra.gmra.mrb[32].mxu0 %v5584_v22  ;;  %v904_v7 = vld [vmem:[%s5206_s29 + $0x13f8] sm:$0xff] }
 0x199   : > { %3333 = vmatpush1.bf16.msra.mxu0 %v1485_v34  ;;  %3704 = vmatmul.mubr.bf16.vlgmr.msra.gmra.mrb[32].mxu1 %v5584_v22  ;;  %v838_v22 = vld [vmem:[%s5206_s29 + $0x11e8] sm:$0xff]  ;;  %v847_v34 = vld [vmem:[%s5206_s29 + $0x1230] sm:$0xff]  ;;  %v944_v17 = vld [vmem:[%s5206_s29 + $0x1538] sm:$0xff] }
 0x19a   : > { %3785 = vmatpush1.bf16.msra.mxu1 %v1487_v2  ;;  %3334 = vmatprep.subr.bf16.mxu0 %v1494_v31  ;;  %v1510_v44 = vpack.c.bf16 %v838_v22, %v830_v50  ;;  %v1520_v2 = vpack.c.bf16 %v856_v62, %v848_v20  ;;  %v855_v31 = vld [vmem:[%s5206_s29 + $0x1270] sm:$0xff]  ;;  %v877_v50 = vld [vmem:[%s5206_s29 + $0x1320] sm:$0xff]  ;;  %v910_v62 = vld [vmem:[%s5206_s29 + $0x1428] sm:$0xff] }
 0x19b   : > { %3786 = vmatprep.subr.bf16.mxu1 %v1496_v45  ;;  %3261 = vmatprep.mubr.bf16.mxu0 %v5598_v38  ;;  %v1517_v45 = vpack.c.bf16 %v853_v47, %v845_v13  ;;  %v1519_v1 = vpack.c.bf16 %v855_v31, %v847_v34  ;;  %v885_v22 = vld [vmem:[%s5206_s29 + $0x1360] sm:$0xff] }
 0x19c   : > { %3713 = vmatprep.mubr.bf16.mxu1 %v5598_v38  ;;  %v839_v38 = vld [vmem:[%s5206_s29 + $0x11f0] sm:$0xff]  ;;  %v1533_v33 = vpack.c.bf16 %v885_v22, %v877_v50  ;;  %v917_v31 = vld [vmem:[%s5206_s29 + $0x1460] sm:$0xff] }
 0x19d   : > { %3335 = vmatpush1.bf16.msra.mxu0 %v1493_v15  ;;  %v1511_v59 = vpack.c.bf16 %v839_v38, %v831_v28  ;;  %v1528_v15 = vpack.c.bf16 %v872_v29, %v864_v54  ;;  %v893_v38 = vld [vmem:[%s5206_s29 + $0x13a0] sm:$0xff]  ;;  %v919_v54 = vld [vmem:[%s5206_s29 + $0x1470] sm:$0xff]  ;;  %v926_v29 = vld [vmem:[%s5206_s29 + $0x14a8] sm:$0xff] }
 0x19e   : > { %3787 = vmatpush1.bf16.msra.mxu1 %v1495_v42  ;;  %3336 = vmatprep.subr.bf16.mxu0 %v1502_v27  ;;  %v878_v42 = vld [vmem:[%s5206_s29 + $0x1328] sm:$0xff]  ;;  %v1541_v13 = vpack.c.bf16 %v901_v0, %v893_v38  ;;  %v941_v22 = vld [vmem:[%s5206_s29 + $0x1520] sm:$0xff] }
 0x19f   : > { %3788 = vmatprep.subr.bf16.mxu1 %v1504_v21  ;;  %v886_v27 = vld [vmem:[%s5206_s29 + $0x1368] sm:$0xff]  ;;  %v957_v38 = vld [vmem:[%s5206_s29 + $0x15a0] sm:$0xff] }
 0x1a0   : > { %3262 = vmatmul.mubr.bf16.gmra.mrb[36].mxu0 %v5615_v60  ;;  %v1534_v58 = vpack.c.bf16 %v886_v27, %v878_v42  ;;  %v942_v27 = vld [vmem:[%s5206_s29 + $0x1528] sm:$0xff]  ;;  %v965_v0 = vld [vmem:[%s5206_s29 + $0x15e0] sm:$0xff] }
 0x1a1   : > { %3337 = vmatpush1.bf16.msra.mxu0 %v1501_v3  ;;  %3714 = vmatmul.mubr.bf16.gmra.mrb[36].mxu1 %v5615_v60  ;;  %v870_v60 = vld [vmem:[%s5206_s29 + $0x12e8] sm:$0xff]  ;;  %v887_v3 = vld [vmem:[%s5206_s29 + $0x1370] sm:$0xff]  ;;  %v1566_v50 = vpack.c.bf16 %v950_v16, %v942_v27  ;;  %v1008_v27 = vld [vmem:[%s5206_s29 + $0x1738] sm:$0xff] }
 0x1a2   : > { %3789 = vmatpush1.bf16.msra.mxu1 %v1503_v4  ;;  %3338 = vmatprep.subr.bf16.mxu0 %v1510_v44  ;;  %v1526_v55 = vpack.c.bf16 %v870_v60, %v862_v39  ;;  %v894_v4 = vld [vmem:[%s5206_s29 + $0x13a8] sm:$0xff]  ;;  %v896_v44 = vld [vmem:[%s5206_s29 + $0x13b8] sm:$0xff]  ;;  %v1535_v28 = vpack.c.bf16 %v887_v3, %v879_v8  ;;  %v911_v39 = vld [vmem:[%s5206_s29 + $0x1430] sm:$0xff] }
 0x1a3   : > { %3790 = vmatprep.subr.bf16.mxu1 %v1512_v48  ;;  %3271 = vmatprep.mubr.bf16.mxu0 %v5628_v12  ;;  %v1544_v20 = vpack.c.bf16 %v904_v7, %v896_v44  ;;  %v1551_v26 = vpack.c.bf16 %v919_v54, %v911_v39  ;;  %v949_v8 = vld [vmem:[%s5206_s29 + $0x1560] sm:$0xff]  ;;  %v960_v44 = vld [vmem:[%s5206_s29 + $0x15b8] sm:$0xff]  ;;  %v990_v54 = vld [vmem:[%s5206_s29 + $0x16a8] sm:$0xff] }
 0x1a4   : > { %3723 = vmatprep.mubr.bf16.mxu1 %v5628_v12  ;;  %v871_v12 = vld [vmem:[%s5206_s29 + $0x12f0] sm:$0xff]  ;;  %v968_v7 = vld [vmem:[%s5206_s29 + $0x15f8] sm:$0xff]  ;;  %v4203_v39 = vld [vmem:[%s7116_s4] sm:$0xff] }
 0x1a5   : > { %3339 = vmatpush1.bf16.msra.mxu0 %v1509_v37  ;;  %v1527_v21 = vpack.c.bf16 %v871_v12, %v863_v52  ;;  %v918_v37 = vld [vmem:[%s5206_s29 + $0x1468] sm:$0xff]  ;;  %v925_v52 = vld [vmem:[%s5206_s29 + $0x14a0] sm:$0xff]  ;;  %v927_v12 = vld [vmem:[%s5206_s29 + $0x14b0] sm:$0xff]  ;;  %4206 = vperm.xlu0 %5113, %v4203_v39  }
 0x1a6   : > { %3791 = vmatpush1.bf16.msra.mxu1 %v1511_v59  ;;  %3340 = vmatprep.subr.bf16.mxu0 %v1518_v49  ;;  %v912_v59 = vld [vmem:[%s5206_s29 + $0x1438] sm:$0xff]  ;;  %v1550_v34 = vpack.c.bf16 %v918_v37, %v910_v62  ;;  %v982_v62 = vld [vmem:[%s5206_s29 + $0x1668] sm:$0xff] }
 0x1a7   : > { %3792 = vmatprep.subr.bf16.mxu1 %v1520_v2  ;;  %v920_v49 = vld [vmem:[%s5206_s29 + $0x1478] sm:$0xff]  ;;  %v909_v2 = vld [vmem:[%s5206_s29 + $0x1420] sm:$0xff] }
 0x1a8   : > { %3272 = vmatmul.mubr.bf16.gmra.mrb[40].mxu0 %v5645_v36  ;;  %v1552_v60 = vpack.c.bf16 %v920_v49, %v912_v59  ;;  %v976_v37 = vld [vmem:[%s5206_s29 + $0x1638] sm:$0xff]  ;;  %v1573_v49 = vpack.c.bf16 %v965_v0, %v957_v38  ;;  %v1038_v0 = vld [vmem:[%s5206_s29 + $0x1828] sm:$0xff] }
 0x1a9   : > { %3341 = vmatpush1.bf16.msra.mxu0 %v1517_v45  ;;  %3724 = vmatmul.mubr.bf16.gmra.mrb[40].mxu1 %v5645_v36  ;;  %v902_v36 = vld [vmem:[%s5206_s29 + $0x13e8] sm:$0xff]  ;;  %v928_v45 = vld [vmem:[%s5206_s29 + $0x14b8] sm:$0xff] }
 0x1aa   : > { %3793 = vmatpush1.bf16.msra.mxu1 %v1519_v1  ;;  %3342 = vmatprep.subr.bf16.mxu0 %v1526_v55  ;;  %v1542_v48 = vpack.c.bf16 %v902_v36, %v894_v4  ;;  %v936_v1 = vld [vmem:[%s5206_s29 + $0x14f8] sm:$0xff]  ;;  %v1549_v55 = vpack.c.bf16 %v917_v31, %v909_v2  ;;  %v951_v4 = vld [vmem:[%s5206_s29 + $0x1570] sm:$0xff]  ;;  %v958_v36 = vld [vmem:[%s5206_s29 + $0x15a8] sm:$0xff] }
 0x1ab   : > { %3794 = vmatprep.subr.bf16.mxu1 %v1528_v15  ;;  %3281 = vmatprep.mubr.bf16.mxu0 %v5658_v53  ;;  %v933_v15 = vld [vmem:[%s5206_s29 + $0x14e0] sm:$0xff]  ;;  %v1560_v42 = vpack.c.bf16 %v936_v1, %v928_v45  ;;  %v984_v59 = vld [vmem:[%s5206_s29 + $0x1678] sm:$0xff]  ;;  %v975_v31 = vld [vmem:[%s5206_s29 + $0x1630] sm:$0xff] }
 0x1ac   : > { %3733 = vmatprep.mubr.bf16.mxu1 %v5658_v53  ;;  %v903_v53 = vld [vmem:[%s5206_s29 + $0x13f0] sm:$0xff]  ;;  %v981_v2 = vld [vmem:[%s5206_s29 + $0x1660] sm:$0xff]  ;;  %v1000_v45 = vld [vmem:[%s5206_s29 + $0x16f8] sm:$0xff] }
 0x1ad   : > { %3343 = vmatpush1.bf16.msra.mxu0 %v1525_v6  ;;  %v1543_v47 = vpack.c.bf16 %v903_v53, %v895_v19  ;;  %v952_v6 = vld [vmem:[%s5206_s29 + $0x1578] sm:$0xff]  ;;  %v959_v19 = vld [vmem:[%s5206_s29 + $0x15b0] sm:$0xff]  ;;  %v974_v53 = vld [vmem:[%s5206_s29 + $0x1628] sm:$0xff] }
 0x1ae   : > { %3795 = vmatpush1.bf16.msra.mxu1 %v1527_v21  ;;  %3344 = vmatprep.subr.bf16.mxu0 %v1534_v58  ;;  %v1557_v21 = vpack.c.bf16 %v933_v15, %v925_v52  ;;  %v1568_v3 = vpack.c.bf16 %v952_v6, %v944_v17  ;;  %v997_v52 = vld [vmem:[%s5206_s29 + $0x16e0] sm:$0xff]  ;;  %v991_v15 = vld [vmem:[%s5206_s29 + $0x16b0] sm:$0xff]  ;;  %v1016_v16 = vld [vmem:[%s5206_s29 + $0x1778] sm:$0xff] }
 0x1af   : > { %3796 = vmatprep.subr.bf16.mxu1 %v1536_v30  ;;  %v943_v30 = vld [vmem:[%s5206_s29 + $0x1530] sm:$0xff]  ;;  %v1064_v39 = vld [vmem:[%s5206_s29 + $0x18f8] sm:$0xff] }
 0x1b0   : > { %3282 = vmatmul.mubr.bf16.gmra.mrb[44].mxu0 %v5675_v14 }
 0x1b1   : > { %3345 = vmatpush1.bf16.msra.mxu0 %v1533_v33  ;;  %3734 = vmatmul.mubr.bf16.gmra.mrb[44].mxu1 %v5675_v14  ;;  %v934_v14 = vld [vmem:[%s5206_s29 + $0x14e8] sm:$0xff]  ;;  %v1565_v33 = vpack.c.bf16 %v949_v8, %v941_v22  ;;  %v1007_v22 = vld [vmem:[%s5206_s29 + $0x1730] sm:$0xff]  ;;  %v1600_v8 = vpack.c.bf16 %v1016_v16, %v1008_v27 }
 0x1b2   : > { %3797 = vmatpush1.bf16.msra.mxu1 %v1535_v28  ;;  %3346 = vmatprep.subr.bf16.mxu0 %v1542_v48  ;;  %v1558_v41 = vpack.c.bf16 %v934_v14, %v926_v29  ;;  %v1567_v28 = vpack.c.bf16 %v951_v4, %v943_v30  ;;  %v998_v29 = vld [vmem:[%s5206_s29 + $0x16e8] sm:$0xff]  ;;  %v992_v14 = vld [vmem:[%s5206_s29 + $0x16b8] sm:$0xff]  ;;  %v1015_v30 = vld [vmem:[%s5206_s29 + $0x1770] sm:$0xff] }
 0x1b3   : > { %3798 = vmatprep.subr.bf16.mxu1 %v1544_v20  ;;  %3291 = vmatprep.mubr.bf16.mxu0 %v5688_v32  ;;  %v1576_v20 = vpack.c.bf16 %v968_v7, %v960_v44  ;;  %v1024_v4 = vld [vmem:[%s5206_s29 + $0x17b8] sm:$0xff]  ;;  %v1599_v44 = vpack.c.bf16 %v1015_v30, %v1007_v22  ;;  %v1071_v27 = vld [vmem:[%s5206_s29 + $0x1930] sm:$0xff]  ;;  %v1085_v30 = vld [vmem:[%s5206_s29 + $0x19a0] sm:$0xff] }
 0x1b4   : > { %3743 = vmatprep.mubr.bf16.mxu1 %v5688_v32  ;;  %v935_v32 = vld [vmem:[%s5206_s29 + $0x14f0] sm:$0xff] }
 0x1b5   : > { %3347 = vmatpush1.bf16.msra.mxu0 %v1541_v13  ;;  %v1559_v58 = vpack.c.bf16 %v935_v32, %v927_v12  ;;  %v973_v13 = vld [vmem:[%s5206_s29 + $0x1620] sm:$0xff]  ;;  %v999_v12 = vld [vmem:[%s5206_s29 + $0x16f0] sm:$0xff]  ;;  %v1014_v32 = vld [vmem:[%s5206_s29 + $0x1768] sm:$0xff] }
 0x1b6   : > { %3799 = vmatpush1.bf16.msra.mxu1 %v1543_v47  ;;  %3348 = vmatprep.subr.bf16.mxu0 %v1550_v34  ;;  %v1582_v34 = vpack.c.bf16 %v982_v62, %v974_v53  ;;  %v1581_v1 = vpack.c.bf16 %v981_v2, %v973_v13  ;;  %v1591_v6 = vpack.c.bf16 %v999_v12, %v991_v15  ;;  %v1039_v13 = vld [vmem:[%s5206_s29 + $0x1830] sm:$0xff]  ;;  %v1054_v2 = vld [vmem:[%s5206_s29 + $0x18a8] sm:$0xff] }
 0x1b7   : > { %3800 = vmatprep.subr.bf16.mxu1 %v1552_v60  ;;  %v983_v60 = vld [vmem:[%s5206_s29 + $0x1670] sm:$0xff] }
 0x1b8   : > { %3292 = vmatmul.mubr.bf16.gmra.mrb[48].mxu0 %v5705_v56 }
 0x1b9   : > { %3349 = vmatpush1.bf16.msra.mxu0 %v1549_v55  ;;  %3744 = vmatmul.mubr.bf16.gmra.mrb[48].mxu1 %v5705_v56  ;;  %v966_v56 = vld [vmem:[%s5206_s29 + $0x15e8] sm:$0xff]  ;;  %v1583_v55 = vpack.c.bf16 %v983_v60, %v975_v31  ;;  %v1056_v31 = vld [vmem:[%s5206_s29 + $0x18b8] sm:$0xff] }
 0x1ba   : > { %3801 = vmatpush1.bf16.msra.mxu1 %v1551_v26  ;;  %3350 = vmatprep.subr.bf16.mxu0 %v1558_v41  ;;  %v1574_v48 = vpack.c.bf16 %v966_v56, %v958_v36  ;;  %v1590_v26 = vpack.c.bf16 %v998_v29, %v990_v54  ;;  %v989_v41 = vld [vmem:[%s5206_s29 + $0x16a0] sm:$0xff]  ;;  %v1032_v36 = vld [vmem:[%s5206_s29 + $0x17f8] sm:$0xff] }
 0x1bb   : > { %3802 = vmatprep.subr.bf16.mxu1 %v1560_v42  ;;  %3301 = vmatprep.mubr.bf16.mxu0 %v5718_v11  ;;  %v1006_v42 = vld [vmem:[%s5206_s29 + $0x1728] sm:$0xff]  ;;  %v1589_v17 = vpack.c.bf16 %v997_v52, %v989_v41  ;;  %v1608_v38 = vpack.c.bf16 %v1032_v36, %v1024_v4  ;;  %v1053_v29 = vld [vmem:[%s5206_s29 + $0x18a0] sm:$0xff]  ;;  %v1072_v41 = vld [vmem:[%s5206_s29 + $0x1938] sm:$0xff] }
 0x1bc   : > { %3753 = vmatprep.mubr.bf16.mxu1 %v5718_v11  ;;  %v967_v11 = vld [vmem:[%s5206_s29 + $0x15f0] sm:$0xff]  ;;  %v1080_v52 = vld [vmem:[%s5206_s29 + $0x1978] sm:$0xff]  ;;  %v1102_v36 = vld [vmem:[%s5206_s29 + $0x1a28] sm:$0xff] }
 0x1bd   : > { %3351 = vmatpush1.bf16.msra.mxu0 %v1557_v21  ;;  %v1575_v47 = vpack.c.bf16 %v967_v11, %v959_v19  ;;  %v1598_v21 = vpack.c.bf16 %v1014_v32, %v1006_v42  ;;  %v1046_v19 = vld [vmem:[%s5206_s29 + $0x1868] sm:$0xff]  ;;  %v1048_v11 = vld [vmem:[%s5206_s29 + $0x1878] sm:$0xff]  ;;  %v1069_v42 = vld [vmem:[%s5206_s29 + $0x1920] sm:$0xff]  ;;  %v1632_v16 = vpack.c.bf16 %v1080_v52, %v1072_v41 }
 0x1be   : > { %3803 = vmatpush1.bf16.msra.mxu1 %v1559_v58  ;;  %3352 = vmatprep.subr.bf16.mxu0 %v1566_v50  ;;  %v1005_v58 = vld [vmem:[%s5206_s29 + $0x1720] sm:$0xff]  ;;  %v1143_v41 = vld [vmem:[%s5206_s29 + $0x1b70] sm:$0xff] }
 0x1bf   : > { %3804 = vmatprep.subr.bf16.mxu1 %v1568_v3  ;;  %v1013_v50 = vld [vmem:[%s5206_s29 + $0x1760] sm:$0xff]  ;;  %v1022_v3 = vld [vmem:[%s5206_s29 + $0x17a8] sm:$0xff] }
 0x1c0   : > { %3302 = vmatmul.mubr.bf16.gmra.mrb[52].mxu0 %v5735_v40  ;;  %v1597_v56 = vpack.c.bf16 %v1013_v50, %v1005_v58  ;;  %v1077_v32 = vld [vmem:[%s5206_s29 + $0x1960] sm:$0xff]  ;;  %v1096_v58 = vld [vmem:[%s5206_s29 + $0x19f8] sm:$0xff] }
 0x1c1   : > { %3353 = vmatpush1.bf16.msra.mxu0 %v1565_v33  ;;  %3754 = vmatmul.mubr.bf16.gmra.mrb[52].mxu1 %v5735_v40  ;;  %v1584_v40 = vpack.c.bf16 %v984_v59, %v976_v37  ;;  %v1021_v33 = vld [vmem:[%s5206_s29 + $0x17a0] sm:$0xff]  ;;  %v1614_v37 = vpack.c.bf16 %v1046_v19, %v1038_v0  ;;  %v1629_v50 = vpack.c.bf16 %v1077_v32, %v1069_v42  ;;  %v1103_v0 = vld [vmem:[%s5206_s29 + $0x1a30] sm:$0xff]  ;;  %v1150_v42 = vld [vmem:[%s5206_s29 + $0x1ba8] sm:$0xff] }
 0x1c2   : > { %3805 = vmatpush1.bf16.msra.mxu1 %v1567_v28  ;;  %3354 = vmatprep.subr.bf16.mxu0 %v1574_v48  ;;  %v1029_v28 = vld [vmem:[%s5206_s29 + $0x17e0] sm:$0xff]  ;;  %v1023_v48 = vld [vmem:[%s5206_s29 + $0x17b0] sm:$0xff]  ;;  %v1158_v32 = vld [vmem:[%s5206_s29 + $0x1be8] sm:$0xff] }
 0x1c3   : > { %3806 = vmatprep.subr.bf16.mxu1 %v1576_v20  ;;  %3311 = vmatprep.mubr.bf16.mxu0 %v5748_v61  ;;  %v1040_v20 = vld [vmem:[%s5206_s29 + $0x1838] sm:$0xff]  ;;  %v1605_v53 = vpack.c.bf16 %v1029_v28, %v1021_v33  ;;  %v1037_v59 = vld [vmem:[%s5206_s29 + $0x1820] sm:$0xff] }
 0x1c4   : > { %3763 = vmatprep.mubr.bf16.mxu1 %v5748_v61  ;;  %v1592_v61 = vpack.c.bf16 %v1000_v45, %v992_v14  ;;  %v1061_v14 = vld [vmem:[%s5206_s29 + $0x18e0] sm:$0xff]  ;;  %v1055_v45 = vld [vmem:[%s5206_s29 + $0x18b0] sm:$0xff] }
 0x1c5   : > { %3355 = vmatpush1.bf16.msra.mxu0 %v1573_v49  ;;  %v1045_v49 = vld [vmem:[%s5206_s29 + $0x1860] sm:$0xff]  ;;  %v1621_v15 = vpack.c.bf16 %v1061_v14, %v1053_v29 }
 0x1c6   : > { %3807 = vmatpush1.bf16.msra.mxu1 %v1575_v47  ;;  %3356 = vmatprep.subr.bf16.mxu0 %v1582_v34  ;;  %v1616_v47 = vpack.c.bf16 %v1048_v11, %v1040_v20  ;;  %v1047_v34 = vld [vmem:[%s5206_s29 + $0x1870] sm:$0xff]  ;;  %v1118_v11 = vld [vmem:[%s5206_s29 + $0x1aa8] sm:$0xff]  ;;  %v1133_v14 = vld [vmem:[%s5206_s29 + $0x1b20] sm:$0xff] }
 0x1c7   : > { %3808 = vmatprep.subr.bf16.mxu1 %v1584_v40  ;;  %v1613_v40 = vpack.c.bf16 %v1045_v49, %v1037_v59  ;;  %v1615_v60 = vpack.c.bf16 %v1047_v34, %v1039_v13  ;;  %v1111_v20 = vld [vmem:[%s5206_s29 + $0x1a70] sm:$0xff]  ;;  %v1125_v34 = vld [vmem:[%s5206_s29 + $0x1ae0] sm:$0xff] }
 0x1c8   : > { %3312 = vmatmul.mubr.bf16.gmra.mrb[56].mxu0 %v5765_v24  ;;  %v1647_v49 = vpack.c.bf16 %v1111_v20, %v1103_v0  ;;  %v1174_v20 = vld [vmem:[%s5206_s29 + $0x1c68] sm:$0xff] }
 0x1c9   : > { %3357 = vmatpush1.bf16.msra.mxu0 %v1581_v1  ;;  %3764 = vmatmul.mubr.bf16.gmra.mrb[56].mxu1 %v5765_v24  ;;  %v1030_v24 = vld [vmem:[%s5206_s29 + $0x17e8] sm:$0xff]  ;;  %v1624_v1 = vpack.c.bf16 %v1064_v39, %v1056_v31 }
 0x1ca   : > { %3809 = vmatpush1.bf16.msra.mxu1 %v1583_v55  ;;  %3358 = vmatprep.subr.bf16.mxu0 %v1590_v26  ;;  %v1606_v7 = vpack.c.bf16 %v1030_v24, %v1022_v3  ;;  %v1070_v55 = vld [vmem:[%s5206_s29 + $0x1928] sm:$0xff]  ;;  %v1093_v3 = vld [vmem:[%s5206_s29 + $0x19e0] sm:$0xff]  ;;  %v1087_v24 = vld [vmem:[%s5206_s29 + $0x19b0] sm:$0xff] }
 0x1cb   : > { %3810 = vmatprep.subr.bf16.mxu1 %v1592_v61  ;;  %3321 = vmatprep.mubr.bf16.mxu0 %v5778_v46  ;;  %v1078_v26 = vld [vmem:[%s5206_s29 + $0x1968] sm:$0xff]  ;;  %v1637_v33 = vpack.c.bf16 %v1093_v3, %v1085_v30 }
 0x1cc   : > { %3773 = vmatprep.mubr.bf16.mxu1 %v5778_v46  ;;  %v1031_v46 = vld [vmem:[%s5206_s29 + $0x17f0] sm:$0xff]  ;;  %v1630_v12 = vpack.c.bf16 %v1078_v26, %v1070_v55  ;;  %v1134_v31 = vld [vmem:[%s5206_s29 + $0x1b28] sm:$0xff]  ;;  %v1141_v55 = vld [vmem:[%s5206_s29 + $0x1b60] sm:$0xff] }
 0x1cd   : > { %3359 = vmatpush1.bf16.msra.mxu0 %v1589_v17  ;;  %v1607_v62 = vpack.c.bf16 %v1031_v46, %v1023_v48  ;;  %v1079_v17 = vld [vmem:[%s5206_s29 + $0x1970] sm:$0xff]  ;;  %v1109_v46 = vld [vmem:[%s5206_s29 + $0x1a60] sm:$0xff]  ;;  %v1142_v39 = vld [vmem:[%s5206_s29 + $0x1b68] sm:$0xff]  ;;  %v1661_v3 = vpack.c.bf16 %v1141_v55, %v1133_v14 }
 0x1ce   : > { %3811 = vmatpush1.bf16.msra.mxu1 %v1591_v6  ;;  %3360 = vmatprep.subr.bf16.mxu0 %v1598_v21  ;;  %v1086_v6 = vld [vmem:[%s5206_s29 + $0x19a8] sm:$0xff]  ;;  %v1088_v21 = vld [vmem:[%s5206_s29 + $0x19b8] sm:$0xff]  ;;  %v1631_v22 = vpack.c.bf16 %v1079_v17, %v1071_v27  ;;  %v1135_v26 = vld [vmem:[%s5206_s29 + $0x1b30] sm:$0xff] }
 0x1cf   : > { %3812 = vmatprep.subr.bf16.mxu1 %v1600_v8  ;;  %v1640_v4 = vpack.c.bf16 %v1096_v58, %v1088_v21  ;;  %v1152_v27 = vld [vmem:[%s5206_s29 + $0x1bb8] sm:$0xff]  ;;  %v6723_v21 = vld [vmem:[%s5206_s29 + $0x1ba0] sm:$0xff]  ;;  %v1175_v14 = vld [vmem:[%s5206_s29 + $0x1c70] sm:$0xff] }
 0x1d0   : > { %3322 = vmatmul.mubr.bf16.gmra.mrb[60].mxu0 %v5795_v10  ;;  %v6726_v58 = vld [vmem:[%s5206_s29 + $0x1be0] sm:$0xff] }
 0x1d1   : > { %3361 = vmatpush1.bf16.msra.mxu0 %v1597_v56  ;;  %3774 = vmatmul.mubr.bf16.gmra.mrb[60].mxu1 %v5795_v10  ;;  %v1062_v10 = vld [vmem:[%s5206_s29 + $0x18e8] sm:$0xff]  ;;  %v1669_v0 = vpack.c.bf16 %v6726_v58, %v6723_v21  ;;  %v6778_v21 = vld [vmem:[%s5206_s29 + $0x1ce0] sm:$0xff] }
 0x1d2   : > { %3813 = vmatpush1.bf16.msra.mxu1 %v1599_v44  ;;  %3362 = vmatprep.subr.bf16.mxu0 %v1606_v7  ;;  %v1622_v54 = vpack.c.bf16 %v1062_v10, %v1054_v2  ;;  %v1110_v56 = vld [vmem:[%s5206_s29 + $0x1a68] sm:$0xff]  ;;  %v1104_v44 = vld [vmem:[%s5206_s29 + $0x1a38] sm:$0xff]  ;;  %v1119_v2 = vld [vmem:[%s5206_s29 + $0x1ab0] sm:$0xff] }
 0x1d3   : > { %3814 = vmatprep.subr.bf16.mxu1 %v1608_v38  ;;  %3364 = vmatprep.mubr.bf16.mxu0 %v5808_v35  ;;  %v1112_v7 = vld [vmem:[%s5206_s29 + $0x1a78] sm:$0xff]  ;;  %v1646_v48 = vpack.c.bf16 %v1110_v56, %v1102_v36  ;;  %v1101_v38 = vld [vmem:[%s5206_s29 + $0x1a20] sm:$0xff]  ;;  %v1127_v10 = vld [vmem:[%s5206_s29 + $0x1af0] sm:$0xff] }
 0x1d4   : > { %3816 = vmatprep.mubr.bf16.mxu1 %v5808_v35  ;;  %v1063_v35 = vld [vmem:[%s5206_s29 + $0x18f0] sm:$0xff]  ;;  %v1648_v19 = vpack.c.bf16 %v1112_v7, %v1104_v44  ;;  %v1645_v59 = vpack.c.bf16 %v1109_v46, %v1101_v38 }
 0x1d5   : > { %3363 = vmatpush1.bf16.msra.mxu0 %v1605_v53  ;;  %v1623_v61 = vpack.c.bf16 %v1063_v35, %v1055_v45  ;;  %v6693_v53 = vpop.permute.xlu0 %1787  ;;  %v1655_v45 = vpack.c.bf16 %v1127_v10, %v1119_v2  ;;  %v1662_v35 = vpack.c.bf16 %v1142_v39, %v1134_v31  ;;  %v6752_v10 = vld [vmem:[%s5206_s29 + $0x1c20] sm:$0xff] }
 0x1d6   : > { %3815 = vmatpush1.bf16.msra.mxu1 %v1607_v62  ;;  %3445 = vmatprep.subr.bf16.mxu0 %v1614_v37  ;;  %v1120_v62 = vld [vmem:[%s5206_s29 + $0x1ab8] sm:$0xff] }
 0x1d7   : > { %3897 = vmatprep.subr.bf16.mxu1 %v1616_v47  ;;  %v1128_v37 = vld [vmem:[%s5206_s29 + $0x1af8] sm:$0xff]  ;;  %v1117_v47 = vld [vmem:[%s5206_s29 + $0x1aa0] sm:$0xff] }
 0x1d8   : > { %3365 = vmatmul.mubr.bf16.vlgmr.msra.gmra.mrb[32].mxu0 %v5824_v5  ;;  %v1653_v29 = vpack.c.bf16 %v1125_v34, %v1117_v47 }
 0x1d9   : > { %3446 = vmatpush1.bf16.msra.mxu0 %v1613_v40  ;;  %3817 = vmatmul.mubr.bf16.vlgmr.msra.gmra.mrb[32].mxu1 %v5824_v5  ;;  %v1094_v5 = vld [vmem:[%s5206_s29 + $0x19e8] sm:$0xff]  ;;  %v7186_v40 = vld [vmem:[#allocation2_spill] sm:$0xff] }
 0x1da   : > { %3898 = vmatpush1.bf16.msra.mxu1 %v1615_v60  ;;  %3447 = vmatprep.subr.bf16.mxu0 %v1622_v54  ;;  %v1638_v8 = vpack.c.bf16 %v1094_v5, %v1086_v6  ;;  %v1136_v60 = vld [vmem:[%s5206_s29 + $0x1b38] sm:$0xff] }
 0x1db   : > { %3899 = vmatprep.subr.bf16.mxu1 %v1624_v1  ;;  %3374 = vmatprep.mubr.bf16.mxu0 %v5837_v25  ;;  %v1144_v54 = vld [vmem:[%s5206_s29 + $0x1b78] sm:$0xff]  ;;  %v6708_v1 = vpop.permute.xlu0 %1792 }
 0x1dc   : > { %3826 = vmatprep.mubr.bf16.mxu1 %v5837_v25  ;;  %v1095_v25 = vld [vmem:[%s5206_s29 + $0x19f0] sm:$0xff]  ;;  %v1160_v5 = vld [vmem:[%s5206_s29 + $0x1bf8] sm:$0xff] }
 0x1dd   : > { %3448 = vmatpush1.bf16.msra.mxu0 %v1621_v15  ;;  %v1639_v28 = vpack.c.bf16 %v1095_v25, %v1087_v24  ;;  %v7187_v15 = vld [vmem:[#allocation3_spill] sm:$0xff]  ;;  %v1663_v24 = vpack.c.bf16 %v1143_v41, %v1135_v26  ;;  %v6734_v25 = vld [vmem:[%s5206_s29 + $0x1bf0] sm:$0xff]  ;;  %v1672_v46 = vpack.c.bf16 %v1160_v5, %v1152_v27  ;;  %v7189_v41 = vld [vmem:[#allocation5_spill] sm:$0xff] }
 0x1de   : > { %3900 = vmatpush1.bf16.msra.mxu1 %v1623_v61  ;;  %3449 = vmatprep.subr.bf16.mxu0 %v1630_v12  ;;  %v1664_v61 = vpack.c.bf16 %v1144_v54, %v1136_v60  ;;  %v6714_v12 = vpop.permute.xlu1 %1797  ;;  %v1173_v54 = vld [vmem:[%s5206_s29 + $0x1c60] sm:$0xff] }
 0x1df   : > { %3901 = vmatprep.subr.bf16.mxu1 %v1632_v16  ;;  %v6775_v5 = vld [vmem:[%s5206_s29 + $0x1ca0] sm:$0xff] }
 0x1e0   : > { %3375 = vmatmul.mubr.bf16.gmra.mrb[36].mxu0 %v5858_v57 }
 0x1e1   : > { %3450 = vmatpush1.bf16.msra.mxu0 %v1629_v50  ;;  %3827 = vmatmul.mubr.bf16.gmra.mrb[36].mxu1 %v5858_v57  ;;  %v1126_v57 = vld [vmem:[%s5206_s29 + $0x1ae8] sm:$0xff] }
 0x1e2   : > { %3902 = vmatpush1.bf16.msra.mxu1 %v1631_v22  ;;  %3451 = vmatprep.subr.bf16.mxu0 %v1638_v8  ;;  %v1654_v13 = vpack.c.bf16 %v1126_v57, %v1118_v11  ;;  %v6763_v26 = vpop.permute.xlu1 %1802 }
 0x1e3   : > { %3903 = vmatprep.subr.bf16.mxu1 %v1640_v4  ;;  %3384 = vmatprep.mubr.bf16.mxu0 %v5864_v18  ;;  %v6731_v4 = vld [vmem:[%s5206_s29 + $0x1bb0] sm:$0xff] }
 0x1e4   : > { %3836 = vmatprep.mubr.bf16.mxu1 %v5864_v18  ;;  %v1656_v18 = vpack.c.bf16 %v1128_v37, %v1120_v62  ;;  %v7188_v37 = vld [vmem:[#allocation4_spill] sm:$0xff] }
 0x1e5   : > { %3452 = vmatpush1.bf16.msra.mxu0 %v1637_v33  ;;  %v1670_v33 = vpack.c.bf16 %v1158_v32, %v1150_v42  ;;  %v1184_v42 = vld [vmem:[%s5206_s29 + $0x1cb8] sm:$0xff] }
 0x1e6   : > { %3904 = vmatpush1.bf16.msra.mxu1 %v1639_v28  ;;  %3453 = vmatprep.subr.bf16.mxu0 %v1646_v48 }
 0x1e7   : > { %3905 = vmatprep.subr.bf16.mxu1 %v1648_v19  ;;  %v1166_v19 = vld [vmem:[%s5206_s29 + $0x1c28] sm:$0xff] }
 0x1e8   : > { %3385 = vmatmul.mubr.bf16.gmra.mrb[40].mxu0 %v7186_v40  ;;  %v1678_v60 = vpack.c.bf16 %v1174_v20, %v1166_v19  ;;  %v1206_v19 = vld [vmem:[%s5206_s29 + $0x1d68] sm:$0xff] }
 0x1e9   : > { %3454 = vmatpush1.bf16.msra.mxu0 %v1645_v59  ;;  %3837 = vmatmul.mubr.bf16.gmra.mrb[40].mxu1 %v7186_v40  ;;  %v1671_v59 = vpack.c.bf16 %v6734_v25, %v6731_v4  ;;  %v6787_v4 = vld [vmem:[%s5206_s29 + $0x1cf0] sm:$0xff] }
 0x1ea   : > { %3906 = vmatpush1.bf16.msra.mxu1 %v1647_v49  ;;  %3455 = vmatprep.subr.bf16.mxu0 %v1654_v13  ;;  %v1168_v49 = vld [vmem:[%s5206_s29 + $0x1c38] sm:$0xff] }
 0x1eb   : > { %v2575_v52 = vpop.f32.mrb[0].mxu0  ;;  %3907 = vmatprep.subr.bf16.mxu1 %v1656_v18  ;;  %3394 = vmatprep.mubr.bf16.mxu0 %v7187_v15  ;;  %v1176_v13 = vld [vmem:[%s5206_s29 + $0x1c78] sm:$0xff] }
 0x1ec   : > { %v4575_v16 = vadd.f32 %v2575_v52, %v6693_v53  ;;  %v3027_v17 = vpop.f32.mrb[0].mxu1  ;;  %v2577_v6 = vpop.f32.mrb[1].mxu0  ;;  %3846 = vmatprep.mubr.bf16.mxu1 %v7187_v15  ;;  %v1680_v52 = vpack.c.bf16 %v1176_v13, %v1168_v49  ;;  %v1182_v15 = vld [vmem:[%s5206_s29 + $0x1ca8] sm:$0xff]  ;;  %v1208_v49 = vld [vmem:[%s5206_s29 + $0x1d78] sm:$0xff] }
 0x1ed   : > { %v4607_v50 = vadd.f32 %v3027_v17, %v6693_v53  ;;  %v4576_v22 = vadd.f32 %v2577_v6, %v6693_v53  ;;  %v3029_v8 = vpop.f32.mrb[1].mxu1  ;;  %3456 = vmatpush1.bf16.msra.mxu0 %v1653_v29  ;;  %v2579_v30 = vpop.f32.mrb[2].mxu0  ;;  %v1167_v29 = vld [vmem:[%s5206_s29 + $0x1c30] sm:$0xff]  ;;  %v1192_v6 = vld [vmem:[%s5206_s29 + $0x1cf8] sm:$0xff] }
 0x1ee   : > { %v4608_v36 = vadd.f32 %v3029_v8, %v6693_v53  ;;  %3908 = vmatpush1.bf16.msra.mxu1 %v1655_v45  ;;  %v4577_v56 = vadd.f32 %v2579_v30, %v6708_v1  ;;  %v3031_v44 = vpop.f32.mrb[2].mxu1  ;;  %v2581_v7 = vpop.f32.mrb[3].mxu0  ;;  %3457 = vmatprep.subr.bf16.mxu0 %v1662_v35  ;;  %v4010_v11 = vmax.f32 %v4575_v16, 0.0  ;;  %v1677_v30 = vpack.c.bf16 %v1173_v54, %v6752_v10  ;;  %v1197_v10 = vld [vmem:[%s5206_s29 + $0x1d20] sm:$0xff] }
 0x1ef   : > { %v4609_v28 = vadd.f32 %v3031_v44, %v6708_v1  ;;  %v4578_v48 = vadd.f32 %v2581_v7, %v6708_v1  ;;  %v3033_v38 = vpop.f32.mrb[3].mxu1  ;;  %3909 = vmatprep.subr.bf16.mxu1 %v1664_v61  ;;  %v4012_v47 = vmax.f32 %v4607_v50, 0.0  ;;  %v4011_v34 = vmax.f32 %v4576_v22, 0.0  ;;  %v1190_v61 = vld [vmem:[%s5206_s29 + $0x1ce8] sm:$0xff] }
 0x1f0   : > { %v4018_v57 = vmax.f32 %v4577_v56, 0.0  ;;  %v4610_v62 = vadd.f32 %v3033_v38, %v6708_v1  ;;  %3395 = vmatmul.mubr.bf16.gmra.mrb[44].mxu0 %v7188_v37  ;;  %v4013_v31 = vmax.f32 %v4608_v36, 0.0  ;;  %v1686_v7 = vpack.c.bf16 %v1190_v61, %v1182_v15  ;;  %v6816_v61 = vpop.permute.xlu1 %1812 }
 0x1f1   : > { %v4020_v2 = vmax.f32 %v4609_v28, 0.0  ;;  %v4019_v18 = vmax.f32 %v4578_v48, 0.0  ;;  %3458 = vmatpush1.bf16.msra.mxu0 %v1661_v3  ;;  %3847 = vmatmul.mubr.bf16.gmra.mrb[44].mxu1 %v7188_v37  ;;  %v1679_v3 = vpack.c.bf16 %v1175_v14, %v1167_v29  ;;  %v1688_v38 = vpack.c.bf16 %v1192_v6, %v1184_v42  ;;  %v1205_v29 = vld [vmem:[%s5206_s29 + $0x1d60] sm:$0xff]  ;;  %v1199_v14 = vld [vmem:[%s5206_s29 + $0x1d30] sm:$0xff]  ;;  %v7191_v42 = vld [vmem:[#allocation7_spill] sm:$0xff] }
 0x1f2   : > { %v6754_v39 = vpack.c.bf16 %v4018_v57, %v4010_v11  ;;  %v4021_v40 = vmax.f32 %v4610_v62, 0.0  ;;  %3910 = vmatpush1.bf16.msra.mxu1 %v1663_v24  ;;  %3459 = vmatprep.subr.bf16.mxu0 %v1670_v33  ;;  %v6784_v24 = vld [vmem:[%s5206_s29 + $0x1cb0] sm:$0xff]  ;;  %v7190_v62 = vld [vmem:[#allocation6_spill] sm:$0xff] }
 0x1f3   : > { %v6759_v45 = vpack.c.bf16 %v4020_v2, %v4012_v47  ;;  %v6761_v35 = vpack.c.bf16 %v4019_v18, %v4011_v34  ;;  %v2585_v55 = vpop.f32.mrb[4].mxu0  ;;  %3911 = vmatprep.subr.bf16.mxu1 %v1672_v46  ;;  %3404 = vmatprep.mubr.bf16.mxu0 %v7189_v41  ;;  %v1685_v46 = vpack.c.bf16 %v6778_v21, %v6775_v5  ;;  %v6804_v18 = vpop.permute.xlu0 %1807 }
 0x1f4   : > { %v6769_v32 = vpack.c.bf16 %v4021_v40, %v4013_v31  ;;  %v4579_v27 = vadd.f32 %v2585_v55, %v6714_v12  ;;  %v3037_v16 = vpop.f32.mrb[4].mxu1  ;;  %v2587_v17 = vpop.f32.mrb[5].mxu0  ;;  %3856 = vmatprep.mubr.bf16.mxu1 %v7189_v41  ;;  %v1687_v37 = vpack.c.bf16 %v6787_v4, %v6784_v24  ;;  %v1207_v55 = vld [vmem:[%s5206_s29 + $0x1d70] sm:$0xff]  ;;  %v1693_v4 = vpack.c.bf16 %v1205_v29, %v1197_v10 }
 0x1f5   : > { %v4611_v58 = vadd.f32 %v3037_v16, %v6714_v12  ;;  %v4580_v50 = vadd.f32 %v2587_v17, %v6714_v12  ;;  %v3039_v22 = vpop.f32.mrb[5].mxu1  ;;  %3460 = vmatpush1.bf16.msra.mxu0 %v1669_v0  ;;  %v2589_v8 = vpop.f32.mrb[6].mxu0  ;;  %v1198_v0 = vld [vmem:[%s5206_s29 + $0x1d28] sm:$0xff] }
 0x1f6   : > { %v4612_v25 = vadd.f32 %v3039_v22, %v6714_v12  ;;  %3912 = vmatpush1.bf16.msra.mxu1 %v1671_v59  ;;  %v4581_v36 = vadd.f32 %v2589_v8, %v6763_v26  ;;  %v3041_v56 = vpop.f32.mrb[6].mxu1  ;;  %v2591_v44 = vpop.f32.mrb[7].mxu0  ;;  %3461 = vmatprep.subr.bf16.mxu0 %v1678_v60  ;;  %v4026_v20 = vmax.f32 %v4579_v27, 0.0  ;;  %v1200_v59 = vld [vmem:[%s5206_s29 + $0x1d38] sm:$0xff]  ;;  %v1694_v54 = vpack.c.bf16 %v1206_v19, %v1198_v0  ;;  %v1214_v16 = vld [vmem:[%s5206_s29 + $0x1da8] sm:$0xff] }
 0x1f7   : > { %v4613_v33 = vadd.f32 %v3041_v56, %v6763_v26  ;;  %v4582_v28 = vadd.f32 %v2591_v44, %v6763_v26  ;;  %v3043_v48 = vpop.f32.mrb[7].mxu1  ;;  %3913 = vmatprep.subr.bf16.mxu1 %v1680_v52  ;;  %v4028_v13 = vmax.f32 %v4611_v58, 0.0  ;;  %v4027_v47 = vmax.f32 %v4580_v50, 0.0  ;;  %v1222_v17 = vld [vmem:[%s5206_s29 + $0x1de8] sm:$0xff]  ;;  %v1216_v50 = vld [vmem:[%s5206_s29 + $0x1db8] sm:$0xff]  ;;  %v1221_v56 = vld [vmem:[%s5206_s29 + $0x1de0] sm:$0xff] }
 0x1f8   : > { %v4034_v11 = vmax.f32 %v4581_v36, 0.0  ;;  %v4614_v57 = vadd.f32 %v3043_v48, %v6763_v26  ;;  %3405 = vmatmul.mubr.bf16.gmra.mrb[48].mxu0 %v7190_v62  ;;  %v4029_v31 = vmax.f32 %v4612_v25, 0.0  ;;  %v1696_v27 = vpack.c.bf16 %v1208_v49, %v1200_v59  ;;  %v1224_v22 = vld [vmem:[%s5206_s29 + $0x1df8] sm:$0xff]  ;;  %v1213_v36 = vld [vmem:[%s5206_s29 + $0x1da0] sm:$0xff] }
 0x1f9   : > { %v4036_v34 = vmax.f32 %v4613_v33, 0.0  ;;  %v4035_v2 = vmax.f32 %v4582_v28, 0.0  ;;  %3462 = vmatpush1.bf16.msra.mxu0 %v1677_v30  ;;  %3857 = vmatmul.mubr.bf16.gmra.mrb[48].mxu1 %v7190_v62  ;;  %v1695_v25 = vpack.c.bf16 %v1207_v55, %v1199_v14  ;;  %v1702_v48 = vpack.c.bf16 %v1222_v17, %v1214_v16 }
 0x1fa   : > { %v6807_v40 = vpack.c.bf16 %v4034_v11, %v4026_v20  ;;  %v4037_v60 = vmax.f32 %v4614_v57, 0.0  ;;  %3914 = vmatpush1.bf16.msra.mxu1 %v1679_v3  ;;  %3463 = vmatprep.subr.bf16.mxu0 %v1686_v7  ;;  %v1704_v19 = vpack.c.bf16 %v1224_v22, %v1216_v50  ;;  %v1215_v20 = vld [vmem:[%s5206_s29 + $0x1db0] sm:$0xff] }
 0x1fb   : > { %v6812_v41 = vpack.c.bf16 %v4036_v34, %v4028_v13  ;;  %v6814_v52 = vpack.c.bf16 %v4035_v2, %v4027_v47  ;;  %v2595_v15 = vpop.f32.mrb[8].mxu0  ;;  %3915 = vmatprep.subr.bf16.mxu1 %v1688_v38  ;;  %3414 = vmatprep.mubr.bf16.mxu0 %v7191_v42  ;;  %v1223_v11 = vld [vmem:[%s5206_s29 + $0x1df0] sm:$0xff]  ;;  %v6840_v2 = vpop.permute.xlu0 %1817 }
 0x1fc   : > { %v6821_v6 = vpack.c.bf16 %v4037_v60, %v4029_v31  ;;  %v4583_v5 = vadd.f32 %v2595_v15, %v6804_v18  ;;  %v3047_v21 = vpop.f32.mrb[8].mxu1  ;;  %v2597_v58 = vpop.f32.mrb[9].mxu0  ;;  %3866 = vmatprep.mubr.bf16.mxu1 %v7191_v42 }
 0x1fd   : > { %v4615_v8 = vadd.f32 %v3047_v21, %v6804_v18  ;;  %v4584_v30 = vadd.f32 %v2597_v58, %v6804_v18  ;;  %v3049_v3 = vpop.f32.mrb[9].mxu1  ;;  %3464 = vmatpush1.bf16.msra.mxu0 %v1685_v46  ;;  %v2599_v24 = vpop.f32.mrb[10].mxu0 }
 0x1fe   : > { %v4616_v44 = vadd.f32 %v3049_v3, %v6804_v18  ;;  %3916 = vmatpush1.bf16.msra.mxu1 %v1687_v37  ;;  %v4585_v7 = vadd.f32 %v2599_v24, %v6816_v61  ;;  %v3051_v33 = vpop.f32.mrb[10].mxu1  ;;  %v2601_v28 = vpop.f32.mrb[11].mxu0  ;;  %3465 = vmatprep.subr.bf16.mxu0 %v1694_v54  ;;  %v4042_v57 = vmax.f32 %v4583_v5, 0.0  ;;  %v1701_v37 = vpack.c.bf16 %v1221_v56, %v1213_v36  ;;  %v7192_v56 = vld [vmem:[#allocation8_spill] sm:$0xff] }
 0x1ff   : > { %v4617_v38 = vadd.f32 %v3051_v33, %v6816_v61  ;;  %v4586_v46 = vadd.f32 %v2601_v28, %v6816_v61  ;;  %v3053_v0 = vpop.f32.mrb[11].mxu1  ;;  %3917 = vmatprep.subr.bf16.mxu1 %v1696_v27  ;;  %v4044_v49 = vmax.f32 %v4615_v8, 0.0  ;;  %v4043_v13 = vmax.f32 %v4584_v30, 0.0  ;;  %v6848_v15 = vpop.permute.xlu1 %1822 }
 0x200   : > { %v4050_v62 = vmax.f32 %v4585_v7, 0.0  ;;  %v4618_v59 = vadd.f32 %v3053_v0, %v6816_v61  ;;  %3415 = vmatmul.mubr.bf16.gmra.mrb[52].mxu0 %v5979_v43  ;;  %v4045_v10 = vmax.f32 %v4616_v44, 0.0  ;;  %v1703_v54 = vpack.c.bf16 %v1223_v11, %v1215_v20 }
 0x201   : > { %v4052_v47 = vmax.f32 %v4617_v38, 0.0  ;;  %v4051_v34 = vmax.f32 %v4586_v46, 0.0  ;;  %3466 = vmatpush1.bf16.msra.mxu0 %v1693_v4  ;;  %3867 = vmatmul.mubr.bf16.gmra.mrb[52].mxu1 %v5979_v43 }
 0x202   : > { %v6842_v31 = vpack.c.bf16 %v4050_v62, %v4042_v57  ;;  %v4053_v60 = vmax.f32 %v4618_v59, 0.0  ;;  %3918 = vmatpush1.bf16.msra.mxu1 %v1695_v25  ;;  %3467 = vmatprep.subr.bf16.mxu0 %v1702_v48  ;;  %v7193_v48 = vld [vmem:[#allocation9_spill] sm:$0xff] }
 0x203   : > { %v6844_v29 = vpack.c.bf16 %v4052_v47, %v4044_v49  ;;  %v6846_v14 = vpack.c.bf16 %v4051_v34, %v4043_v13  ;;  %v2605_v55 = vpop.f32.mrb[12].mxu0  ;;  %3919 = vmatprep.subr.bf16.mxu1 %v1704_v19  ;;  %3424 = vmatprep.mubr.bf16.mxu0 %v5984_v63  ;;  %v6876_v11 = vpop.permute.xlu1 %1832 }
 0x204   : > { %v6851_v43 = vpack.c.bf16 %v4053_v60, %v4045_v10  ;;  %v4587_v42 = vadd.f32 %v2605_v55, %v6840_v2  ;;  %v3057_v27 = vpop.f32.mrb[12].mxu1  ;;  %v2607_v16 = vpop.f32.mrb[13].mxu0  ;;  %3876 = vmatprep.mubr.bf16.mxu1 %v5984_v63 }
 0x205   : > { %v4619_v17 = vadd.f32 %v3057_v27, %v6840_v2  ;;  %v4588_v5 = vadd.f32 %v2607_v16, %v6840_v2  ;;  %v3059_v21 = vpop.f32.mrb[13].mxu1  ;;  %3468 = vmatpush1.bf16.msra.mxu0 %v1701_v37  ;;  %v2609_v58 = vpop.f32.mrb[14].mxu0 }
 0x206   : > { %v4620_v50 = vadd.f32 %v3059_v21, %v6840_v2  ;;  %3920 = vmatpush1.bf16.msra.mxu1 %v1703_v54  ;;  %v4589_v22 = vadd.f32 %v2609_v58, %v6848_v15  ;;  %v3061_v8 = vpop.f32.mrb[14].mxu1  ;;  %4209 = vmatprep.subr.bf16.mxu0 %v6761_v35  ;;  %v2611_v30 = vpop.f32.mrb[15].mxu0  ;;  %v4058_v4 = vmax.f32 %v4587_v42, 0.0  ;;  %v7194_v58 = vld [vmem:[#allocation10_spill] sm:$0xff] }
 0x207   : > { %v4621_v3 = vadd.f32 %v3061_v8, %v6848_v15  ;;  %4250 = vmatprep.subr.bf16.mxu1 %v6769_v32  ;;  %v4590_v63 = vadd.f32 %v2611_v30, %v6848_v15  ;;  %v3063_v24 = vpop.f32.mrb[15].mxu1  ;;  %v4060_v44 = vmax.f32 %v4619_v17, 0.0  ;;  %v4059_v7 = vmax.f32 %v4588_v5, 0.0  ;;  %v6866_v35 = vpop.permute.xlu0 %1827 }
 0x208   : > { %v4066_v25 = vmax.f32 %v4589_v22, 0.0  ;;  %v4622_v36 = vadd.f32 %v3063_v24, %v6848_v15  ;;  %3425 = vmatmul.mubr.bf16.gmra.mrb[56].mxu0 %v7192_v56  ;;  %v4061_v32 = vmax.f32 %v4620_v50, 0.0 }
 0x209   : > { %v4068_v33 = vmax.f32 %v4621_v3, 0.0  ;;  %v4067_v28 = vmax.f32 %v4590_v63, 0.0  ;;  %3877 = vmatmul.mubr.bf16.gmra.mrb[56].mxu1 %v7192_v56  ;;  %3434 = vmatprep.mubr.bf16.mxu0 %v7193_v48  ;;  %v7195_v63 = vld [vmem:[#allocation11_spill] sm:$0xff] }
 0x20a   : > { %v6869_v38 = vpack.c.bf16 %v4066_v25, %v4058_v4  ;;  %v4069_v46 = vmax.f32 %v4622_v36, 0.0  ;;  %3886 = vmatprep.mubr.bf16.mxu1 %v7193_v48 }
 0x20b   : > { %v6872_v0 = vpack.c.bf16 %v4068_v33, %v4060_v44  ;;  %v6874_v19 = vpack.c.bf16 %v4067_v28, %v4059_v7  ;;  %v2615_v20 = vpop.f32.mrb[16].mxu0  ;;  %v6890_v3 = vpop.permute.xlu0 %1837 }
 0x20c   : > { %v6878_v57 = vpack.c.bf16 %v4069_v46, %v4061_v32  ;;  %v4591_v62 = vadd.f32 %v2615_v20, %v6866_v35  ;;  %v3067_v59 = vpop.f32.mrb[16].mxu1  ;;  %v2617_v37 = vpop.f32.mrb[17].mxu0 }
 0x20d   : > { %v4623_v49 = vadd.f32 %v3067_v59, %v6866_v35  ;;  %v4592_v13 = vadd.f32 %v2617_v37, %v6866_v35  ;;  %v3069_v47 = vpop.f32.mrb[17].mxu1  ;;  %v2619_v34 = vpop.f32.mrb[18].mxu0 }
 0x20e   : > { %v4624_v10 = vadd.f32 %v3069_v47, %v6866_v35  ;;  %v4593_v60 = vadd.f32 %v2619_v34, %v6876_v11  ;;  %v3071_v54 = vpop.f32.mrb[18].mxu1  ;;  %v2621_v55 = vpop.f32.mrb[19].mxu0  ;;  %v4074_v17 = vmax.f32 %v4591_v62, 0.0 }
 0x20f   : > { %v4625_v42 = vadd.f32 %v3071_v54, %v6876_v11  ;;  %v4594_v27 = vadd.f32 %v2621_v55, %v6876_v11  ;;  %v3073_v16 = vpop.f32.mrb[19].mxu1  ;;  %v4076_v50 = vmax.f32 %v4623_v49, 0.0  ;;  %v4075_v22 = vmax.f32 %v4592_v13, 0.0  ;;  %v6902_v7 = vpop.permute.xlu1 %1842 }
 0x210   : > { %v4082_v5 = vmax.f32 %v4593_v60, 0.0  ;;  %v4626_v21 = vadd.f32 %v3073_v16, %v6876_v11  ;;  %3435 = vmatmul.mubr.bf16.gmra.mrb[60].mxu0 %v7194_v58  ;;  %v4077_v24 = vmax.f32 %v4624_v10, 0.0 }
 0x211   : > { %v4084_v8 = vmax.f32 %v4625_v42, 0.0  ;;  %v4083_v30 = vmax.f32 %v4594_v27, 0.0  ;;  %3887 = vmatmul.mubr.bf16.gmra.mrb[60].mxu1 %v7194_v58  ;;  %4556 = vmatprep.mubr.msk.bf16.mxu0 %vm2177_vm0, %v7195_v63  ;;  %v7196_v27 = vld [vmem:[#allocation12_spill] sm:$0xff]  ;;  %v6917_v58 = vpop.permute.xlu0 %1847 }
 0x212   : > { %v6894_v4 = vpack.c.bf16 %v4082_v5, %v4074_v17  ;;  %v4085_v25 = vmax.f32 %v4626_v21, 0.0  ;;  %4564 = vmatprep.mubr.msk.bf16.mxu1 %vm2177_vm0, %v7195_v63 }
 0x213   : > { %v6898_v36 = vpack.c.bf16 %v4084_v8, %v4076_v50  ;;  %v6900_v56 = vpack.c.bf16 %v4083_v30, %v4075_v22  ;;  %v2625_v44 = vpop.f32.mrb[20].mxu0 }
 0x214   : > { %v6904_v33 = vpack.c.bf16 %v4085_v25, %v4077_v24  ;;  %v4595_v28 = vadd.f32 %v2625_v44, %v6890_v3  ;;  %v3077_v48 = vpop.f32.mrb[20].mxu1  ;;  %v2627_v32 = vpop.f32.mrb[21].mxu0 }
 0x215   : > { %v4627_v46 = vadd.f32 %v3077_v48, %v6890_v3  ;;  %v4596_v20 = vadd.f32 %v2627_v32, %v6890_v3  ;;  %v3079_v62 = vpop.f32.mrb[21].mxu1  ;;  %v2629_v59 = vpop.f32.mrb[22].mxu0 }
 0x216   : > { %v4628_v37 = vadd.f32 %v3079_v62, %v6890_v3  ;;  %v4597_v49 = vadd.f32 %v2629_v59, %v6902_v7  ;;  %v3081_v13 = vpop.f32.mrb[22].mxu1  ;;  %v2631_v47 = vpop.f32.mrb[23].mxu0  ;;  %v4090_v54 = vmax.f32 %v4595_v28, 0.0 }
 0x217   : > { %v4629_v34 = vadd.f32 %v3081_v13, %v6902_v7  ;;  %v4598_v10 = vadd.f32 %v2631_v47, %v6902_v7  ;;  %v3083_v60 = vpop.f32.mrb[23].mxu1  ;;  %v4092_v16 = vmax.f32 %v4627_v46, 0.0  ;;  %v4091_v17 = vmax.f32 %v4596_v20, 0.0  ;;  %v6928_v25 = vpop.permute.xlu1 %1852 }
 0x218   : > { %v4098_v55 = vmax.f32 %v4597_v49, 0.0  ;;  %v4630_v42 = vadd.f32 %v3083_v60, %v6902_v7  ;;  %3478 = vmatmul.mubr.bf16.vlgmr.msra.gmra.mrb[32].mxu0 %v7196_v27  ;;  %v4093_v50 = vmax.f32 %v4628_v37, 0.0  ;;  %v7198_v60 = vld [vmem:[#allocation14_spill] sm:$0xff] }
 0x219   : > { %v4100_v5 = vmax.f32 %v4629_v34, 0.0  ;;  %v4099_v21 = vmax.f32 %v4598_v10, 0.0  ;;  %3930 = vmatmul.mubr.bf16.vlgmr.msra.gmra.mrb[32].mxu1 %v7196_v27  ;;  %4210 = vmatpush1.bf16.msra.mxu0 %v6754_v39  ;;  %v7197_v39 = vld [vmem:[#allocation13_spill] sm:$0xff] }
 0x21a   : > { %v6919_v22 = vpack.c.bf16 %v4098_v55, %v4090_v54  ;;  %v4101_v8 = vmax.f32 %v4630_v42, 0.0  ;;  %4251 = vmatpush1.bf16.msra.mxu1 %v6759_v45  ;;  %4211 = vmatprep.subr.bf16.mxu0 %v6814_v52 }
 0x21b   : > { %v6923_v30 = vpack.c.bf16 %v4100_v5, %v4092_v16  ;;  %v6925_v63 = vpack.c.bf16 %v4099_v21, %v4091_v17  ;;  %4252 = vmatprep.subr.bf16.mxu1 %v6821_v6  ;;  %v2635_v24 = vpop.f32.mrb[24].mxu0  ;;  %4557 = vmatprep.mubr.msk.bf16.mxu0 %vm2177_vm0, %v7197_v39 }
 0x21c   : > { %v6932_v44 = vpack.c.bf16 %v4101_v8, %v4093_v50  ;;  %v4599_v28 = vadd.f32 %v2635_v24, %v6917_v58  ;;  %v3087_v48 = vpop.f32.mrb[24].mxu1  ;;  %v2637_v45 = vpop.f32.mrb[25].mxu0  ;;  %4565 = vmatprep.mubr.msk.bf16.mxu1 %vm2177_vm0, %v7197_v39  ;;  %v7199_v8 = vld [vmem:[#allocation15_spill] sm:$0xff] }
 0x21d   : > { %v4631_v52 = vadd.f32 %v3087_v48, %v6917_v58  ;;  %v4600_v32 = vadd.f32 %v2637_v45, %v6917_v58  ;;  %v3089_v6 = vpop.f32.mrb[25].mxu1  ;;  %4212 = vmatpush1.bf16.msra.mxu0 %v6807_v40  ;;  %v2639_v46 = vpop.f32.mrb[26].mxu0 }
 0x21e   : > { %v4632_v20 = vadd.f32 %v3089_v6, %v6917_v58  ;;  %4253 = vmatpush1.bf16.msra.mxu1 %v6812_v41  ;;  %v4601_v62 = vadd.f32 %v2639_v46, %v6928_v25  ;;  %v3091_v59 = vpop.f32.mrb[26].mxu1  ;;  %4213 = vmatprep.subr.bf16.mxu0 %v6846_v14  ;;  %v2641_v37 = vpop.f32.mrb[27].mxu0  ;;  %v4106_v34 = vmax.f32 %v4599_v28, 0.0 }
 0x21f   : > { %v4633_v49 = vadd.f32 %v3091_v59, %v6928_v25  ;;  %4254 = vmatprep.subr.bf16.mxu1 %v6851_v43  ;;  %v4602_v13 = vadd.f32 %v2641_v37, %v6928_v25  ;;  %v3093_v47 = vpop.f32.mrb[27].mxu1  ;;  %v4108_v41 = vmax.f32 %v4631_v52, 0.0  ;;  %v4107_v54 = vmax.f32 %v4600_v32, 0.0  ;;  %v6951_v14 = vpop.permute.xlu0 %1857 }
 0x220   : > { %v4114_v40 = vmax.f32 %v4601_v62, 0.0  ;;  %v4634_v10 = vadd.f32 %v3093_v47, %v6928_v25  ;;  %3488 = vmatmul.mubr.bf16.gmra.mrb[36].mxu0 %v7198_v60  ;;  %v4109_v43 = vmax.f32 %v4632_v20, 0.0  ;;  %v6956_v50 = vpop.permute.xlu1 %1862 }
 0x221   : > { %v4116_v55 = vmax.f32 %v4633_v49, 0.0  ;;  %v4115_v42 = vmax.f32 %v4602_v13, 0.0  ;;  %3940 = vmatmul.mubr.bf16.gmra.mrb[36].mxu1 %v7198_v60  ;;  %4214 = vmatpush1.bf16.msra.mxu0 %v6842_v31  ;;  %v7200_v49 = vld [vmem:[#allocation16_spill] sm:$0xff] }
 0x222   : > { %v4187_v27 = vpack.c.bf16 %v4114_v40, %v4106_v34  ;;  %v4117_v16 = vmax.f32 %v4634_v10, 0.0  ;;  %4255 = vmatpush1.bf16.msra.mxu1 %v6844_v29  ;;  %4215 = vmatprep.subr.bf16.mxu0 %v6874_v19 }
 0x223   : > { %v4189_v17 = vpack.c.bf16 %v4116_v55, %v4108_v41  ;;  %v4188_v5 = vpack.c.bf16 %v4115_v42, %v4107_v54  ;;  %4256 = vmatprep.subr.bf16.mxu1 %v6878_v57  ;;  %v2645_v21 = vpop.f32.mrb[28].mxu0  ;;  %4558 = vmatprep.mubr.msk.bf16.mxu0 %vm2177_vm0, %v7199_v8  ;;  %v7201_v41 = vld [vmem:[#allocation17_spill] sm:$0xff]  ;;  %v7208_v55 = vmov 0   ;;  %v7017_v42 = vld [vmem:[%s7115_s3] sm:$0xf] }
 0x224   : > { %v4190_v31 = vpack.c.bf16 %v4117_v16, %v4109_v43  ;;  %v4603_v24 = vadd.f32 %v2645_v21, %v6951_v14  ;;  %v3097_v39 = vpop.f32.mrb[28].mxu1  ;;  %v2647_v28 = vpop.f32.mrb[29].mxu0  ;;  %4566 = vmatprep.mubr.msk.bf16.mxu1 %vm2177_vm0, %v7199_v8 }
 0x225   : > { %v4635_v29 = vadd.f32 %v3097_v39, %v6951_v14  ;;  %v4604_v19 = vadd.f32 %v2647_v28, %v6951_v14  ;;  %v3099_v48 = vpop.f32.mrb[29].mxu1  ;;  %4216 = vmatpush1.bf16.msra.mxu0 %v6869_v38  ;;  %v2649_v57 = vpop.f32.mrb[30].mxu0 }
 0x226   : > { %v4636_v45 = vadd.f32 %v3099_v48, %v6951_v14  ;;  %4257 = vmatpush1.bf16.msra.mxu1 %v6872_v0  ;;  %v4605_v52 = vadd.f32 %v2649_v57, %v6956_v50  ;;  %v3101_v32 = vpop.f32.mrb[30].mxu1  ;;  %4217 = vmatprep.subr.bf16.mxu0 %v6900_v56  ;;  %v2651_v6 = vpop.f32.mrb[31].mxu0  ;;  %v4122_v59 = vmax.f32 %v4603_v24, 0.0 }
 0x227   : > { %v4637_v46 = vadd.f32 %v3101_v32, %v6956_v50  ;;  %4258 = vmatprep.subr.bf16.mxu1 %v6904_v33  ;;  %v4606_v20 = vadd.f32 %v2651_v6, %v6956_v50  ;;  %v3103_v62 = vpop.f32.mrb[31].mxu1  ;;  %v4124_v0 = vmax.f32 %v4635_v29, 0.0  ;;  %v4123_v13 = vmax.f32 %v4604_v19, 0.0 }
 0x228   : > { %v4130_v38 = vmax.f32 %v4605_v52, 0.0  ;;  %v4638_v37 = vadd.f32 %v3103_v62, %v6956_v50  ;;  %3498 = vmatmul.mubr.bf16.gmra.mrb[40].mxu0 %v7200_v49  ;;  %v4125_v56 = vmax.f32 %v4636_v45, 0.0 }
 0x229   : > { %v4132_v47 = vmax.f32 %v4637_v46, 0.0  ;;  %v4131_v34 = vmax.f32 %v4606_v20, 0.0  ;;  %3950 = vmatmul.mubr.bf16.gmra.mrb[40].mxu1 %v7200_v49  ;;  %4218 = vmatpush1.bf16.msra.mxu0 %v6894_v4  ;;  %v7202_v4 = vld [vmem:[#allocation18_spill] sm:$0xff] }
 0x22a   : > { %v4195_v40 = vpack.c.bf16 %v4130_v38, %v4122_v59  ;;  %v4133_v33 = vmax.f32 %v4638_v37, 0.0  ;;  %4259 = vmatpush1.bf16.msra.mxu1 %v6898_v36  ;;  %4219 = vmatprep.subr.bf16.mxu0 %v6925_v63  ;;  %v7203_v36 = vld [vmem:[#allocation19_spill] sm:$0xff]  ;;  %v7206_v63 = vld [vmem:[#allocation22_spill] sm:$0xff] }
 0x22b   : > { %v4197_v10 = vpack.c.bf16 %v4132_v47, %v4124_v0  ;;  %v4196_v60 = vpack.c.bf16 %v4131_v34, %v4123_v13  ;;  %4260 = vmatprep.subr.bf16.mxu1 %v6932_v44  ;;  %4559 = vmatprep.mubr.msk.bf16.mxu0 %vm2177_vm0, %v7201_v41  ;;  %v7207_v44 = vld [vmem:[#allocation23_spill] sm:$0xff] }
 0x22c   : > { %v4198_v54 = vpack.c.bf16 %v4133_v33, %v4125_v56  ;;  %4567 = vmatprep.mubr.msk.bf16.mxu1 %vm2177_vm0, %v7201_v41 }
 0x22d   : > { %4220 = vmatpush1.bf16.msra.mxu0 %v6919_v22  ;;  %v7204_v22 = vld [vmem:[#allocation20_spill] sm:$0xff] }
 0x22e   : > { %4261 = vmatpush1.bf16.msra.mxu1 %v6923_v30  ;;  %4221 = vmatprep.subr.bf16.mxu0 %v4188_v5  ;;  %v7205_v30 = vld [vmem:[#allocation21_spill] sm:$0xff] }
 0x22f   : > { %4262 = vmatprep.subr.bf16.mxu1 %v4190_v31 }
 0x230   : > { %3508 = vmatmul.mubr.bf16.gmra.mrb[44].mxu0 %v7202_v4 }
 0x231   : > { %3960 = vmatmul.mubr.bf16.gmra.mrb[44].mxu1 %v7202_v4  ;;  %4222 = vmatpush1.bf16.msra.mxu0 %v4187_v27 }
 0x232   : > { %4263 = vmatpush1.bf16.msra.mxu1 %v4189_v17  ;;  %4223 = vmatprep.subr.bf16.mxu0 %v4196_v60 }
 0x233   : > { %4264 = vmatprep.subr.bf16.mxu1 %v4198_v54  ;;  %4560 = vmatprep.mubr.msk.bf16.mxu0 %vm2177_vm0, %v7203_v36 }
 0x234   : > { %4568 = vmatprep.mubr.msk.bf16.mxu1 %vm2177_vm0, %v7203_v36 }
 0x235   : > { %4224 = vmatpush1.bf16.msra.mxu0 %v4195_v40 }
 0x236   : > { %4265 = vmatpush1.bf16.msra.mxu1 %v4197_v10 }
 0x238   : > { %3518 = vmatmul.mubr.bf16.gmra.mrb[48].mxu0 %v7204_v22 }
 0x239   : > { %3970 = vmatmul.mubr.bf16.gmra.mrb[48].mxu1 %v7204_v22  ;;  %4561 = vmatprep.mubr.msk.bf16.mxu0 %vm2177_vm0, %v7205_v30 }
 0x23a   : > { %4569 = vmatprep.mubr.msk.bf16.mxu1 %vm2177_vm0, %v7205_v30 }
 0x240   : > { %3528 = vmatmul.mubr.bf16.gmra.mrb[52].mxu0 %v7206_v63 }
 0x241   : > { %3980 = vmatmul.mubr.bf16.gmra.mrb[52].mxu1 %v7206_v63  ;;  %4562 = vmatprep.mubr.msk.bf16.mxu0 %vm2177_vm0, %v7207_v44 }
 0x242   : > { %4570 = vmatprep.mubr.msk.bf16.mxu1 %vm2177_vm0, %v7207_v44 }
 0x248   : > { %3538 = vmatmul.mubr.bf16.gmra.mrb[56].mxu0 %v6277_v23 }
 0x249   : > { %3990 = vmatmul.mubr.bf16.gmra.mrb[56].mxu1 %v6277_v23  ;;  %4563 = vmatprep.mubr.msk.bf16.mxu0 %vm2177_vm0, %v6290_v51 }
 0x24a   : > { %4571 = vmatprep.mubr.msk.bf16.mxu1 %vm2177_vm0, %v6290_v51 }
 0x250   : > { %3548 = vmatmul.mubr.bf16.gmra.mrb[60].mxu0 %v6308_v9 }
 0x251   : > { %4000 = vmatmul.mubr.bf16.gmra.mrb[60].mxu1 %v6308_v9  ;;  %4241 = vmatprep.mubr.bf16.mxu0 %v7208_v55 }
 0x252   : > { %4282 = vmatprep.mubr.bf16.mxu1 %v7208_v55 }
 0x258   : > { %4242 = vmatmul.mubr.bf16.vlgmr.msra.gmra.mrb[64].mxu0 %v7017_v42 }
 0x259   : > { %4283 = vmatmul.mubr.bf16.vlgmr.msra.gmra.mrb[64].mxu1 %v7017_v42  ;;  %4323 = vmatprep.mubr.bf16.mxu0 %v7208_v55 }
 0x25a   : > { %4364 = vmatprep.mubr.bf16.mxu1 %v7208_v55 }
 0x2eb   : > { %v3479_v51 = vpop.f32.mrb[32].mxu0 }
 0x2ec   : > { %v4639_v23 = vadd.f32 %v3479_v51, %v6693_v53  ;;  %v3931_v9 = vpop.f32.mrb[32].mxu1  ;;  %v3481_v43 = vpop.f32.mrb[33].mxu0 }
 0x2ed   : > { %v4671_v27 = vadd.f32 %v3931_v9, %v6693_v53  ;;  %v4640_v16 = vadd.f32 %v3481_v43, %v6693_v53  ;;  %v3933_v17 = vpop.f32.mrb[33].mxu1  ;;  %v3483_v5 = vpop.f32.mrb[34].mxu0 }
 0x2ee   : > { %v4672_v21 = vadd.f32 %v3933_v17, %v6693_v53  ;;  %v4641_v8 = vadd.f32 %v3483_v5, %v6708_v1  ;;  %v3935_v31 = vpop.f32.mrb[34].mxu1  ;;  %v3485_v24 = vpop.f32.mrb[35].mxu0  ;;  %v4014_v19 = vmax.f32 %v4639_v23, 0.0 }
 0x2ef   : > { %v4673_v39 = vadd.f32 %v3935_v31, %v6708_v1  ;;  %v4642_v28 = vadd.f32 %v3485_v24, %v6708_v1  ;;  %v3937_v29 = vpop.f32.mrb[35].mxu1  ;;  %v4016_v45 = vmax.f32 %v4671_v27, 0.0  ;;  %v4015_v52 = vmax.f32 %v4640_v16, 0.0 }
 0x2f0   : > { %v4022_v48 = vmax.f32 %v4641_v8, 0.0  ;;  %v4674_v57 = vadd.f32 %v3937_v29, %v6708_v1  ;;  %v4017_v46 = vmax.f32 %v4672_v21, 0.0 }
 0x2f1   : > { %v4024_v32 = vmax.f32 %v4673_v39, 0.0  ;;  %v4023_v6 = vmax.f32 %v4642_v28, 0.0 }
 0x2f2   : > { %v4143_v20 = vpack.c.bf16 %v4022_v48, %v4014_v19  ;;  %v4025_v53 = vmax.f32 %v4674_v57, 0.0 }
 0x2f3   : > { %v4145_v62 = vpack.c.bf16 %v4024_v32, %v4016_v45  ;;  %v4144_v59 = vpack.c.bf16 %v4023_v6, %v4015_v52  ;;  %v3489_v38 = vpop.f32.mrb[36].mxu0 }
 0x2f4   : > { %v4146_v37 = vpack.c.bf16 %v4025_v53, %v4017_v46  ;;  %v4643_v49 = vadd.f32 %v3489_v38, %v6714_v12  ;;  %v3941_v0 = vpop.f32.mrb[36].mxu1  ;;  %v3491_v13 = vpop.f32.mrb[37].mxu0 }
 0x2f5   : > { %v4675_v47 = vadd.f32 %v3941_v0, %v6714_v12  ;;  %v4644_v34 = vadd.f32 %v3491_v13, %v6714_v12  ;;  %v3943_v1 = vpop.f32.mrb[37].mxu1  ;;  %v3493_v56 = vpop.f32.mrb[38].mxu0  ;;  %4291 = vmatprep.subr.bf16.mxu0 %v4144_v59 }
 0x2f6   : > { %v4676_v40 = vadd.f32 %v3943_v1, %v6714_v12  ;;  %v4645_v33 = vadd.f32 %v3493_v56, %v6763_v26  ;;  %v3945_v10 = vpop.f32.mrb[38].mxu1  ;;  %4332 = vmatprep.subr.bf16.mxu1 %v4146_v37  ;;  %v3495_v60 = vpop.f32.mrb[39].mxu0  ;;  %4292 = vmatpush1.bf16.msra.mxu0 %v4143_v20  ;;  %v4030_v36 = vmax.f32 %v4643_v49, 0.0 }
 0x2f7   : > { %v4677_v41 = vadd.f32 %v3945_v10, %v6763_v26  ;;  %v4646_v54 = vadd.f32 %v3495_v60, %v6763_v26  ;;  %v3947_v4 = vpop.f32.mrb[39].mxu1  ;;  %4333 = vmatpush1.bf16.msra.mxu1 %v4145_v62  ;;  %v4032_v63 = vmax.f32 %v4675_v47, 0.0  ;;  %v4031_v44 = vmax.f32 %v4644_v34, 0.0 }
 0x2f8   : > { %v4038_v22 = vmax.f32 %v4645_v33, 0.0  ;;  %v4678_v30 = vadd.f32 %v3947_v4, %v6763_v26  ;;  %v4033_v51 = vmax.f32 %v4676_v40, 0.0 }
 0x2f9   : > { %v4040_v55 = vmax.f32 %v4677_v41, 0.0  ;;  %v4039_v12 = vmax.f32 %v4646_v54, 0.0 }
 0x2fa   : > { %v4151_v23 = vpack.c.bf16 %v4038_v22, %v4030_v36  ;;  %v4041_v9 = vmax.f32 %v4678_v30, 0.0 }
 0x2fb   : > { %v4153_v43 = vpack.c.bf16 %v4040_v55, %v4032_v63  ;;  %v4152_v27 = vpack.c.bf16 %v4039_v12, %v4031_v44  ;;  %v3499_v16 = vpop.f32.mrb[40].mxu0 }
 0x2fc   : > { %v4154_v17 = vpack.c.bf16 %v4041_v9, %v4033_v51  ;;  %v4647_v5 = vadd.f32 %v3499_v16, %v6804_v18  ;;  %v3951_v21 = vpop.f32.mrb[40].mxu1  ;;  %v3501_v8 = vpop.f32.mrb[41].mxu0 }
 0x2fd   : > { %v4679_v31 = vadd.f32 %v3951_v21, %v6804_v18  ;;  %v4648_v24 = vadd.f32 %v3501_v8, %v6804_v18  ;;  %v3953_v26 = vpop.f32.mrb[41].mxu1  ;;  %v3503_v39 = vpop.f32.mrb[42].mxu0  ;;  %4293 = vmatprep.subr.bf16.mxu0 %v4152_v27 }
 0x2fe   : > { %v4680_v28 = vadd.f32 %v3953_v26, %v6804_v18  ;;  %v4649_v29 = vadd.f32 %v3503_v39, %v6816_v61  ;;  %v3955_v19 = vpop.f32.mrb[42].mxu1  ;;  %4334 = vmatprep.subr.bf16.mxu1 %v4154_v17  ;;  %v3505_v48 = vpop.f32.mrb[43].mxu0  ;;  %4294 = vmatpush1.bf16.msra.mxu0 %v4151_v23  ;;  %v4046_v32 = vmax.f32 %v4647_v5, 0.0 }
 0x2ff   : > { %v4681_v57 = vadd.f32 %v3955_v19, %v6816_v61  ;;  %v4650_v45 = vadd.f32 %v3505_v48, %v6816_v61  ;;  %v3957_v52 = vpop.f32.mrb[43].mxu1  ;;  %4335 = vmatpush1.bf16.msra.mxu1 %v4153_v43  ;;  %v4048_v20 = vmax.f32 %v4679_v31, 0.0  ;;  %v4047_v53 = vmax.f32 %v4648_v24, 0.0 }
 0x300   : > { %v4054_v6 = vmax.f32 %v4649_v29, 0.0  ;;  %v4682_v46 = vadd.f32 %v3957_v52, %v6816_v61  ;;  %v4049_v59 = vmax.f32 %v4680_v28, 0.0 }
 0x301   : > { %v4056_v62 = vmax.f32 %v4681_v57, 0.0  ;;  %v4055_v18 = vmax.f32 %v4650_v45, 0.0 }
 0x302   : > { %v4159_v38 = vpack.c.bf16 %v4054_v6, %v4046_v32  ;;  %v4057_v37 = vmax.f32 %v4682_v46, 0.0 }
 0x303   : > { %v4161_v49 = vpack.c.bf16 %v4056_v62, %v4048_v20  ;;  %v4160_v0 = vpack.c.bf16 %v4055_v18, %v4047_v53  ;;  %v3509_v13 = vpop.f32.mrb[44].mxu0 }
 0x304   : > { %v4162_v47 = vpack.c.bf16 %v4057_v37, %v4049_v59  ;;  %v4651_v34 = vadd.f32 %v3509_v13, %v6840_v2  ;;  %v3961_v1 = vpop.f32.mrb[44].mxu1  ;;  %v3511_v56 = vpop.f32.mrb[45].mxu0 }
 0x305   : > { %v4683_v40 = vadd.f32 %v3961_v1, %v6840_v2  ;;  %v4652_v33 = vadd.f32 %v3511_v56, %v6840_v2  ;;  %v3963_v61 = vpop.f32.mrb[45].mxu1  ;;  %v3513_v10 = vpop.f32.mrb[46].mxu0  ;;  %4295 = vmatprep.subr.bf16.mxu0 %v4160_v0 }
 0x306   : > { %v4684_v60 = vadd.f32 %v3963_v61, %v6840_v2  ;;  %v4653_v41 = vadd.f32 %v3513_v10, %v6848_v15  ;;  %v3965_v54 = vpop.f32.mrb[46].mxu1  ;;  %4336 = vmatprep.subr.bf16.mxu1 %v4162_v47  ;;  %v3515_v4 = vpop.f32.mrb[47].mxu0  ;;  %4296 = vmatpush1.bf16.msra.mxu0 %v4159_v38  ;;  %v4062_v63 = vmax.f32 %v4651_v34, 0.0 }
 0x307   : > { %v4685_v36 = vadd.f32 %v3965_v54, %v6848_v15  ;;  %v4654_v22 = vadd.f32 %v3515_v4, %v6848_v15  ;;  %v3967_v30 = vpop.f32.mrb[47].mxu1  ;;  %4337 = vmatpush1.bf16.msra.mxu1 %v4161_v49  ;;  %v4064_v12 = vmax.f32 %v4683_v40, 0.0  ;;  %v4063_v51 = vmax.f32 %v4652_v33, 0.0 }
 0x308   : > { %v4070_v44 = vmax.f32 %v4653_v41, 0.0  ;;  %v4686_v55 = vadd.f32 %v3967_v30, %v6848_v15  ;;  %v4065_v9 = vmax.f32 %v4684_v60, 0.0 }
 0x309   : > { %v4072_v23 = vmax.f32 %v4685_v36, 0.0  ;;  %v4071_v2 = vmax.f32 %v4654_v22, 0.0 }
 0x30a   : > { %v4167_v43 = vpack.c.bf16 %v4070_v44, %v4062_v63  ;;  %v4073_v27 = vmax.f32 %v4686_v55, 0.0 }
 0x30b   : > { %v4169_v16 = vpack.c.bf16 %v4072_v23, %v4064_v12  ;;  %v4168_v17 = vpack.c.bf16 %v4071_v2, %v4063_v51  ;;  %v3519_v5 = vpop.f32.mrb[48].mxu0 }
 0x30c   : > { %v4170_v21 = vpack.c.bf16 %v4073_v27, %v4065_v9  ;;  %v4655_v8 = vadd.f32 %v3519_v5, %v6866_v35  ;;  %v3971_v31 = vpop.f32.mrb[48].mxu1  ;;  %v3521_v24 = vpop.f32.mrb[49].mxu0 }
 0x30d   : > { %v4687_v26 = vadd.f32 %v3971_v31, %v6866_v35  ;;  %v4656_v39 = vadd.f32 %v3521_v24, %v6866_v35  ;;  %v3973_v15 = vpop.f32.mrb[49].mxu1  ;;  %v3523_v28 = vpop.f32.mrb[50].mxu0  ;;  %4297 = vmatprep.subr.bf16.mxu0 %v4168_v17 }
 0x30e   : > { %v4688_v29 = vadd.f32 %v3973_v15, %v6866_v35  ;;  %v4657_v19 = vadd.f32 %v3523_v28, %v6876_v11  ;;  %v3975_v48 = vpop.f32.mrb[50].mxu1  ;;  %4338 = vmatprep.subr.bf16.mxu1 %v4170_v21  ;;  %v3525_v57 = vpop.f32.mrb[51].mxu0  ;;  %4298 = vmatpush1.bf16.msra.mxu0 %v4167_v43  ;;  %v4078_v6 = vmax.f32 %v4655_v8, 0.0 }
 0x30f   : > { %v4689_v45 = vadd.f32 %v3975_v48, %v6876_v11  ;;  %v4658_v52 = vadd.f32 %v3525_v57, %v6876_v11  ;;  %v3977_v32 = vpop.f32.mrb[51].mxu1  ;;  %4339 = vmatpush1.bf16.msra.mxu1 %v4169_v16  ;;  %v4080_v53 = vmax.f32 %v4687_v26, 0.0  ;;  %v4079_v62 = vmax.f32 %v4656_v39, 0.0 }
 0x310   : > { %v4086_v46 = vmax.f32 %v4657_v19, 0.0  ;;  %v4690_v20 = vadd.f32 %v3977_v32, %v6876_v11  ;;  %v4081_v59 = vmax.f32 %v4688_v29, 0.0 }
 0x311   : > { %v4088_v18 = vmax.f32 %v4689_v45, 0.0  ;;  %v4087_v35 = vmax.f32 %v4658_v52, 0.0 }
 0x312   : > { %v4175_v38 = vpack.c.bf16 %v4086_v46, %v4078_v6  ;;  %v4089_v37 = vmax.f32 %v4690_v20, 0.0 }
 0x313   : > { %v4177_v49 = vpack.c.bf16 %v4088_v18, %v4080_v53  ;;  %v4176_v0 = vpack.c.bf16 %v4087_v35, %v4079_v62  ;;  %v3529_v13 = vpop.f32.mrb[52].mxu0 }
 0x314   : > { %v4178_v47 = vpack.c.bf16 %v4089_v37, %v4081_v59  ;;  %v4659_v34 = vadd.f32 %v3529_v13, %v6890_v3  ;;  %v3981_v1 = vpop.f32.mrb[52].mxu1  ;;  %v3531_v56 = vpop.f32.mrb[53].mxu0 }
 0x315   : > { %v4691_v40 = vadd.f32 %v3981_v1, %v6890_v3  ;;  %v4660_v33 = vadd.f32 %v3531_v56, %v6890_v3  ;;  %v3983_v11 = vpop.f32.mrb[53].mxu1  ;;  %v3533_v61 = vpop.f32.mrb[54].mxu0  ;;  %4299 = vmatprep.subr.bf16.mxu0 %v4176_v0 }
 0x316   : > { %v4692_v10 = vadd.f32 %v3983_v11, %v6890_v3  ;;  %v4661_v60 = vadd.f32 %v3533_v61, %v6902_v7  ;;  %v3985_v41 = vpop.f32.mrb[54].mxu1  ;;  %4340 = vmatprep.subr.bf16.mxu1 %v4178_v47  ;;  %v3535_v54 = vpop.f32.mrb[55].mxu0  ;;  %4300 = vmatpush1.bf16.msra.mxu0 %v4175_v38  ;;  %v4094_v30 = vmax.f32 %v4659_v34, 0.0 }
 0x317   : > { %v4693_v4 = vadd.f32 %v3985_v41, %v6902_v7  ;;  %v4662_v36 = vadd.f32 %v3535_v54, %v6902_v7  ;;  %v3987_v22 = vpop.f32.mrb[55].mxu1  ;;  %4341 = vmatpush1.bf16.msra.mxu1 %v4177_v49  ;;  %v4096_v55 = vmax.f32 %v4691_v40, 0.0  ;;  %v4095_v12 = vmax.f32 %v4660_v33, 0.0 }
 0x318   : > { %v4102_v63 = vmax.f32 %v4661_v60, 0.0  ;;  %v4694_v44 = vadd.f32 %v3987_v22, %v6902_v7  ;;  %v4097_v23 = vmax.f32 %v4692_v10, 0.0 }
 0x319   : > { %v4104_v51 = vmax.f32 %v4693_v4, 0.0  ;;  %v4103_v3 = vmax.f32 %v4662_v36, 0.0 }
 0x31a   : > { %v4183_v2 = vpack.c.bf16 %v4102_v63, %v4094_v30  ;;  %v4105_v9 = vmax.f32 %v4694_v44, 0.0 }
 0x31b   : > { %v4185_v43 = vpack.c.bf16 %v4104_v51, %v4096_v55  ;;  %v4184_v27 = vpack.c.bf16 %v4103_v3, %v4095_v12  ;;  %v3539_v16 = vpop.f32.mrb[56].mxu0  ;;  %v4207_v12 = vpop.permute.xlu0 %4206 }
 0x31c   : > { %v4186_v17 = vpack.c.bf16 %v4105_v9, %v4097_v23  ;;  %v4663_v5 = vadd.f32 %v3539_v16, %v6917_v58  ;;  %v3991_v21 = vpop.f32.mrb[56].mxu1  ;;  %v3541_v8 = vpop.f32.mrb[57].mxu0 }
 0x31d   : > { %v4695_v31 = vadd.f32 %v3991_v21, %v6917_v58  ;;  %v4664_v24 = vadd.f32 %v3541_v8, %v6917_v58  ;;  %v3993_v7 = vpop.f32.mrb[57].mxu1  ;;  %v3543_v26 = vpop.f32.mrb[58].mxu0  ;;  %4301 = vmatprep.subr.bf16.mxu0 %v4184_v27 }
 0x31e   : > { %v4696_v39 = vadd.f32 %v3993_v7, %v6917_v58  ;;  %v4665_v15 = vadd.f32 %v3543_v26, %v6928_v25  ;;  %v3995_v28 = vpop.f32.mrb[58].mxu1  ;;  %4342 = vmatprep.subr.bf16.mxu1 %v4186_v17  ;;  %v3545_v29 = vpop.f32.mrb[59].mxu0  ;;  %4302 = vmatpush1.bf16.msra.mxu0 %v4183_v2  ;;  %v4110_v45 = vmax.f32 %v4663_v5, 0.0 }
 0x31f   : > { %v4697_v19 = vadd.f32 %v3995_v28, %v6928_v25  ;;  %v4666_v48 = vadd.f32 %v3545_v29, %v6928_v25  ;;  %v3997_v57 = vpop.f32.mrb[59].mxu1  ;;  %4343 = vmatpush1.bf16.msra.mxu1 %v4185_v43  ;;  %v4112_v6 = vmax.f32 %v4695_v31, 0.0  ;;  %v4111_v46 = vmax.f32 %v4664_v24, 0.0 }
 0x320   : > { %v4118_v52 = vmax.f32 %v4665_v15, 0.0  ;;  %v4698_v32 = vadd.f32 %v3997_v57, %v6928_v25  ;;  %v4113_v53 = vmax.f32 %v4696_v39, 0.0 }
 0x321   : > { %v4120_v20 = vmax.f32 %v4697_v19, 0.0  ;;  %v4119_v58 = vmax.f32 %v4666_v48, 0.0 }
 0x322   : > { %v4191_v62 = vpack.c.bf16 %v4118_v52, %v4110_v45  ;;  %v4121_v18 = vmax.f32 %v4698_v32, 0.0 }
 0x323   : > { %v4193_v35 = vpack.c.bf16 %v4120_v20, %v4112_v6  ;;  %v4192_v59 = vpack.c.bf16 %v4119_v58, %v4111_v46  ;;  %v3549_v38 = vpop.f32.mrb[60].mxu0 }
 0x324   : > { %v4194_v37 = vpack.c.bf16 %v4121_v18, %v4113_v53  ;;  %v4667_v49 = vadd.f32 %v3549_v38, %v6951_v14  ;;  %v4001_v0 = vpop.f32.mrb[60].mxu1  ;;  %v3551_v13 = vpop.f32.mrb[61].mxu0 }
 0x325   : > { %v4699_v47 = vadd.f32 %v4001_v0, %v6951_v14  ;;  %v4668_v34 = vadd.f32 %v3551_v13, %v6951_v14  ;;  %v4003_v25 = vpop.f32.mrb[61].mxu1  ;;  %v3553_v1 = vpop.f32.mrb[62].mxu0  ;;  %4303 = vmatprep.subr.bf16.mxu0 %v4192_v59 }
 0x326   : > { %v4700_v56 = vadd.f32 %v4003_v25, %v6951_v14  ;;  %v4669_v40 = vadd.f32 %v3553_v1, %v6956_v50  ;;  %v4005_v33 = vpop.f32.mrb[62].mxu1  ;;  %4344 = vmatprep.subr.bf16.mxu1 %v4194_v37  ;;  %v3555_v11 = vpop.f32.mrb[63].mxu0  ;;  %4304 = vmatpush1.bf16.msra.mxu0 %v4191_v62  ;;  %v4126_v41 = vmax.f32 %v4667_v49, 0.0 }
 0x327   : > { %v4701_v61 = vadd.f32 %v4005_v33, %v6956_v50  ;;  %v4670_v10 = vadd.f32 %v3555_v11, %v6956_v50  ;;  %v4007_v60 = vpop.f32.mrb[63].mxu1  ;;  %4345 = vmatpush1.bf16.msra.mxu1 %v4193_v35  ;;  %v4128_v36 = vmax.f32 %v4699_v47, 0.0  ;;  %v4127_v22 = vmax.f32 %v4668_v34, 0.0 }
 0x328   : > { %v4134_v54 = vmax.f32 %v4669_v40, 0.0  ;;  %v4702_v4 = vadd.f32 %v4007_v60, %v6956_v50  ;;  %v4129_v63 = vmax.f32 %v4700_v56, 0.0 }
 0x329   : > { %v4136_v14 = vmax.f32 %v4701_v61, 0.0  ;;  %v4135_v30 = vmax.f32 %v4670_v10, 0.0 }
 0x32a   : > { %v4199_v44 = vpack.c.bf16 %v4134_v54, %v4126_v41  ;;  %v4137_v55 = vmax.f32 %v4702_v4, 0.0 }
 0x32b   : > { %v4201_v51 = vpack.c.bf16 %v4136_v14, %v4128_v36  ;;  %v4200_v3 = vpack.c.bf16 %v4135_v30, %v4127_v22  ;;  %v4243_v23 = vpop.f32.mrb[64].mxu0 }
 0x32c   : > { %v4202_v50 = vpack.c.bf16 %v4137_v55, %v4129_v63  ;;  %v4244_v2 = vadd.f32 %v4243_v23, %v4207_v12  ;;  %v4284_v9 = vpop.f32.mrb[64].mxu1  ;;  %v4245_v43 = vpop.f32.mrb[65].mxu0 }
 0x32d   : > { %v4285_v27 = vadd.f32 %v4284_v9, %v4207_v12  ;;  %v4246_v16 = vadd.f32 %v4245_v43, %v4207_v12  ;;  %v4286_v17 = vpop.f32.mrb[65].mxu1  ;;  %4305 = vmatprep.subr.bf16.mxu0 %v4200_v3  ;;  %v4247_v5 = vpop.f32.mrb[66].mxu0 }
 0x32e   : > { %4373 = vst [vmem:[%s7091_s7] sm:$0xff] %v4244_v2  ;;  %v4287_v21 = vadd.f32 %v4286_v17, %v4207_v12  ;;  %4346 = vmatprep.subr.bf16.mxu1 %v4202_v50  ;;  %4306 = vmatpush1.bf16.msra.mxu0 %v4199_v44  ;;  %v4288_v8 = vpop.f32.mrb[66].mxu1  ;;  %v4248_v31 = vpop.f32.mrb[67].mxu0 }
 0x32f   : > { %4375 = vst [vmem:[%s7091_s7 + $0x10] sm:$0xff] %v4285_v27  ;;  %4374 = vst [vmem:[%s7091_s7 + $0x8] sm:$0xff] %v4246_v16  ;;  %4347 = vmatpush1.bf16.msra.mxu1 %v4201_v51  ;;  %v4289_v24 = vpop.f32.mrb[67].mxu1 }
 0x330   : > { %4376 = vst [vmem:[%s7091_s7 + $0x18] sm:$0xff] %v4287_v21 }
 0x331   : > { %4324 = vmatmul.mubr.bf16.vlgmr.msra.gmra.mrb[68].mxu0 %v7017_v42 }
 0x332   : > { %4365 = vmatmul.mubr.bf16.vlgmr.msra.gmra.mrb[68].mxu1 %v7017_v42 }
 0x404   : > { %v4325_v7 = vpop.f32.mrb[68].mxu0 }
 0x405   : > { %v4326_v26 = vadd.f32 %v4325_v7, %v4207_v12  ;;  %v4366_v39 = vpop.f32.mrb[68].mxu1  ;;  %v4327_v15 = vpop.f32.mrb[69].mxu0 }
 0x406   : > { %v4367_v28 = vadd.f32 %v4366_v39, %v4207_v12  ;;  %v4328_v29 = vadd.f32 %v4327_v15, %v4207_v12  ;;  %v4368_v19 = vpop.f32.mrb[69].mxu1  ;;  %v4329_v48 = vpop.f32.mrb[70].mxu0 }
 0x407   : > { %4377 = vst [vmem:[%s7091_s7 + $0x20] sm:$0xff] %v4326_v26  ;;  %v4369_v57 = vadd.f32 %v4368_v19, %v4207_v12  ;;  %v4370_v45 = vpop.f32.mrb[70].mxu1  ;;  %v4330_v52 = vpop.f32.mrb[71].mxu0 }
 0x408   : > { %4379 = vst [vmem:[%s7091_s7 + $0x30] sm:$0xff] %v4367_v28  ;;  %4378 = vst [vmem:[%s7091_s7 + $0x28] sm:$0xff] %v4328_v29  ;;  %v4371_v32 = vpop.f32.mrb[71].mxu1 }
 0x409   : > { %4380 = vst [vmem:[%s7091_s7 + $0x38] sm:$0xff] %v4369_v57 }
 0x40a PF: > { %s15_s20 = sadd.s32 1, %s5137_s20   ;;  %s7209_s18 = smov %s5133_s19 }
 0x40b   : > { %p12_p5 = scmp.ge.s32.totalorder %s15_s20, 4   ;;  %s7210_s19 = smov %s7212_s21 }
 0x40d   :  { %14 = sbr.rel (!%p12_p5) target bundleno = 2 (0x2), region = 70 }

</bundles_post_ra>
